<compile_context>
chip_gen: v5e
topology: v5e:2x2
jax: 0.10.0
libtpu: 0.0.40
codegen_flags: <defaults>
</compile_context>

<pallas_src>
import math
from functools import partial

import jax
import jax.numpy as jnp
from jax.experimental import pallas as pl
from jax.experimental.pallas import tpu as pltpu

BN_EPS = 1e-3

# lane-dense padded widths (multiples of 128)
CPAD = 128    # 16 / 24 / 64 real channels -> 128
CLAST = 256   # 144 (last conv)            -> 256
HID = 128     # 64  (pred_classifier)      -> 128
OUTP = 128    # 1   (num_classes)          -> 128
K0 = 128      # 27  (3x3x3 im2col K)       -> 128

VMEM_LIMIT = 32 * 1024 * 1024
_CPARAMS_GRID = pltpu.CompilerParams(dimension_semantics=("parallel",),
                                     vmem_limit_bytes=VMEM_LIMIT)
_CPARAMS_FLAT = pltpu.CompilerParams(vmem_limit_bytes=VMEM_LIMIT)


# ----------------------------- small helpers ---------------------------------
def _round_up(x, m):
    return ((x + m - 1) // m) * m


def _hardswish(x):
    return x * (jnp.clip(x + 3.0, 0.0, 6.0) * (1.0 / 6.0))


# --------------- kernel 1: whole feature extractor, one image per grid step ---
def _features_kernel(p0_ref, c0w_ref, c0b_ref,
                     dw1w_ref, dw1b_ref, sew1_ref, seb1_ref, sew2_ref, seb2_ref,
                     prw_ref, prb_ref, exw_ref, exb_ref,
                     dw2w_ref, dw2b_ref, plw_ref, plb_ref,
                     feat_ref, hbuf, dwbuf, *, H1, W1, Ho, Wo):
    # (1) first conv 3x3 s2 (+folded BN +hardswish) from pre-built im2col slab
    y0 = _hardswish(jnp.dot(p0_ref[0], c0w_ref[...],
                            preferred_element_type=jnp.float32) + c0b_ref[...])  # (HW, C)

    # (2) block 1: depthwise 3x3 s1 (+ReLU) through an in-VMEM zero halo buffer
    hbuf[...] = jnp.zeros_like(hbuf)
    for h in range(H1):
        hbuf[h + 1, 1:1 + W1, :] = y0[h * W1:(h + 1) * W1, :]
    acc = None
    for dy in range(3):
        for dx in range(3):
            tap = hbuf[dy:dy + H1, dx:dx + W1, :]                 # (H1, W1, C)
            contrib = tap * dw1w_ref[dy * 3 + dx]                 # * (C,)
            acc = contrib if acc is None else acc + contrib
    d = jnp.maximum(acc + dw1b_ref[...], 0.0).reshape(H1 * W1, CPAD)

    # squeeze & excite (delta = ReLU, sigma = hard-sigmoid)
    m = jnp.mean(d, axis=0, keepdims=True)                        # (1, C)
    s = jnp.dot(m.astype(jnp.bfloat16), sew1_ref[...],
                preferred_element_type=jnp.float32) + seb1_ref[...]
    s = jnp.maximum(s, 0.0)
    s = jnp.dot(s.astype(jnp.bfloat16), sew2_ref[...],
                preferred_element_type=jnp.float32) + seb2_ref[...]
    s = jnp.clip(s + 3.0, 0.0, 6.0) * (1.0 / 6.0)
    d = d * s

    # 1x1 projection (folded BN, no activation) + residual
    y1 = jnp.dot(d.astype(jnp.bfloat16), prw_ref[...],
                 preferred_element_type=jnp.float32) + prb_ref[...] + y0

    # (3) block 2 expand 1x1 (+folded BN +hardswish)
    e = _hardswish(jnp.dot(y1.astype(jnp.bfloat16), exw_ref[...],
                           preferred_element_type=jnp.float32) + exb_ref[...])

    # (4) block 2 depthwise 3x3 s2 (+hardswish): contiguous 3x3 windows on halo
    for h in range(H1):
        hbuf[h + 1, 1:1 + W1, :] = e[h * W1:(h + 1) * W1, :]      # borders stay 0
    wv = dw2w_ref[...]                                            # (3, 3, C)
    bvec = dw2b_ref[0]                                            # (C,)
    for i in range(Ho):
        for j in range(Wo):
            win = hbuf[2 * i:2 * i + 3, 2 * j:2 * j + 3, :]       # (3, 3, C)
            prod = win * wv
            t = prod[0] + prod[1] + prod[2]                       # (3, C)
            t = t[0] + t[1] + t[2]                                # (C,)
            dwbuf[i * Wo + j, :] = _hardswish(t + bvec)

    # (5) folded [1x1 project @ last 1x1 conv] (+hardswish) -> global avg pool
    z = _hardswish(jnp.dot(dwbuf[...].astype(jnp.bfloat16), plw_ref[...],
                           preferred_element_type=jnp.float32) + plb_ref[...])
    feat_ref[0] = jnp.mean(z, axis=0, keepdims=True)              # (1, CLAST)


def features_fused(p0, P, H1, W1):
    N = p0.shape[0]
    Ho = (H1 - 1) // 2 + 1
    Wo = (W1 - 1) // 2 + 1
    Wh = _round_up(W1 + 2, 8)

    def bspec(shape):
        return pl.BlockSpec(shape, lambda n, _s=len(shape): (0,) * _s)

    kern = partial(_features_kernel, H1=H1, W1=W1, Ho=Ho, Wo=Wo)
    return pl.pallas_call(
        kern,
        grid=(N,),
        out_shape=jax.ShapeDtypeStruct((N, 1, CLAST), jnp.float32),
        in_specs=[
            pl.BlockSpec((1, H1 * W1, K0), lambda n: (n, 0, 0)),
            bspec((K0, CPAD)), bspec((1, CPAD)),
            bspec((16, CPAD)), bspec((1, CPAD)),
            bspec((CPAD, CPAD)), bspec((1, CPAD)),
            bspec((CPAD, CPAD)), bspec((1, CPAD)),
            bspec((CPAD, CPAD)), bspec((1, CPAD)),
            bspec((CPAD, CPAD)), bspec((1, CPAD)),
            bspec((3, 3, CPAD)), bspec((1, CPAD)),
            bspec((CPAD, CLAST)), bspec((1, CLAST)),
        ],
        out_specs=pl.BlockSpec((1, 1, CLAST), lambda n: (n, 0, 0)),
        scratch_shapes=[pltpu.VMEM((H1 + 2, Wh, CPAD), jnp.float32),
                        pltpu.VMEM((Ho * Wo, CPAD), jnp.float32)],
        compiler_params=_CPARAMS_GRID,
    )(p0, P["conv0_w"], P["conv0_b"],
      P["b1_dw_w"], P["b1_dw_b"],
      P["b1_se_w1"], P["b1_se_b1"], P["b1_se_w2"], P["b1_se_b2"],
      P["b1_pr_w"], P["b1_pr_b"],
      P["b2_ex_w"], P["b2_ex_b"],
      P["b2_dw_w"], P["b2_dw_b"],
      P["pl_w"], P["pl_b"])


# --------------- kernel 2: classifier head batched across all images ---------
def _head_kernel(f_ref, w1_ref, b1_ref, w2_ref, b2_ref, o_ref):
    feats = f_ref[...][:, 0, :]                                   # (N, CLAST)
    h = _hardswish(jnp.dot(feats.astype(jnp.bfloat16), w1_ref[...],
                           preferred_element_type=jnp.float32) + b1_ref[...])
    # TODO(synk): nn.Dropout(p=0.2) is an identity in inference mode.
    logits = jnp.dot(h.astype(jnp.bfloat16), w2_ref[...],
                     preferred_element_type=jnp.float32) + b2_ref[...]
    o_ref[...] = 1.0 / (1.0 + jnp.exp(-logits))


def head_fused(feats, P):
    N = feats.shape[0]
    return pl.pallas_call(
        _head_kernel,
        out_shape=jax.ShapeDtypeStruct((N, OUTP), jnp.float32),
        compiler_params=_CPARAMS_FLAT,
    )(feats, P["fc1_w"], P["fc1_b"], P["fc2_w"], P["fc2_b"])


# ----------------------------- parameters ------------------------------------
# MobileNetV3 config (same as the PyTorch spec instantiation):
#   InvertedResidualConfig(16, 3, 16, 16, use_se=True,  'RE', stride=1, dil=1, 1.0)
#   InvertedResidualConfig(16, 3, 64, 24, use_se=False, 'HS', stride=2, dil=1, 1.0)
#   last_channel = 64, num_classes = 1
def init_params(key):
    keys = jax.random.split(key, 11)
    s_bn = 1.0 / math.sqrt(1.0 + BN_EPS)   # folded BN (gamma=1, var=1, mean=0)

    def kconv(k, shape, fan_out):          # kaiming_normal, fan_out mode
        return (math.sqrt(2.0 / fan_out) * jax.random.normal(k, shape)).astype(jnp.float32)

    def pad_w(w, K, N):                    # zero-pad a (k, n) matrix to (K, N)
        return jnp.pad(w, ((0, K - w.shape[0]), (0, N - w.shape[1])))

    def zbias(N):
        return jnp.zeros((1, N), jnp.float32)

    P = {}
    # first conv 3x3 s2: 3 -> 16, BN folded, Hardswish
    P["conv0_w"] = pad_w(kconv(keys[0], (27, 16), 16 * 9) * s_bn, K0, CPAD).astype(jnp.bfloat16)
    P["conv0_b"] = zbias(CPAD)
    # block 1: dw 3x3 s1 (ReLU) + SE(16->8->16) + project 1x1 + residual
    dw1 = kconv(keys[1], (9, 16), 16 * 9) * s_bn
    P["b1_dw_w"] = pad_w(dw1, 16, CPAD)                            # (16,128) f32
    P["b1_dw_b"] = zbias(CPAD)
    P["b1_se_w1"] = pad_w(kconv(keys[2], (16, 8), 8), CPAD, CPAD).astype(jnp.bfloat16)
    P["b1_se_b1"] = zbias(CPAD)
    P["b1_se_w2"] = pad_w(kconv(keys[3], (8, 16), 16), CPAD, CPAD).astype(jnp.bfloat16)
    P["b1_se_b2"] = zbias(CPAD)
    P["b1_pr_w"] = pad_w(kconv(keys[4], (16, 16), 16) * s_bn, CPAD, CPAD).astype(jnp.bfloat16)
    P["b1_pr_b"] = zbias(CPAD)
    # block 2: expand 1x1 16->64 (HS) + dw 3x3 s2 (HS) + project 1x1 64->24
    P["b2_ex_w"] = pad_w(kconv(keys[5], (16, 64), 64) * s_bn, CPAD, CPAD).astype(jnp.bfloat16)
    P["b2_ex_b"] = zbias(CPAD)
    dw2 = kconv(keys[6], (9, 64), 64 * 9) * s_bn
    P["b2_dw_w"] = jnp.pad(dw2, ((0, 0), (0, CPAD - 64))).reshape(3, 3, CPAD)   # f32
    P["b2_dw_b"] = zbias(CPAD)
    # fold activation-free [project 1x1 64->24 (BN)] @ [last conv 1x1 24->144 (BN)]
    prw = pad_w(kconv(keys[7], (64, 24), 24) * s_bn, CPAD, CPAD)   # f32 (128,128)
    prb = zbias(CPAD)
    lcw = pad_w(kconv(keys[8], (24, 144), 144) * s_bn, CPAD, CLAST)  # f32 (128,256)
    lcb = zbias(CLAST)
    P["pl_w"] = jnp.dot(prw, lcw).astype(jnp.bfloat16)             # (128,256)
    P["pl_b"] = jnp.dot(prb, lcw) + lcb                            # (1,256) f32
    # pred_classifier Linear(144, 64) + Hardswish; classifier Linear(64, 1)
    P["fc1_w"] = pad_w((0.01 * jax.random.normal(keys[9], (144, 64))).astype(jnp.float32),
                       CLAST, HID).astype(jnp.bfloat16)
    P["fc1_b"] = zbias(HID)
    P["fc2_w"] = pad_w((0.01 * jax.random.normal(keys[10], (64, 1))).astype(jnp.float32),
                       HID, OUTP).astype(jnp.bfloat16)
    P["fc2_b"] = zbias(OUTP)
    return P


# ----------------------------- forward ----------------------------------------
def mobilenet_v3_forward(x_nchw, P):
    x = jnp.transpose(x_nchw, (0, 2, 3, 1)).astype(jnp.float32)   # NCHW -> NHWC
    N, H, W, Cin = x.shape
    H1 = (H - 1) // 2 + 1
    W1 = (W - 1) // 2 + 1
    assert (H1 * W1) % 8 == 0 and H1 >= 3 and W1 >= 3

    # conv0 im2col (stride 2, pad 1, k 3) on the tiny raw input, stored bf16 and
    # lane-padded so kernel 1 only does a lane-dense matmul.
    # TODO(synk): could be formed in-kernel, but the 3-channel input makes the
    # in-kernel gather awkward for negligible gain at this size.
    xp = jnp.pad(x, ((0, 0), (1, 1), (1, 1), (0, 0)))
    pieces = [xp[:, dy:dy + 2 * H1:2, dx:dx + 2 * W1:2, :]
              for dy in range(3) for dx in range(3)]
    p0 = jnp.concatenate(pieces, axis=-1).reshape(N, H1 * W1, 9 * Cin)
    p0 = jnp.pad(p0, ((0, 0), (0, 0), (0, K0 - 9 * Cin))).astype(jnp.bfloat16)

    feats = features_fused(p0, P, H1, W1)                         # (N, 1, CLAST)
    probs = head_fused(feats, P)                                  # (N, OUTP)
    return probs[:, :1]                                           # (N, num_classes=1)


if __name__ == "__main__":
    key = jax.random.PRNGKey(0)
    pkey, xkey = jax.random.split(key)
    params = init_params(pkey)
    x = jax.random.normal(xkey, (2, 3, 16, 16), jnp.float32)      # NCHW like PyTorch
    fwd = jax.jit(mobilenet_v3_forward)
    out = fwd(x, params)
    jax.block_until_ready(out)
    assert out.shape == (2, 1), out.shape
    assert bool(jnp.all(jnp.isfinite(out)))
    assert bool(jnp.all((out >= 0.0) & (out <= 1.0)))
    print("KERNEL_OK")
</pallas_src>

<mosaic_0001>
module attributes {stable_mosaic.version = 11 : i64} {
  func.func @_head_kernel(%arg0: memref<2x1x256xf32, #tpu.memory_space<vmem>>, %arg1: memref<256x128xbf16, #tpu.memory_space<vmem>>, %arg2: memref<1x128xf32, #tpu.memory_space<vmem>>, %arg3: memref<128x128xbf16, #tpu.memory_space<vmem>>, %arg4: memref<1x128xf32, #tpu.memory_space<vmem>>, %arg5: memref<2x128xf32, #tpu.memory_space<vmem>>) attributes {dimension_semantics = [], scalar_prefetch = 0 : i64, scratch_operands = 0 : i64, tpu.core_type = #tpu.core_type<tc>} {
    %c0 = arith.constant 0 : index
    %c0_0 = arith.constant 0 : index
    %c0_1 = arith.constant 0 : index
    %0 = vector.load %arg0[%c0, %c0_0, %c0_1] : memref<2x1x256xf32, #tpu.memory_space<vmem>>, vector<2x1x256xf32>
    %1 = vector.shape_cast %0 : vector<2x1x256xf32> to vector<2x256xf32>
    %2 = arith.truncf %1 : vector<2x256xf32> to vector<2x256xbf16>
    %c0_2 = arith.constant 0 : index
    %c0_3 = arith.constant 0 : index
    %3 = vector.load %arg1[%c0_2, %c0_3] : memref<256x128xbf16, #tpu.memory_space<vmem>>, vector<256x128xbf16>
    %cst = arith.constant dense<0.000000e+00> : vector<2x128xf32>
    %4 = tpu.matmul %2, %3, %cst {dimension_numbers = #tpu.dot_dimension_numbers<[1], [0], [0], [1], [0, 0, 1, 1], [], []>} : vector<2x256xbf16>, vector<256x128xbf16>, vector<2x128xf32> -> vector<2x128xf32>
    %c0_4 = arith.constant 0 : index
    %c0_5 = arith.constant 0 : index
    %5 = vector.load %arg2[%c0_4, %c0_5] : memref<1x128xf32, #tpu.memory_space<vmem>>, vector<1x128xf32>
    %6 = vector.broadcast %5 : vector<1x128xf32> to vector<2x128xf32>
    %7 = arith.addf %4, %6 : vector<2x128xf32>
    %cst_6 = arith.constant 3.000000e+00 : f32
    %8 = vector.broadcast %cst_6 : f32 to vector<2x128xf32>
    %9 = arith.addf %7, %8 : vector<2x128xf32>
    %cst_7 = arith.constant 0.000000e+00 : f32
    %cst_8 = arith.constant 6.000000e+00 : f32
    %10 = vector.broadcast %cst_7 : f32 to vector<2x128xf32>
    %11 = arith.maximumf %10, %9 : vector<2x128xf32>
    %12 = vector.broadcast %cst_8 : f32 to vector<2x128xf32>
    %13 = arith.minimumf %12, %11 : vector<2x128xf32>
    %cst_9 = arith.constant 0.166666672 : f32
    %14 = vector.broadcast %cst_9 : f32 to vector<2x128xf32>
    %15 = arith.mulf %13, %14 : vector<2x128xf32>
    %16 = arith.mulf %7, %15 : vector<2x128xf32>
    %17 = arith.truncf %16 : vector<2x128xf32> to vector<2x128xbf16>
    %c0_10 = arith.constant 0 : index
    %c0_11 = arith.constant 0 : index
    %18 = vector.load %arg3[%c0_10, %c0_11] : memref<128x128xbf16, #tpu.memory_space<vmem>>, vector<128x128xbf16>
    %cst_12 = arith.constant dense<0.000000e+00> : vector<2x128xf32>
    %19 = tpu.matmul %17, %18, %cst_12 {dimension_numbers = #tpu.dot_dimension_numbers<[1], [0], [0], [1], [0, 0, 1, 1], [], []>} : vector<2x128xbf16>, vector<128x128xbf16>, vector<2x128xf32> -> vector<2x128xf32>
    %c0_13 = arith.constant 0 : index
    %c0_14 = arith.constant 0 : index
    %20 = vector.load %arg4[%c0_13, %c0_14] : memref<1x128xf32, #tpu.memory_space<vmem>>, vector<1x128xf32>
    %21 = vector.broadcast %20 : vector<1x128xf32> to vector<2x128xf32>
    %22 = arith.addf %19, %21 : vector<2x128xf32>
    %cst_15 = arith.constant 0.000000e+00 : f32
    %23 = vector.broadcast %cst_15 : f32 to vector<2x128xf32>
    %24 = arith.subf %23, %22 : vector<2x128xf32>
    %25 = math.exp %24 : vector<2x128xf32>
    %cst_16 = arith.constant 1.000000e+00 : f32
    %26 = vector.broadcast %cst_16 : f32 to vector<2x128xf32>
    %27 = arith.addf %26, %25 : vector<2x128xf32>
    %cst_17 = arith.constant 1.000000e+00 : f32
    %28 = vector.broadcast %cst_17 : f32 to vector<2x128xf32>
    %29 = arith.divf %28, %27 : vector<2x128xf32>
    %c0_18 = arith.constant 0 : index
    %c0_19 = arith.constant 0 : index
    %30 = vector.load %arg5[%c0_18, %c0_19] : memref<2x128xf32, #tpu.memory_space<vmem>>, vector<2x128xf32>
    tpu.vector_store %arg5[%c0_18, %c0_19], %29 {strides = array<i32>} : memref<2x128xf32, #tpu.memory_space<vmem>>, vector<2x128xf32>,
    return
  }
}

module attributes {stable_mosaic.version = 11 : i64} {
  func.func @_features_kernel(%arg0: i32, %arg1: memref<1x64x128xbf16, #tpu.memory_space<vmem>>, %arg2: memref<128x128xbf16, #tpu.memory_space<vmem>>, %arg3: memref<1x128xf32, #tpu.memory_space<vmem>>, %arg4: memref<16x128xf32, #tpu.memory_space<vmem>>, %arg5: memref<1x128xf32, #tpu.memory_space<vmem>>, %arg6: memref<128x128xbf16, #tpu.memory_space<vmem>>, %arg7: memref<1x128xf32, #tpu.memory_space<vmem>>, %arg8: memref<128x128xbf16, #tpu.memory_space<vmem>>, %arg9: memref<1x128xf32, #tpu.memory_space<vmem>>, %arg10: memref<128x128xbf16, #tpu.memory_space<vmem>>, %arg11: memref<1x128xf32, #tpu.memory_space<vmem>>, %arg12: memref<128x128xbf16, #tpu.memory_space<vmem>>, %arg13: memref<1x128xf32, #tpu.memory_space<vmem>>, %arg14: memref<3x3x128xf32, #tpu.memory_space<vmem>>, %arg15: memref<1x128xf32, #tpu.memory_space<vmem>>, %arg16: memref<128x256xbf16, #tpu.memory_space<vmem>>, %arg17: memref<1x256xf32, #tpu.memory_space<vmem>>, %arg18: memref<1x1x256xf32, #tpu.memory_space<vmem>>, %arg19: memref<10x16x128xf32, #tpu.memory_space<vmem>>, %arg20: memref<16x128xf32, #tpu.memory_space<vmem>>) attributes {dimension_semantics = [#tpu.dimension_semantics<parallel>], iteration_bounds = array<i64: 2>, scalar_prefetch = 0 : i64, scratch_operands = 2 : i64, tpu.core_type = #tpu.core_type<tc>, window_params = [{transform_indices = @transform_0, window_bounds = array<i64: 1, 64, 128>}, {pipeline_mode = #tpu.pipeline_mode<synchronous>, transform_indices = @transform_1, window_bounds = array<i64: 128, 128>}, {pipeline_mode = #tpu.pipeline_mode<synchronous>, transform_indices = @transform_2, window_bounds = array<i64: 1, 128>}, {pipeline_mode = #tpu.pipeline_mode<synchronous>, transform_indices = @transform_3, window_bounds = array<i64: 16, 128>}, {pipeline_mode = #tpu.pipeline_mode<synchronous>, transform_indices = @transform_4, window_bounds = array<i64: 1, 128>}, {pipeline_mode = #tpu.pipeline_mode<synchronous>, transform_indices = @transform_5, window_bounds = array<i64: 128, 128>}, {pipeline_mode = #tpu.pipeline_mode<synchronous>, transform_indices = @transform_6, window_bounds = array<i64: 1, 128>}, {pipeline_mode = #tpu.pipeline_mode<synchronous>, transform_indices = @transform_7, window_bounds = array<i64: 128, 128>}, {pipeline_mode = #tpu.pipeline_mode<synchronous>, transform_indices = @transform_8, window_bounds = array<i64: 1, 128>}, {pipeline_mode = #tpu.pipeline_mode<synchronous>, transform_indices = @transform_9, window_bounds = array<i64: 128, 128>}, {pipeline_mode = #tpu.pipeline_mode<synchronous>, transform_indices = @transform_10, window_bounds = array<i64: 1, 128>}, {pipeline_mode = #tpu.pipeline_mode<synchronous>, transform_indices = @transform_11, window_bounds = array<i64: 128, 128>}, {pipeline_mode = #tpu.pipeline_mode<synchronous>, transform_indices = @transform_12, window_bounds = array<i64: 1, 128>}, {pipeline_mode = #tpu.pipeline_mode<synchronous>, transform_indices = @transform_13, window_bounds = array<i64: 3, 3, 128>}, {pipeline_mode = #tpu.pipeline_mode<synchronous>, transform_indices = @transform_14, window_bounds = array<i64: 1, 128>}, {pipeline_mode = #tpu.pipeline_mode<synchronous>, transform_indices = @transform_15, window_bounds = array<i64: 128, 256>}, {pipeline_mode = #tpu.pipeline_mode<synchronous>, transform_indices = @transform_16, window_bounds = array<i64: 1, 256>}, {transform_indices = @transform_17, window_bounds = array<i64: 1, 1, 256>}]} {
    %c0 = arith.constant 0 : index
    %c0_0 = arith.constant 0 : index
    %c0_1 = arith.constant 0 : index
    %0 = vector.load %arg1[%c0, %c0_0, %c0_1] : memref<1x64x128xbf16, #tpu.memory_space<vmem>>, vector<1x64x128xbf16>
    %1 = vector.shape_cast %0 : vector<1x64x128xbf16> to vector<64x128xbf16>
    %c0_2 = arith.constant 0 : index
    %c0_3 = arith.constant 0 : index
    %2 = vector.load %arg2[%c0_2, %c0_3] : memref<128x128xbf16, #tpu.memory_space<vmem>>, vector<128x128xbf16>
    %cst = arith.constant dense<0.000000e+00> : vector<64x128xf32>
    %3 = tpu.matmul %1, %2, %cst {dimension_numbers = #tpu.dot_dimension_numbers<[1], [0], [0], [1], [0, 0, 1, 1], [], []>} : vector<64x128xbf16>, vector<128x128xbf16>, vector<64x128xf32> -> vector<64x128xf32>
    %c0_4 = arith.constant 0 : index
    %c0_5 = arith.constant 0 : index
    %4 = vector.load %arg3[%c0_4, %c0_5] : memref<1x128xf32, #tpu.memory_space<vmem>>, vector<1x128xf32>
    %5 = vector.broadcast %4 : vector<1x128xf32> to vector<64x128xf32>
    %6 = arith.addf %3, %5 : vector<64x128xf32>
    %cst_6 = arith.constant 3.000000e+00 : f32
    %7 = vector.broadcast %cst_6 : f32 to vector<64x128xf32>
    %8 = arith.addf %6, %7 : vector<64x128xf32>
    %cst_7 = arith.constant 0.000000e+00 : f32
    %cst_8 = arith.constant 6.000000e+00 : f32
    %9 = vector.broadcast %cst_7 : f32 to vector<64x128xf32>
    %10 = arith.maximumf %9, %8 : vector<64x128xf32>
    %11 = vector.broadcast %cst_8 : f32 to vector<64x128xf32>
    %12 = arith.minimumf %11, %10 : vector<64x128xf32>
    %cst_9 = arith.constant 0.166666672 : f32
    %13 = vector.broadcast %cst_9 : f32 to vector<64x128xf32>
    %14 = arith.mulf %12, %13 : vector<64x128xf32>
    %15 = arith.mulf %6, %14 : vector<64x128xf32>
    %cst_10 = arith.constant 0.000000e+00 : f32
    %16 = vector.broadcast %cst_10 : f32 to vector<10x16x128xf32>
    %c0_11 = arith.constant 0 : index
    %c0_12 = arith.constant 0 : index
    %c0_13 = arith.constant 0 : index
    %17 = vector.load %arg19[%c0_11, %c0_12, %c0_13] : memref<10x16x128xf32, #tpu.memory_space<vmem>>, vector<10x16x128xf32>
    tpu.vector_store %arg19[%c0_11, %c0_12, %c0_13], %16 {strides = array<i32>} : memref<10x16x128xf32, #tpu.memory_space<vmem>>, vector<10x16x128xf32>,
    %18 = vector.extract_strided_slice %15 {offsets = [0, 0], sizes = [8, 128], strides = [1, 1]} : vector<64x128xf32> to vector<8x128xf32>
    %c1 = arith.constant 1 : index
    %c1_14 = arith.constant 1 : index
    %c0_15 = arith.constant 0 : index
    %19 = vector.load %arg19[%c1, %c1_14, %c0_15] : memref<10x16x128xf32, #tpu.memory_space<vmem>>, vector<1x8x128xf32>
    %20 = vector.shape_cast %19 : vector<1x8x128xf32> to vector<8x128xf32>
    %21 = vector.shape_cast %18 : vector<8x128xf32> to vector<1x8x128xf32>
    tpu.vector_store %arg19[%c1, %c1_14, %c0_15], %21 {strides = array<i32>} : memref<10x16x128xf32, #tpu.memory_space<vmem>>, vector<1x8x128xf32>,
    %22 = vector.extract_strided_slice %15 {offsets = [8, 0], sizes = [8, 128], strides = [1, 1]} : vector<64x128xf32> to vector<8x128xf32>
    %c2 = arith.constant 2 : index
    %c1_16 = arith.constant 1 : index
    %c0_17 = arith.constant 0 : index
    %23 = vector.load %arg19[%c2, %c1_16, %c0_17] : memref<10x16x128xf32, #tpu.memory_space<vmem>>, vector<1x8x128xf32>
    %24 = vector.shape_cast %23 : vector<1x8x128xf32> to vector<8x128xf32>
    %25 = vector.shape_cast %22 : vector<8x128xf32> to vector<1x8x128xf32>
    tpu.vector_store %arg19[%c2, %c1_16, %c0_17], %25 {strides = array<i32>} : memref<10x16x128xf32, #tpu.memory_space<vmem>>, vector<1x8x128xf32>,
    %26 = vector.extract_strided_slice %15 {offsets = [16, 0], sizes = [8, 128], strides = [1, 1]} : vector<64x128xf32> to vector<8x128xf32>
    %c3 = arith.constant 3 : index
    %c1_18 = arith.constant 1 : index
    %c0_19 = arith.constant 0 : index
    %27 = vector.load %arg19[%c3, %c1_18, %c0_19] : memref<10x16x128xf32, #tpu.memory_space<vmem>>, vector<1x8x128xf32>
    %28 = vector.shape_cast %27 : vector<1x8x128xf32> to vector<8x128xf32>
    %29 = vector.shape_cast %26 : vector<8x128xf32> to vector<1x8x128xf32>
    tpu.vector_store %arg19[%c3, %c1_18, %c0_19], %29 {strides = array<i32>} : memref<10x16x128xf32, #tpu.memory_space<vmem>>, vector<1x8x128xf32>,
    %30 = vector.extract_strided_slice %15 {offsets = [24, 0], sizes = [8, 128], strides = [1, 1]} : vector<64x128xf32> to vector<8x128xf32>
    %c4 = arith.constant 4 : index
    %c1_20 = arith.constant 1 : index
    %c0_21 = arith.constant 0 : index
    %31 = vector.load %arg19[%c4, %c1_20, %c0_21] : memref<10x16x128xf32, #tpu.memory_space<vmem>>, vector<1x8x128xf32>
    %32 = vector.shape_cast %31 : vector<1x8x128xf32> to vector<8x128xf32>
    %33 = vector.shape_cast %30 : vector<8x128xf32> to vector<1x8x128xf32>
    tpu.vector_store %arg19[%c4, %c1_20, %c0_21], %33 {strides = array<i32>} : memref<10x16x128xf32, #tpu.memory_space<vmem>>, vector<1x8x128xf32>,
    %34 = vector.extract_strided_slice %15 {offsets = [32, 0], sizes = [8, 128], strides = [1, 1]} : vector<64x128xf32> to vector<8x128xf32>
    %c5 = arith.constant 5 : index
    %c1_22 = arith.constant 1 : index
    %c0_23 = arith.constant 0 : index
    %35 = vector.load %arg19[%c5, %c1_22, %c0_23] : memref<10x16x128xf32, #tpu.memory_space<vmem>>, vector<1x8x128xf32>
    %36 = vector.shape_cast %35 : vector<1x8x128xf32> to vector<8x128xf32>
    %37 = vector.shape_cast %34 : vector<8x128xf32> to vector<1x8x128xf32>
    tpu.vector_store %arg19[%c5, %c1_22, %c0_23], %37 {strides = array<i32>} : memref<10x16x128xf32, #tpu.memory_space<vmem>>, vector<1x8x128xf32>,
    %38 = vector.extract_strided_slice %15 {offsets = [40, 0], sizes = [8, 128], strides = [1, 1]} : vector<64x128xf32> to vector<8x128xf32>
    %c6 = arith.constant 6 : index
    %c1_24 = arith.constant 1 : index
    %c0_25 = arith.constant 0 : index
    %39 = vector.load %arg19[%c6, %c1_24, %c0_25] : memref<10x16x128xf32, #tpu.memory_space<vmem>>, vector<1x8x128xf32>
    %40 = vector.shape_cast %39 : vector<1x8x128xf32> to vector<8x128xf32>
    %41 = vector.shape_cast %38 : vector<8x128xf32> to vector<1x8x128xf32>
    tpu.vector_store %arg19[%c6, %c1_24, %c0_25], %41 {strides = array<i32>} : memref<10x16x128xf32, #tpu.memory_space<vmem>>, vector<1x8x128xf32>,
    %42 = vector.extract_strided_slice %15 {offsets = [48, 0], sizes = [8, 128], strides = [1, 1]} : vector<64x128xf32> to vector<8x128xf32>
    %c7 = arith.constant 7 : index
    %c1_26 = arith.constant 1 : index
    %c0_27 = arith.constant 0 : index
    %43 = vector.load %arg19[%c7, %c1_26, %c0_27] : memref<10x16x128xf32, #tpu.memory_space<vmem>>, vector<1x8x128xf32>
    %44 = vector.shape_cast %43 : vector<1x8x128xf32> to vector<8x128xf32>
    %45 = vector.shape_cast %42 : vector<8x128xf32> to vector<1x8x128xf32>
    tpu.vector_store %arg19[%c7, %c1_26, %c0_27], %45 {strides = array<i32>} : memref<10x16x128xf32, #tpu.memory_space<vmem>>, vector<1x8x128xf32>,
    %46 = vector.extract_strided_slice %15 {offsets = [56, 0], sizes = [8, 128], strides = [1, 1]} : vector<64x128xf32> to vector<8x128xf32>
    %c8 = arith.constant 8 : index
    %c1_28 = arith.constant 1 : index
    %c0_29 = arith.constant 0 : index
    %47 = vector.load %arg19[%c8, %c1_28, %c0_29] : memref<10x16x128xf32, #tpu.memory_space<vmem>>, vector<1x8x128xf32>
    %48 = vector.shape_cast %47 : vector<1x8x128xf32> to vector<8x128xf32>
    %49 = vector.shape_cast %46 : vector<8x128xf32> to vector<1x8x128xf32>
    tpu.vector_store %arg19[%c8, %c1_28, %c0_29], %49 {strides = array<i32>} : memref<10x16x128xf32, #tpu.memory_space<vmem>>, vector<1x8x128xf32>,
    %c0_30 = arith.constant 0 : index
    %c0_31 = arith.constant 0 : index
    %c0_32 = arith.constant 0 : index
    %50 = vector.load %arg19[%c0_30, %c0_31, %c0_32] : memref<10x16x128xf32, #tpu.memory_space<vmem>>, vector<8x8x128xf32>
    %c0_33 = arith.constant 0 : index
    %c0_34 = arith.constant 0 : index
    %51 = vector.load %arg4[%c0_33, %c0_34] : memref<16x128xf32, #tpu.memory_space<vmem>>, vector<1x128xf32>
    %52 = vector.shape_cast %51 : vector<1x128xf32> to vector<128xf32>
    %53 = vector.shape_cast %52 : vector<128xf32> to vector<1x1x128xf32>
    %54 = vector.broadcast %53 : vector<1x1x128xf32> to vector<8x8x128xf32>
    %55 = arith.mulf %50, %54 : vector<8x8x128xf32>
    %c0_35 = arith.constant 0 : index
    %c1_36 = arith.constant 1 : index
    %c0_37 = arith.constant 0 : index
    %56 = vector.load %arg19[%c0_35, %c1_36, %c0_37] : memref<10x16x128xf32, #tpu.memory_space<vmem>>, vector<8x8x128xf32>
    %c1_38 = arith.constant 1 : index
    %c0_39 = arith.constant 0 : index
    %57 = vector.load %arg4[%c1_38, %c0_39] : memref<16x128xf32, #tpu.memory_space<vmem>>, vector<1x128xf32>
    %58 = vector.shape_cast %57 : vector<1x128xf32> to vector<128xf32>
    %59 = vector.shape_cast %58 : vector<128xf32> to vector<1x1x128xf32>
    %60 = vector.broadcast %59 : vector<1x1x128xf32> to vector<8x8x128xf32>
    %61 = arith.mulf %56, %60 : vector<8x8x128xf32>
    %62 = arith.addf %55, %61 : vector<8x8x128xf32>
    %c0_40 = arith.constant 0 : index
    %c2_41 = arith.constant 2 : index
    %c0_42 = arith.constant 0 : index
    %63 = vector.load %arg19[%c0_40, %c2_41, %c0_42] : memref<10x16x128xf32, #tpu.memory_space<vmem>>, vector<8x8x128xf32>
    %c2_43 = arith.constant 2 : index
    %c0_44 = arith.constant 0 : index
    %64 = vector.load %arg4[%c2_43, %c0_44] : memref<16x128xf32, #tpu.memory_space<vmem>>, vector<1x128xf32>
    %65 = vector.shape_cast %64 : vector<1x128xf32> to vector<128xf32>
    %66 = vector.shape_cast %65 : vector<128xf32> to vector<1x1x128xf32>
    %67 = vector.broadcast %66 : vector<1x1x128xf32> to vector<8x8x128xf32>
    %68 = arith.mulf %63, %67 : vector<8x8x128xf32>
    %69 = arith.addf %62, %68 : vector<8x8x128xf32>
    %c1_45 = arith.constant 1 : index
    %c0_46 = arith.constant 0 : index
    %c0_47 = arith.constant 0 : index
    %70 = vector.load %arg19[%c1_45, %c0_46, %c0_47] : memref<10x16x128xf32, #tpu.memory_space<vmem>>, vector<8x8x128xf32>
    %c3_48 = arith.constant 3 : index
    %c0_49 = arith.constant 0 : index
    %71 = vector.load %arg4[%c3_48, %c0_49] : memref<16x128xf32, #tpu.memory_space<vmem>>, vector<1x128xf32>
    %72 = vector.shape_cast %71 : vector<1x128xf32> to vector<128xf32>
    %73 = vector.shape_cast %72 : vector<128xf32> to vector<1x1x128xf32>
    %74 = vector.broadcast %73 : vector<1x1x128xf32> to vector<8x8x128xf32>
    %75 = arith.mulf %70, %74 : vector<8x8x128xf32>
    %76 = arith.addf %69, %75 : vector<8x8x128xf32>
    %c1_50 = arith.constant 1 : index
    %c1_51 = arith.constant 1 : index
    %c0_52 = arith.constant 0 : index
    %77 = vector.load %arg19[%c1_50, %c1_51, %c0_52] : memref<10x16x128xf32, #tpu.memory_space<vmem>>, vector<8x8x128xf32>
    %c4_53 = arith.constant 4 : index
    %c0_54 = arith.constant 0 : index
    %78 = vector.load %arg4[%c4_53, %c0_54] : memref<16x128xf32, #tpu.memory_space<vmem>>, vector<1x128xf32>
    %79 = vector.shape_cast %78 : vector<1x128xf32> to vector<128xf32>
    %80 = vector.shape_cast %79 : vector<128xf32> to vector<1x1x128xf32>
    %81 = vector.broadcast %80 : vector<1x1x128xf32> to vector<8x8x128xf32>
    %82 = arith.mulf %77, %81 : vector<8x8x128xf32>
    %83 = arith.addf %76, %82 : vector<8x8x128xf32>
    %c1_55 = arith.constant 1 : index
    %c2_56 = arith.constant 2 : index
    %c0_57 = arith.constant 0 : index
    %84 = vector.load %arg19[%c1_55, %c2_56, %c0_57] : memref<10x16x128xf32, #tpu.memory_space<vmem>>, vector<8x8x128xf32>
    %c5_58 = arith.constant 5 : index
    %c0_59 = arith.constant 0 : index
    %85 = vector.load %arg4[%c5_58, %c0_59] : memref<16x128xf32, #tpu.memory_space<vmem>>, vector<1x128xf32>
    %86 = vector.shape_cast %85 : vector<1x128xf32> to vector<128xf32>
    %87 = vector.shape_cast %86 : vector<128xf32> to vector<1x1x128xf32>
    %88 = vector.broadcast %87 : vector<1x1x128xf32> to vector<8x8x128xf32>
    %89 = arith.mulf %84, %88 : vector<8x8x128xf32>
    %90 = arith.addf %83, %89 : vector<8x8x128xf32>
    %c2_60 = arith.constant 2 : index
    %c0_61 = arith.constant 0 : index
    %c0_62 = arith.constant 0 : index
    %91 = vector.load %arg19[%c2_60, %c0_61, %c0_62] : memref<10x16x128xf32, #tpu.memory_space<vmem>>, vector<8x8x128xf32>
    %c6_63 = arith.constant 6 : index
    %c0_64 = arith.constant 0 : index
    %92 = vector.load %arg4[%c6_63, %c0_64] : memref<16x128xf32, #tpu.memory_space<vmem>>, vector<1x128xf32>
    %93 = vector.shape_cast %92 : vector<1x128xf32> to vector<128xf32>
    %94 = vector.shape_cast %93 : vector<128xf32> to vector<1x1x128xf32>
    %95 = vector.broadcast %94 : vector<1x1x128xf32> to vector<8x8x128xf32>
    %96 = arith.mulf %91, %95 : vector<8x8x128xf32>
    %97 = arith.addf %90, %96 : vector<8x8x128xf32>
    %c2_65 = arith.constant 2 : index
    %c1_66 = arith.constant 1 : index
    %c0_67 = arith.constant 0 : index
    %98 = vector.load %arg19[%c2_65, %c1_66, %c0_67] : memref<10x16x128xf32, #tpu.memory_space<vmem>>, vector<8x8x128xf32>
    %c7_68 = arith.constant 7 : index
    %c0_69 = arith.constant 0 : index
    %99 = vector.load %arg4[%c7_68, %c0_69] : memref<16x128xf32, #tpu.memory_space<vmem>>, vector<1x128xf32>
    %100 = vector.shape_cast %99 : vector<1x128xf32> to vector<128xf32>
    %101 = vector.shape_cast %100 : vector<128xf32> to vector<1x1x128xf32>
    %102 = vector.broadcast %101 : vector<1x1x128xf32> to vector<8x8x128xf32>
    %103 = arith.mulf %98, %102 : vector<8x8x128xf32>
    %104 = arith.addf %97, %103 : vector<8x8x128xf32>
    %c2_70 = arith.constant 2 : index
    %c2_71 = arith.constant 2 : index
    %c0_72 = arith.constant 0 : index
    %105 = vector.load %arg19[%c2_70, %c2_71, %c0_72] : memref<10x16x128xf32, #tpu.memory_space<vmem>>, vector<8x8x128xf32>
    %c8_73 = arith.constant 8 : index
    %c0_74 = arith.constant 0 : index
    %106 = vector.load %arg4[%c8_73, %c0_74] : memref<16x128xf32, #tpu.memory_space<vmem>>, vector<1x128xf32>
    %107 = vector.shape_cast %106 : vector<1x128xf32> to vector<128xf32>
    %108 = vector.shape_cast %107 : vector<128xf32> to vector<1x1x128xf32>
    %109 = vector.broadcast %108 : vector<1x1x128xf32> to vector<8x8x128xf32>
    %110 = arith.mulf %105, %109 : vector<8x8x128xf32>
    %111 = arith.addf %104, %110 : vector<8x8x128xf32>
    %c0_75 = arith.constant 0 : index
    %c0_76 = arith.constant 0 : index
    %112 = vector.load %arg5[%c0_75, %c0_76] : memref<1x128xf32, #tpu.memory_space<vmem>>, vector<1x128xf32>
    %113 = vector.shape_cast %112 : vector<1x128xf32> to vector<1x1x128xf32>
    %114 = vector.broadcast %113 : vector<1x1x128xf32> to vector<8x8x128xf32>
    %115 = arith.addf %111, %114 : vector<8x8x128xf32>
    %cst_77 = arith.constant 0.000000e+00 : f32
    %116 = vector.broadcast %cst_77 : f32 to vector<8x8x128xf32>
    %117 = arith.maximumf %115, %116 : vector<8x8x128xf32>
    %118 = vector.shape_cast %117 : vector<8x8x128xf32> to vector<64x128xf32>
    %cst_78 = arith.constant dense<0.000000e+00> : vector<128xf32>
    %119 = vector.multi_reduction <add>, %118, %cst_78 [0] : vector<64x128xf32> to vector<128xf32>
    %120 = vector.shape_cast %119 : vector<128xf32> to vector<1x128xf32>
    %cst_79 = arith.constant 6.400000e+01 : f32
    %121 = vector.broadcast %cst_79 : f32 to vector<1x128xf32>
    %122 = arith.divf %120, %121 : vector<1x128xf32>
    %123 = arith.truncf %122 : vector<1x128xf32> to vector<1x128xbf16>
    %c0_80 = arith.constant 0 : index
    %c0_81 = arith.constant 0 : index
    %124 = vector.load %arg6[%c0_80, %c0_81] : memref<128x128xbf16, #tpu.memory_space<vmem>>, vector<128x128xbf16>
    %cst_82 = arith.constant dense<0.000000e+00> : vector<1x128xf32>
    %125 = tpu.matmul %123, %124, %cst_82 {dimension_numbers = #tpu.dot_dimension_numbers<[1], [0], [0], [1], [0, 0, 1, 1], [], []>} : vector<1x128xbf16>, vector<128x128xbf16>, vector<1x128xf32> -> vector<1x128xf32>
    %c0_83 = arith.constant 0 : index
    %c0_84 = arith.constant 0 : index
    %126 = vector.load %arg7[%c0_83, %c0_84] : memref<1x128xf32, #tpu.memory_space<vmem>>, vector<1x128xf32>
    %127 = arith.addf %125, %126 : vector<1x128xf32>
    %cst_85 = arith.constant 0.000000e+00 : f32
    %128 = vector.broadcast %cst_85 : f32 to vector<1x128xf32>
    %129 = arith.maximumf %127, %128 : vector<1x128xf32>
    %130 = arith.truncf %129 : vector<1x128xf32> to vector<1x128xbf16>
    %c0_86 = arith.constant 0 : index
    %c0_87 = arith.constant 0 : index
    %131 = vector.load %arg8[%c0_86, %c0_87] : memref<128x128xbf16, #tpu.memory_space<vmem>>, vector<128x128xbf16>
    %cst_88 = arith.constant dense<0.000000e+00> : vector<1x128xf32>
    %132 = tpu.matmul %130, %131, %cst_88 {dimension_numbers = #tpu.dot_dimension_numbers<[1], [0], [0], [1], [0, 0, 1, 1], [], []>} : vector<1x128xbf16>, vector<128x128xbf16>, vector<1x128xf32> -> vector<1x128xf32>
    %c0_89 = arith.constant 0 : index
    %c0_90 = arith.constant 0 : index
    %133 = vector.load %arg9[%c0_89, %c0_90] : memref<1x128xf32, #tpu.memory_space<vmem>>, vector<1x128xf32>
    %134 = arith.addf %132, %133 : vector<1x128xf32>
    %cst_91 = arith.constant 3.000000e+00 : f32
    %135 = vector.broadcast %cst_91 : f32 to vector<1x128xf32>
    %136 = arith.addf %134, %135 : vector<1x128xf32>
    %cst_92 = arith.constant 0.000000e+00 : f32
    %cst_93 = arith.constant 6.000000e+00 : f32
    %137 = vector.broadcast %cst_92 : f32 to vector<1x128xf32>
    %138 = arith.maximumf %137, %136 : vector<1x128xf32>
    %139 = vector.broadcast %cst_93 : f32 to vector<1x128xf32>
    %140 = arith.minimumf %139, %138 : vector<1x128xf32>
    %cst_94 = arith.constant 0.166666672 : f32
    %141 = vector.broadcast %cst_94 : f32 to vector<1x128xf32>
    %142 = arith.mulf %140, %141 : vector<1x128xf32>
    %143 = vector.broadcast %142 : vector<1x128xf32> to vector<64x128xf32>
    %144 = arith.mulf %118, %143 : vector<64x128xf32>
    %145 = arith.truncf %144 : vector<64x128xf32> to vector<64x128xbf16>
    %c0_95 = arith.constant 0 : index
    %c0_96 = arith.constant 0 : index
    %146 = vector.load %arg10[%c0_95, %c0_96] : memref<128x128xbf16, #tpu.memory_space<vmem>>, vector<128x128xbf16>
    %cst_97 = arith.constant dense<0.000000e+00> : vector<64x128xf32>
    %147 = tpu.matmul %145, %146, %cst_97 {dimension_numbers = #tpu.dot_dimension_numbers<[1], [0], [0], [1], [0, 0, 1, 1], [], []>} : vector<64x128xbf16>, vector<128x128xbf16>, vector<64x128xf32> -> vector<64x128xf32>
    %c0_98 = arith.constant 0 : index
    %c0_99 = arith.constant 0 : index
    %148 = vector.load %arg11[%c0_98, %c0_99] : memref<1x128xf32, #tpu.memory_space<vmem>>, vector<1x128xf32>
    %149 = vector.broadcast %148 : vector<1x128xf32> to vector<64x128xf32>
    %150 = arith.addf %147, %149 : vector<64x128xf32>
    %151 = arith.addf %150, %15 : vector<64x128xf32>
    %152 = arith.truncf %151 : vector<64x128xf32> to vector<64x128xbf16>
    %c0_100 = arith.constant 0 : index
    %c0_101 = arith.constant 0 : index
    %153 = vector.load %arg12[%c0_100, %c0_101] : memref<128x128xbf16, #tpu.memory_space<vmem>>, vector<128x128xbf16>
    %cst_102 = arith.constant dense<0.000000e+00> : vector<64x128xf32>
    %154 = tpu.matmul %152, %153, %cst_102 {dimension_numbers = #tpu.dot_dimension_numbers<[1], [0], [0], [1], [0, 0, 1, 1], [], []>} : vector<64x128xbf16>, vector<128x128xbf16>, vector<64x128xf32> -> vector<64x128xf32>
    %c0_103 = arith.constant 0 : index
    %c0_104 = arith.constant 0 : index
    %155 = vector.load %arg13[%c0_103, %c0_104] : memref<1x128xf32, #tpu.memory_space<vmem>>, vector<1x128xf32>
    %156 = vector.broadcast %155 : vector<1x128xf32> to vector<64x128xf32>
    %157 = arith.addf %154, %156 : vector<64x128xf32>
    %cst_105 = arith.constant 3.000000e+00 : f32
    %158 = vector.broadcast %cst_105 : f32 to vector<64x128xf32>
    %159 = arith.addf %157, %158 : vector<64x128xf32>
    %cst_106 = arith.constant 0.000000e+00 : f32
    %cst_107 = arith.constant 6.000000e+00 : f32
    %160 = vector.broadcast %cst_106 : f32 to vector<64x128xf32>
    %161 = arith.maximumf %160, %159 : vector<64x128xf32>
    %162 = vector.broadcast %cst_107 : f32 to vector<64x128xf32>
    %163 = arith.minimumf %162, %161 : vector<64x128xf32>
    %cst_108 = arith.constant 0.166666672 : f32
    %164 = vector.broadcast %cst_108 : f32 to vector<64x128xf32>
    %165 = arith.mulf %163, %164 : vector<64x128xf32>
    %166 = arith.mulf %157, %165 : vector<64x128xf32>
    %167 = vector.extract_strided_slice %166 {offsets = [0, 0], sizes = [8, 128], strides = [1, 1]} : vector<64x128xf32> to vector<8x128xf32>
    %c1_109 = arith.constant 1 : index
    %c1_110 = arith.constant 1 : index
    %c0_111 = arith.constant 0 : index
    %168 = vector.load %arg19[%c1_109, %c1_110, %c0_111] : memref<10x16x128xf32, #tpu.memory_space<vmem>>, vector<1x8x128xf32>
    %169 = vector.shape_cast %168 : vector<1x8x128xf32> to vector<8x128xf32>
    %170 = vector.shape_cast %167 : vector<8x128xf32> to vector<1x8x128xf32>
    tpu.vector_store %arg19[%c1_109, %c1_110, %c0_111], %170 {strides = array<i32>} : memref<10x16x128xf32, #tpu.memory_space<vmem>>, vector<1x8x128xf32>,
    %171 = vector.extract_strided_slice %166 {offsets = [8, 0], sizes = [8, 128], strides = [1, 1]} : vector<64x128xf32> to vector<8x128xf32>
    %c2_112 = arith.constant 2 : index
    %c1_113 = arith.constant 1 : index
    %c0_114 = arith.constant 0 : index
    %172 = vector.load %arg19[%c2_112, %c1_113, %c0_114] : memref<10x16x128xf32, #tpu.memory_space<vmem>>, vector<1x8x128xf32>
    %173 = vector.shape_cast %172 : vector<1x8x128xf32> to vector<8x128xf32>
    %174 = vector.shape_cast %171 : vector<8x128xf32> to vector<1x8x128xf32>
    tpu.vector_store %arg19[%c2_112, %c1_113, %c0_114], %174 {strides = array<i32>} : memref<10x16x128xf32, #tpu.memory_space<vmem>>, vector<1x8x128xf32>,
    %175 = vector.extract_strided_slice %166 {offsets = [16, 0], sizes = [8, 128], strides = [1, 1]} : vector<64x128xf32> to vector<8x128xf32>
    %c3_115 = arith.constant 3 : index
    %c1_116 = arith.constant 1 : index
    %c0_117 = arith.constant 0 : index
    %176 = vector.load %arg19[%c3_115, %c1_116, %c0_117] : memref<10x16x128xf32, #tpu.memory_space<vmem>>, vector<1x8x128xf32>
    %177 = vector.shape_cast %176 : vector<1x8x128xf32> to vector<8x128xf32>
    %178 = vector.shape_cast %175 : vector<8x128xf32> to vector<1x8x128xf32>
    tpu.vector_store %arg19[%c3_115, %c1_116, %c0_117], %178 {strides = array<i32>} : memref<10x16x128xf32, #tpu.memory_space<vmem>>, vector<1x8x128xf32>,
    %179 = vector.extract_strided_slice %166 {offsets = [24, 0], sizes = [8, 128], strides = [1, 1]} : vector<64x128xf32> to vector<8x128xf32>
    %c4_118 = arith.constant 4 : index
    %c1_119 = arith.constant 1 : index
    %c0_120 = arith.constant 0 : index
    %180 = vector.load %arg19[%c4_118, %c1_119, %c0_120] : memref<10x16x128xf32, #tpu.memory_space<vmem>>, vector<1x8x128xf32>
    %181 = vector.shape_cast %180 : vector<1x8x128xf32> to vector<8x128xf32>
    %182 = vector.shape_cast %179 : vector<8x128xf32> to vector<1x8x128xf32>
    tpu.vector_store %arg19[%c4_118, %c1_119, %c0_120], %182 {strides = array<i32>} : memref<10x16x128xf32, #tpu.memory_space<vmem>>, vector<1x8x128xf32>,
    %183 = vector.extract_strided_slice %166 {offsets = [32, 0], sizes = [8, 128], strides = [1, 1]} : vector<64x128xf32> to vector<8x128xf32>
    %c5_121 = arith.constant 5 : index
    %c1_122 = arith.constant 1 : index
    %c0_123 = arith.constant 0 : index
    %184 = vector.load %arg19[%c5_121, %c1_122, %c0_123] : memref<10x16x128xf32, #tpu.memory_space<vmem>>, vector<1x8x128xf32>
    %185 = vector.shape_cast %184 : vector<1x8x128xf32> to vector<8x128xf32>
    %186 = vector.shape_cast %183 : vector<8x128xf32> to vector<1x8x128xf32>
    tpu.vector_store %arg19[%c5_121, %c1_122, %c0_123], %186 {strides = array<i32>} : memref<10x16x128xf32, #tpu.memory_space<vmem>>, vector<1x8x128xf32>,
    %187 = vector.extract_strided_slice %166 {offsets = [40, 0], sizes = [8, 128], strides = [1, 1]} : vector<64x128xf32> to vector<8x128xf32>
    %c6_124 = arith.constant 6 : index
    %c1_125 = arith.constant 1 : index
    %c0_126 = arith.constant 0 : index
    %188 = vector.load %arg19[%c6_124, %c1_125, %c0_126] : memref<10x16x128xf32, #tpu.memory_space<vmem>>, vector<1x8x128xf32>
    %189 = vector.shape_cast %188 : vector<1x8x128xf32> to vector<8x128xf32>
    %190 = vector.shape_cast %187 : vector<8x128xf32> to vector<1x8x128xf32>
    tpu.vector_store %arg19[%c6_124, %c1_125, %c0_126], %190 {strides = array<i32>} : memref<10x16x128xf32, #tpu.memory_space<vmem>>, vector<1x8x128xf32>,
    %191 = vector.extract_strided_slice %166 {offsets = [48, 0], sizes = [8, 128], strides = [1, 1]} : vector<64x128xf32> to vector<8x128xf32>
    %c7_127 = arith.constant 7 : index
    %c1_128 = arith.constant 1 : index
    %c0_129 = arith.constant 0 : index
    %192 = vector.load %arg19[%c7_127, %c1_128, %c0_129] : memref<10x16x128xf32, #tpu.memory_space<vmem>>, vector<1x8x128xf32>
    %193 = vector.shape_cast %192 : vector<1x8x128xf32> to vector<8x128xf32>
    %194 = vector.shape_cast %191 : vector<8x128xf32> to vector<1x8x128xf32>
    tpu.vector_store %arg19[%c7_127, %c1_128, %c0_129], %194 {strides = array<i32>} : memref<10x16x128xf32, #tpu.memory_space<vmem>>, vector<1x8x128xf32>,
    %195 = vector.extract_strided_slice %166 {offsets = [56, 0], sizes = [8, 128], strides = [1, 1]} : vector<64x128xf32> to vector<8x128xf32>
    %c8_130 = arith.constant 8 : index
    %c1_131 = arith.constant 1 : index
    %c0_132 = arith.constant 0 : index
    %196 = vector.load %arg19[%c8_130, %c1_131, %c0_132] : memref<10x16x128xf32, #tpu.memory_space<vmem>>, vector<1x8x128xf32>
    %197 = vector.shape_cast %196 : vector<1x8x128xf32> to vector<8x128xf32>
    %198 = vector.shape_cast %195 : vector<8x128xf32> to vector<1x8x128xf32>
    tpu.vector_store %arg19[%c8_130, %c1_131, %c0_132], %198 {strides = array<i32>} : memref<10x16x128xf32, #tpu.memory_space<vmem>>, vector<1x8x128xf32>,
    %c0_133 = arith.constant 0 : index
    %c0_134 = arith.constant 0 : index
    %c0_135 = arith.constant 0 : index
    %199 = vector.load %arg14[%c0_133, %c0_134, %c0_135] : memref<3x3x128xf32, #tpu.memory_space<vmem>>, vector<3x3x128xf32>
    %c0_136 = arith.constant 0 : index
    %c0_137 = arith.constant 0 : index
    %200 = vector.load %arg15[%c0_136, %c0_137] : memref<1x128xf32, #tpu.memory_space<vmem>>, vector<1x128xf32>
    %201 = vector.shape_cast %200 : vector<1x128xf32> to vector<128xf32>
    %c0_138 = arith.constant 0 : index
    %c0_139 = arith.constant 0 : index
    %c0_140 = arith.constant 0 : index
    %202 = vector.load %arg19[%c0_138, %c0_139, %c0_140] : memref<10x16x128xf32, #tpu.memory_space<vmem>>, vector<3x3x128xf32>
    %203 = arith.mulf %202, %199 : vector<3x3x128xf32>
    %204 = vector.extract_strided_slice %203 {offsets = [0, 0, 0], sizes = [1, 3, 128], strides = [1, 1, 1]} : vector<3x3x128xf32> to vector<1x3x128xf32>
    %205 = vector.shape_cast %204 : vector<1x3x128xf32> to vector<3x128xf32>
    %206 = vector.extract_strided_slice %203 {offsets = [1, 0, 0], sizes = [1, 3, 128], strides = [1, 1, 1]} : vector<3x3x128xf32> to vector<1x3x128xf32>
    %207 = vector.shape_cast %206 : vector<1x3x128xf32> to vector<3x128xf32>
    %208 = arith.addf %205, %207 : vector<3x128xf32>
    %209 = vector.extract_strided_slice %203 {offsets = [2, 0, 0], sizes = [1, 3, 128], strides = [1, 1, 1]} : vector<3x3x128xf32> to vector<1x3x128xf32>
    %210 = vector.shape_cast %209 : vector<1x3x128xf32> to vector<3x128xf32>
    %211 = arith.addf %208, %210 : vector<3x128xf32>
    %212 = vector.extract_strided_slice %211 {offsets = [0, 0], sizes = [1, 128], strides = [1, 1]} : vector<3x128xf32> to vector<1x128xf32>
    %213 = vector.shape_cast %212 : vector<1x128xf32> to vector<128xf32>
    %214 = vector.extract_strided_slice %211 {offsets = [1, 0], sizes = [1, 128], strides = [1, 1]} : vector<3x128xf32> to vector<1x128xf32>
    %215 = vector.shape_cast %214 : vector<1x128xf32> to vector<128xf32>
    %216 = arith.addf %213, %215 : vector<128xf32>
    %217 = vector.extract_strided_slice %211 {offsets = [2, 0], sizes = [1, 128], strides = [1, 1]} : vector<3x128xf32> to vector<1x128xf32>
    %218 = vector.shape_cast %217 : vector<1x128xf32> to vector<128xf32>
    %219 = arith.addf %216, %218 : vector<128xf32>
    %220 = arith.addf %219, %201 : vector<128xf32>
    %cst_141 = arith.constant 3.000000e+00 : f32
    %221 = vector.broadcast %cst_141 : f32 to vector<128xf32>
    %222 = arith.addf %220, %221 : vector<128xf32>
    %cst_142 = arith.constant 0.000000e+00 : f32
    %cst_143 = arith.constant 6.000000e+00 : f32
    %223 = vector.broadcast %cst_142 : f32 to vector<128xf32>
    %224 = arith.maximumf %223, %222 : vector<128xf32>
    %225 = vector.broadcast %cst_143 : f32 to vector<128xf32>
    %226 = arith.minimumf %225, %224 : vector<128xf32>
    %cst_144 = arith.constant 0.166666672 : f32
    %227 = vector.broadcast %cst_144 : f32 to vector<128xf32>
    %228 = arith.mulf %226, %227 : vector<128xf32>
    %229 = arith.mulf %220, %228 : vector<128xf32>
    %c0_145 = arith.constant 0 : index
    %c0_146 = arith.constant 0 : index
    %230 = vector.load %arg20[%c0_145, %c0_146] : memref<16x128xf32, #tpu.memory_space<vmem>>, vector<1x128xf32>
    %231 = vector.shape_cast %230 : vector<1x128xf32> to vector<128xf32>
    %232 = vector.shape_cast %229 : vector<128xf32> to vector<1x128xf32>
    tpu.vector_store %arg20[%c0_145, %c0_146], %232 {strides = array<i32>} : memref<16x128xf32, #tpu.memory_space<vmem>>, vector<1x128xf32>,
    %c0_147 = arith.constant 0 : index
    %c2_148 = arith.constant 2 : index
    %c0_149 = arith.constant 0 : index
    %233 = vector.load %arg19[%c0_147, %c2_148, %c0_149] : memref<10x16x128xf32, #tpu.memory_space<vmem>>, vector<3x3x128xf32>
    %234 = arith.mulf %233, %199 : vector<3x3x128xf32>
    %235 = vector.extract_strided_slice %234 {offsets = [0, 0, 0], sizes = [1, 3, 128], strides = [1, 1, 1]} : vector<3x3x128xf32> to vector<1x3x128xf32>
    %236 = vector.shape_cast %235 : vector<1x3x128xf32> to vector<3x128xf32>
    %237 = vector.extract_strided_slice %234 {offsets = [1, 0, 0], sizes = [1, 3, 128], strides = [1, 1, 1]} : vector<3x3x128xf32> to vector<1x3x128xf32>
    %238 = vector.shape_cast %237 : vector<1x3x128xf32> to vector<3x128xf32>
    %239 = arith.addf %236, %238 : vector<3x128xf32>
    %240 = vector.extract_strided_slice %234 {offsets = [2, 0, 0], sizes = [1, 3, 128], strides = [1, 1, 1]} : vector<3x3x128xf32> to vector<1x3x128xf32>
    %241 = vector.shape_cast %240 : vector<1x3x128xf32> to vector<3x128xf32>
    %242 = arith.addf %239, %241 : vector<3x128xf32>
    %243 = vector.extract_strided_slice %242 {offsets = [0, 0], sizes = [1, 128], strides = [1, 1]} : vector<3x128xf32> to vector<1x128xf32>
    %244 = vector.shape_cast %243 : vector<1x128xf32> to vector<128xf32>
    %245 = vector.extract_strided_slice %242 {offsets = [1, 0], sizes = [1, 128], strides = [1, 1]} : vector<3x128xf32> to vector<1x128xf32>
    %246 = vector.shape_cast %245 : vector<1x128xf32> to vector<128xf32>
    %247 = arith.addf %244, %246 : vector<128xf32>
    %248 = vector.extract_strided_slice %242 {offsets = [2, 0], sizes = [1, 128], strides = [1, 1]} : vector<3x128xf32> to vector<1x128xf32>
    %249 = vector.shape_cast %248 : vector<1x128xf32> to vector<128xf32>
    %250 = arith.addf %247, %249 : vector<128xf32>
    %251 = arith.addf %250, %201 : vector<128xf32>
    %cst_150 = arith.constant 3.000000e+00 : f32
    %252 = vector.broadcast %cst_150 : f32 to vector<128xf32>
    %253 = arith.addf %251, %252 : vector<128xf32>
    %cst_151 = arith.constant 0.000000e+00 : f32
    %cst_152 = arith.constant 6.000000e+00 : f32
    %254 = vector.broadcast %cst_151 : f32 to vector<128xf32>
    %255 = arith.maximumf %254, %253 : vector<128xf32>
    %256 = vector.broadcast %cst_152 : f32 to vector<128xf32>
    %257 = arith.minimumf %256, %255 : vector<128xf32>
    %cst_153 = arith.constant 0.166666672 : f32
    %258 = vector.broadcast %cst_153 : f32 to vector<128xf32>
    %259 = arith.mulf %257, %258 : vector<128xf32>
    %260 = arith.mulf %251, %259 : vector<128xf32>
    %c1_154 = arith.constant 1 : index
    %c0_155 = arith.constant 0 : index
    %261 = vector.load %arg20[%c1_154, %c0_155] : memref<16x128xf32, #tpu.memory_space<vmem>>, vector<1x128xf32>
    %262 = vector.shape_cast %261 : vector<1x128xf32> to vector<128xf32>
    %263 = vector.shape_cast %260 : vector<128xf32> to vector<1x128xf32>
    tpu.vector_store %arg20[%c1_154, %c0_155], %263 {strides = array<i32>} : memref<16x128xf32, #tpu.memory_space<vmem>>, vector<1x128xf32>,
    %c0_156 = arith.constant 0 : index
    %c4_157 = arith.constant 4 : index
    %c0_158 = arith.constant 0 : index
    %264 = vector.load %arg19[%c0_156, %c4_157, %c0_158] : memref<10x16x128xf32, #tpu.memory_space<vmem>>, vector<3x3x128xf32>
    %265 = arith.mulf %264, %199 : vector<3x3x128xf32>
    %266 = vector.extract_strided_slice %265 {offsets = [0, 0, 0], sizes = [1, 3, 128], strides = [1, 1, 1]} : vector<3x3x128xf32> to vector<1x3x128xf32>
    %267 = vector.shape_cast %266 : vector<1x3x128xf32> to vector<3x128xf32>
    %268 = vector.extract_strided_slice %265 {offsets = [1, 0, 0], sizes = [1, 3, 128], strides = [1, 1, 1]} : vector<3x3x128xf32> to vector<1x3x128xf32>
    %269 = vector.shape_cast %268 : vector<1x3x128xf32> to vector<3x128xf32>
    %270 = arith.addf %267, %269 : vector<3x128xf32>
    %271 = vector.extract_strided_slice %265 {offsets = [2, 0, 0], sizes = [1, 3, 128], strides = [1, 1, 1]} : vector<3x3x128xf32> to vector<1x3x128xf32>
    %272 = vector.shape_cast %271 : vector<1x3x128xf32> to vector<3x128xf32>
    %273 = arith.addf %270, %272 : vector<3x128xf32>
    %274 = vector.extract_strided_slice %273 {offsets = [0, 0], sizes = [1, 128], strides = [1, 1]} : vector<3x128xf32> to vector<1x128xf32>
    %275 = vector.shape_cast %274 : vector<1x128xf32> to vector<128xf32>
    %276 = vector.extract_strided_slice %273 {offsets = [1, 0], sizes = [1, 128], strides = [1, 1]} : vector<3x128xf32> to vector<1x128xf32>
    %277 = vector.shape_cast %276 : vector<1x128xf32> to vector<128xf32>
    %278 = arith.addf %275, %277 : vector<128xf32>
    %279 = vector.extract_strided_slice %273 {offsets = [2, 0], sizes = [1, 128], strides = [1, 1]} : vector<3x128xf32> to vector<1x128xf32>
    %280 = vector.shape_cast %279 : vector<1x128xf32> to vector<128xf32>
    %281 = arith.addf %278, %280 : vector<128xf32>
    %282 = arith.addf %281, %201 : vector<128xf32>
    %cst_159 = arith.constant 3.000000e+00 : f32
    %283 = vector.broadcast %cst_159 : f32 to vector<128xf32>
    %284 = arith.addf %282, %283 : vector<128xf32>
    %cst_160 = arith.constant 0.000000e+00 : f32
    %cst_161 = arith.constant 6.000000e+00 : f32
    %285 = vector.broadcast %cst_160 : f32 to vector<128xf32>
    %286 = arith.maximumf %285, %284 : vector<128xf32>
    %287 = vector.broadcast %cst_161 : f32 to vector<128xf32>
    %288 = arith.minimumf %287, %286 : vector<128xf32>
    %cst_162 = arith.constant 0.166666672 : f32
    %289 = vector.broadcast %cst_162 : f32 to vector<128xf32>
    %290 = arith.mulf %288, %289 : vector<128xf32>
    %291 = arith.mulf %282, %290 : vector<128xf32>
    %c2_163 = arith.constant 2 : index
    %c0_164 = arith.constant 0 : index
    %292 = vector.load %arg20[%c2_163, %c0_164] : memref<16x128xf32, #tpu.memory_space<vmem>>, vector<1x128xf32>
    %293 = vector.shape_cast %292 : vector<1x128xf32> to vector<128xf32>
    %294 = vector.shape_cast %291 : vector<128xf32> to vector<1x128xf32>
    tpu.vector_store %arg20[%c2_163, %c0_164], %294 {strides = array<i32>} : memref<16x128xf32, #tpu.memory_space<vmem>>, vector<1x128xf32>,
    %c0_165 = arith.constant 0 : index
    %c6_166 = arith.constant 6 : index
    %c0_167 = arith.constant 0 : index
    %295 = vector.load %arg19[%c0_165, %c6_166, %c0_167] : memref<10x16x128xf32, #tpu.memory_space<vmem>>, vector<3x3x128xf32>
    %296 = arith.mulf %295, %199 : vector<3x3x128xf32>
    %297 = vector.extract_strided_slice %296 {offsets = [0, 0, 0], sizes = [1, 3, 128], strides = [1, 1, 1]} : vector<3x3x128xf32> to vector<1x3x128xf32>
    %298 = vector.shape_cast %297 : vector<1x3x128xf32> to vector<3x128xf32>
    %299 = vector.extract_strided_slice %296 {offsets = [1, 0, 0], sizes = [1, 3, 128], strides = [1, 1, 1]} : vector<3x3x128xf32> to vector<1x3x128xf32>
    %300 = vector.shape_cast %299 : vector<1x3x128xf32> to vector<3x128xf32>
    %301 = arith.addf %298, %300 : vector<3x128xf32>
    %302 = vector.extract_strided_slice %296 {offsets = [2, 0, 0], sizes = [1, 3, 128], strides = [1, 1, 1]} : vector<3x3x128xf32> to vector<1x3x128xf32>
    %303 = vector.shape_cast %302 : vector<1x3x128xf32> to vector<3x128xf32>
    %304 = arith.addf %301, %303 : vector<3x128xf32>
    %305 = vector.extract_strided_slice %304 {offsets = [0, 0], sizes = [1, 128], strides = [1, 1]} : vector<3x128xf32> to vector<1x128xf32>
    %306 = vector.shape_cast %305 : vector<1x128xf32> to vector<128xf32>
    %307 = vector.extract_strided_slice %304 {offsets = [1, 0], sizes = [1, 128], strides = [1, 1]} : vector<3x128xf32> to vector<1x128xf32>
    %308 = vector.shape_cast %307 : vector<1x128xf32> to vector<128xf32>
    %309 = arith.addf %306, %308 : vector<128xf32>
    %310 = vector.extract_strided_slice %304 {offsets = [2, 0], sizes = [1, 128], strides = [1, 1]} : vector<3x128xf32> to vector<1x128xf32>
    %311 = vector.shape_cast %310 : vector<1x128xf32> to vector<128xf32>
    %312 = arith.addf %309, %311 : vector<128xf32>
    %313 = arith.addf %312, %201 : vector<128xf32>
    %cst_168 = arith.constant 3.000000e+00 : f32
    %314 = vector.broadcast %cst_168 : f32 to vector<128xf32>
    %315 = arith.addf %313, %314 : vector<128xf32>
    %cst_169 = arith.constant 0.000000e+00 : f32
    %cst_170 = arith.constant 6.000000e+00 : f32
    %316 = vector.broadcast %cst_169 : f32 to vector<128xf32>
    %317 = arith.maximumf %316, %315 : vector<128xf32>
    %318 = vector.broadcast %cst_170 : f32 to vector<128xf32>
    %319 = arith.minimumf %318, %317 : vector<128xf32>
    %cst_171 = arith.constant 0.166666672 : f32
    %320 = vector.broadcast %cst_171 : f32 to vector<128xf32>
    %321 = arith.mulf %319, %320 : vector<128xf32>
    %322 = arith.mulf %313, %321 : vector<128xf32>
    %c3_172 = arith.constant 3 : index
    %c0_173 = arith.constant 0 : index
    %323 = vector.load %arg20[%c3_172, %c0_173] : memref<16x128xf32, #tpu.memory_space<vmem>>, vector<1x128xf32>
    %324 = vector.shape_cast %323 : vector<1x128xf32> to vector<128xf32>
    %325 = vector.shape_cast %322 : vector<128xf32> to vector<1x128xf32>
    tpu.vector_store %arg20[%c3_172, %c0_173], %325 {strides = array<i32>} : memref<16x128xf32, #tpu.memory_space<vmem>>, vector<1x128xf32>,
    %c2_174 = arith.constant 2 : index
    %c0_175 = arith.constant 0 : index
    %c0_176 = arith.constant 0 : index
    %326 = vector.load %arg19[%c2_174, %c0_175, %c0_176] : memref<10x16x128xf32, #tpu.memory_space<vmem>>, vector<3x3x128xf32>
    %327 = arith.mulf %326, %199 : vector<3x3x128xf32>
    %328 = vector.extract_strided_slice %327 {offsets = [0, 0, 0], sizes = [1, 3, 128], strides = [1, 1, 1]} : vector<3x3x128xf32> to vector<1x3x128xf32>
    %329 = vector.shape_cast %328 : vector<1x3x128xf32> to vector<3x128xf32>
    %330 = vector.extract_strided_slice %327 {offsets = [1, 0, 0], sizes = [1, 3, 128], strides = [1, 1, 1]} : vector<3x3x128xf32> to vector<1x3x128xf32>
    %331 = vector.shape_cast %330 : vector<1x3x128xf32> to vector<3x128xf32>
    %332 = arith.addf %329, %331 : vector<3x128xf32>
    %333 = vector.extract_strided_slice %327 {offsets = [2, 0, 0], sizes = [1, 3, 128], strides = [1, 1, 1]} : vector<3x3x128xf32> to vector<1x3x128xf32>
    %334 = vector.shape_cast %333 : vector<1x3x128xf32> to vector<3x128xf32>
    %335 = arith.addf %332, %334 : vector<3x128xf32>
    %336 = vector.extract_strided_slice %335 {offsets = [0, 0], sizes = [1, 128], strides = [1, 1]} : vector<3x128xf32> to vector<1x128xf32>
    %337 = vector.shape_cast %336 : vector<1x128xf32> to vector<128xf32>
    %338 = vector.extract_strided_slice %335 {offsets = [1, 0], sizes = [1, 128], strides = [1, 1]} : vector<3x128xf32> to vector<1x128xf32>
    %339 = vector.shape_cast %338 : vector<1x128xf32> to vector<128xf32>
    %340 = arith.addf %337, %339 : vector<128xf32>
    %341 = vector.extract_strided_slice %335 {offsets = [2, 0], sizes = [1, 128], strides = [1, 1]} : vector<3x128xf32> to vector<1x128xf32>
    %342 = vector.shape_cast %341 : vector<1x128xf32> to vector<128xf32>
    %343 = arith.addf %340, %342 : vector<128xf32>
    %344 = arith.addf %343, %201 : vector<128xf32>
    %cst_177 = arith.constant 3.000000e+00 : f32
    %345 = vector.broadcast %cst_177 : f32 to vector<128xf32>
    %346 = arith.addf %344, %345 : vector<128xf32>
    %cst_178 = arith.constant 0.000000e+00 : f32
    %cst_179 = arith.constant 6.000000e+00 : f32
    %347 = vector.broadcast %cst_178 : f32 to vector<128xf32>
    %348 = arith.maximumf %347, %346 : vector<128xf32>
    %349 = vector.broadcast %cst_179 : f32 to vector<128xf32>
    %350 = arith.minimumf %349, %348 : vector<128xf32>
    %cst_180 = arith.constant 0.166666672 : f32
    %351 = vector.broadcast %cst_180 : f32 to vector<128xf32>
    %352 = arith.mulf %350, %351 : vector<128xf32>
    %353 = arith.mulf %344, %352 : vector<128xf32>
    %c4_181 = arith.constant 4 : index
    %c0_182 = arith.constant 0 : index
    %354 = vector.load %arg20[%c4_181, %c0_182] : memref<16x128xf32, #tpu.memory_space<vmem>>, vector<1x128xf32>
    %355 = vector.shape_cast %354 : vector<1x128xf32> to vector<128xf32>
    %356 = vector.shape_cast %353 : vector<128xf32> to vector<1x128xf32>
    tpu.vector_store %arg20[%c4_181, %c0_182], %356 {strides = array<i32>} : memref<16x128xf32, #tpu.memory_space<vmem>>, vector<1x128xf32>,
    %c2_183 = arith.constant 2 : index
    %c2_184 = arith.constant 2 : index
    %c0_185 = arith.constant 0 : index
    %357 = vector.load %arg19[%c2_183, %c2_184, %c0_185] : memref<10x16x128xf32, #tpu.memory_space<vmem>>, vector<3x3x128xf32>
    %358 = arith.mulf %357, %199 : vector<3x3x128xf32>
    %359 = vector.extract_strided_slice %358 {offsets = [0, 0, 0], sizes = [1, 3, 128], strides = [1, 1, 1]} : vector<3x3x128xf32> to vector<1x3x128xf32>
    %360 = vector.shape_cast %359 : vector<1x3x128xf32> to vector<3x128xf32>
    %361 = vector.extract_strided_slice %358 {offsets = [1, 0, 0], sizes = [1, 3, 128], strides = [1, 1, 1]} : vector<3x3x128xf32> to vector<1x3x128xf32>
    %362 = vector.shape_cast %361 : vector<1x3x128xf32> to vector<3x128xf32>
    %363 = arith.addf %360, %362 : vector<3x128xf32>
    %364 = vector.extract_strided_slice %358 {offsets = [2, 0, 0], sizes = [1, 3, 128], strides = [1, 1, 1]} : vector<3x3x128xf32> to vector<1x3x128xf32>
    %365 = vector.shape_cast %364 : vector<1x3x128xf32> to vector<3x128xf32>
    %366 = arith.addf %363, %365 : vector<3x128xf32>
    %367 = vector.extract_strided_slice %366 {offsets = [0, 0], sizes = [1, 128], strides = [1, 1]} : vector<3x128xf32> to vector<1x128xf32>
    %368 = vector.shape_cast %367 : vector<1x128xf32> to vector<128xf32>
    %369 = vector.extract_strided_slice %366 {offsets = [1, 0], sizes = [1, 128], strides = [1, 1]} : vector<3x128xf32> to vector<1x128xf32>
    %370 = vector.shape_cast %369 : vector<1x128xf32> to vector<128xf32>
    %371 = arith.addf %368, %370 : vector<128xf32>
    %372 = vector.extract_strided_slice %366 {offsets = [2, 0], sizes = [1, 128], strides = [1, 1]} : vector<3x128xf32> to vector<1x128xf32>
    %373 = vector.shape_cast %372 : vector<1x128xf32> to vector<128xf32>
    %374 = arith.addf %371, %373 : vector<128xf32>
    %375 = arith.addf %374, %201 : vector<128xf32>
    %cst_186 = arith.constant 3.000000e+00 : f32
    %376 = vector.broadcast %cst_186 : f32 to vector<128xf32>
    %377 = arith.addf %375, %376 : vector<128xf32>
    %cst_187 = arith.constant 0.000000e+00 : f32
    %cst_188 = arith.constant 6.000000e+00 : f32
    %378 = vector.broadcast %cst_187 : f32 to vector<128xf32>
    %379 = arith.maximumf %378, %377 : vector<128xf32>
    %380 = vector.broadcast %cst_188 : f32 to vector<128xf32>
    %381 = arith.minimumf %380, %379 : vector<128xf32>
    %cst_189 = arith.constant 0.166666672 : f32
    %382 = vector.broadcast %cst_189 : f32 to vector<128xf32>
    %383 = arith.mulf %381, %382 : vector<128xf32>
    %384 = arith.mulf %375, %383 : vector<128xf32>
    %c5_190 = arith.constant 5 : index
    %c0_191 = arith.constant 0 : index
    %385 = vector.load %arg20[%c5_190, %c0_191] : memref<16x128xf32, #tpu.memory_space<vmem>>, vector<1x128xf32>
    %386 = vector.shape_cast %385 : vector<1x128xf32> to vector<128xf32>
    %387 = vector.shape_cast %384 : vector<128xf32> to vector<1x128xf32>
    tpu.vector_store %arg20[%c5_190, %c0_191], %387 {strides = array<i32>} : memref<16x128xf32, #tpu.memory_space<vmem>>, vector<1x128xf32>,
    %c2_192 = arith.constant 2 : index
    %c4_193 = arith.constant 4 : index
    %c0_194 = arith.constant 0 : index
    %388 = vector.load %arg19[%c2_192, %c4_193, %c0_194] : memref<10x16x128xf32, #tpu.memory_space<vmem>>, vector<3x3x128xf32>
    %389 = arith.mulf %388, %199 : vector<3x3x128xf32>
    %390 = vector.extract_strided_slice %389 {offsets = [0, 0, 0], sizes = [1, 3, 128], strides = [1, 1, 1]} : vector<3x3x128xf32> to vector<1x3x128xf32>
    %391 = vector.shape_cast %390 : vector<1x3x128xf32> to vector<3x128xf32>
    %392 = vector.extract_strided_slice %389 {offsets = [1, 0, 0], sizes = [1, 3, 128], strides = [1, 1, 1]} : vector<3x3x128xf32> to vector<1x3x128xf32>
    %393 = vector.shape_cast %392 : vector<1x3x128xf32> to vector<3x128xf32>
    %394 = arith.addf %391, %393 : vector<3x128xf32>
    %395 = vector.extract_strided_slice %389 {offsets = [2, 0, 0], sizes = [1, 3, 128], strides = [1, 1, 1]} : vector<3x3x128xf32> to vector<1x3x128xf32>
    %396 = vector.shape_cast %395 : vector<1x3x128xf32> to vector<3x128xf32>
    %397 = arith.addf %394, %396 : vector<3x128xf32>
    %398 = vector.extract_strided_slice %397 {offsets = [0, 0], sizes = [1, 128], strides = [1, 1]} : vector<3x128xf32> to vector<1x128xf32>
    %399 = vector.shape_cast %398 : vector<1x128xf32> to vector<128xf32>
    %400 = vector.extract_strided_slice %397 {offsets = [1, 0], sizes = [1, 128], strides = [1, 1]} : vector<3x128xf32> to vector<1x128xf32>
    %401 = vector.shape_cast %400 : vector<1x128xf32> to vector<128xf32>
    %402 = arith.addf %399, %401 : vector<128xf32>
    %403 = vector.extract_strided_slice %397 {offsets = [2, 0], sizes = [1, 128], strides = [1, 1]} : vector<3x128xf32> to vector<1x128xf32>
    %404 = vector.shape_cast %403 : vector<1x128xf32> to vector<128xf32>
    %405 = arith.addf %402, %404 : vector<128xf32>
    %406 = arith.addf %405, %201 : vector<128xf32>
    %cst_195 = arith.constant 3.000000e+00 : f32
    %407 = vector.broadcast %cst_195 : f32 to vector<128xf32>
    %408 = arith.addf %406, %407 : vector<128xf32>
    %cst_196 = arith.constant 0.000000e+00 : f32
    %cst_197 = arith.constant 6.000000e+00 : f32
    %409 = vector.broadcast %cst_196 : f32 to vector<128xf32>
    %410 = arith.maximumf %409, %408 : vector<128xf32>
    %411 = vector.broadcast %cst_197 : f32 to vector<128xf32>
    %412 = arith.minimumf %411, %410 : vector<128xf32>
    %cst_198 = arith.constant 0.166666672 : f32
    %413 = vector.broadcast %cst_198 : f32 to vector<128xf32>
    %414 = arith.mulf %412, %413 : vector<128xf32>
    %415 = arith.mulf %406, %414 : vector<128xf32>
    %c6_199 = arith.constant 6 : index
    %c0_200 = arith.constant 0 : index
    %416 = vector.load %arg20[%c6_199, %c0_200] : memref<16x128xf32, #tpu.memory_space<vmem>>, vector<1x128xf32>
    %417 = vector.shape_cast %416 : vector<1x128xf32> to vector<128xf32>
    %418 = vector.shape_cast %415 : vector<128xf32> to vector<1x128xf32>
    tpu.vector_store %arg20[%c6_199, %c0_200], %418 {strides = array<i32>} : memref<16x128xf32, #tpu.memory_space<vmem>>, vector<1x128xf32>,
    %c2_201 = arith.constant 2 : index
    %c6_202 = arith.constant 6 : index
    %c0_203 = arith.constant 0 : index
    %419 = vector.load %arg19[%c2_201, %c6_202, %c0_203] : memref<10x16x128xf32, #tpu.memory_space<vmem>>, vector<3x3x128xf32>
    %420 = arith.mulf %419, %199 : vector<3x3x128xf32>
    %421 = vector.extract_strided_slice %420 {offsets = [0, 0, 0], sizes = [1, 3, 128], strides = [1, 1, 1]} : vector<3x3x128xf32> to vector<1x3x128xf32>
    %422 = vector.shape_cast %421 : vector<1x3x128xf32> to vector<3x128xf32>
    %423 = vector.extract_strided_slice %420 {offsets = [1, 0, 0], sizes = [1, 3, 128], strides = [1, 1, 1]} : vector<3x3x128xf32> to vector<1x3x128xf32>
    %424 = vector.shape_cast %423 : vector<1x3x128xf32> to vector<3x128xf32>
    %425 = arith.addf %422, %424 : vector<3x128xf32>
    %426 = vector.extract_strided_slice %420 {offsets = [2, 0, 0], sizes = [1, 3, 128], strides = [1, 1, 1]} : vector<3x3x128xf32> to vector<1x3x128xf32>
    %427 = vector.shape_cast %426 : vector<1x3x128xf32> to vector<3x128xf32>
    %428 = arith.addf %425, %427 : vector<3x128xf32>
    %429 = vector.extract_strided_slice %428 {offsets = [0, 0], sizes = [1, 128], strides = [1, 1]} : vector<3x128xf32> to vector<1x128xf32>
    %430 = vector.shape_cast %429 : vector<1x128xf32> to vector<128xf32>
    %431 = vector.extract_strided_slice %428 {offsets = [1, 0], sizes = [1, 128], strides = [1, 1]} : vector<3x128xf32> to vector<1x128xf32>
    %432 = vector.shape_cast %431 : vector<1x128xf32> to vector<128xf32>
    %433 = arith.addf %430, %432 : vector<128xf32>
    %434 = vector.extract_strided_slice %428 {offsets = [2, 0], sizes = [1, 128], strides = [1, 1]} : vector<3x128xf32> to vector<1x128xf32>
    %435 = vector.shape_cast %434 : vector<1x128xf32> to vector<128xf32>
    %436 = arith.addf %433, %435 : vector<128xf32>
    %437 = arith.addf %436, %201 : vector<128xf32>
    %cst_204 = arith.constant 3.000000e+00 : f32
    %438 = vector.broadcast %cst_204 : f32 to vector<128xf32>
    %439 = arith.addf %437, %438 : vector<128xf32>
    %cst_205 = arith.constant 0.000000e+00 : f32
    %cst_206 = arith.constant 6.000000e+00 : f32
    %440 = vector.broadcast %cst_205 : f32 to vector<128xf32>
    %441 = arith.maximumf %440, %439 : vector<128xf32>
    %442 = vector.broadcast %cst_206 : f32 to vector<128xf32>
    %443 = arith.minimumf %442, %441 : vector<128xf32>
    %cst_207 = arith.constant 0.166666672 : f32
    %444 = vector.broadcast %cst_207 : f32 to vector<128xf32>
    %445 = arith.mulf %443, %444 : vector<128xf32>
    %446 = arith.mulf %437, %445 : vector<128xf32>
    %c7_208 = arith.constant 7 : index
    %c0_209 = arith.constant 0 : index
    %447 = vector.load %arg20[%c7_208, %c0_209] : memref<16x128xf32, #tpu.memory_space<vmem>>, vector<1x128xf32>
    %448 = vector.shape_cast %447 : vector<1x128xf32> to vector<128xf32>
    %449 = vector.shape_cast %446 : vector<128xf32> to vector<1x128xf32>
    tpu.vector_store %arg20[%c7_208, %c0_209], %449 {strides = array<i32>} : memref<16x128xf32, #tpu.memory_space<vmem>>, vector<1x128xf32>,
    %c4_210 = arith.constant 4 : index
    %c0_211 = arith.constant 0 : index
    %c0_212 = arith.constant 0 : index
    %450 = vector.load %arg19[%c4_210, %c0_211, %c0_212] : memref<10x16x128xf32, #tpu.memory_space<vmem>>, vector<3x3x128xf32>
    %451 = arith.mulf %450, %199 : vector<3x3x128xf32>
    %452 = vector.extract_strided_slice %451 {offsets = [0, 0, 0], sizes = [1, 3, 128], strides = [1, 1, 1]} : vector<3x3x128xf32> to vector<1x3x128xf32>
    %453 = vector.shape_cast %452 : vector<1x3x128xf32> to vector<3x128xf32>
    %454 = vector.extract_strided_slice %451 {offsets = [1, 0, 0], sizes = [1, 3, 128], strides = [1, 1, 1]} : vector<3x3x128xf32> to vector<1x3x128xf32>
    %455 = vector.shape_cast %454 : vector<1x3x128xf32> to vector<3x128xf32>
    %456 = arith.addf %453, %455 : vector<3x128xf32>
    %457 = vector.extract_strided_slice %451 {offsets = [2, 0, 0], sizes = [1, 3, 128], strides = [1, 1, 1]} : vector<3x3x128xf32> to vector<1x3x128xf32>
    %458 = vector.shape_cast %457 : vector<1x3x128xf32> to vector<3x128xf32>
    %459 = arith.addf %456, %458 : vector<3x128xf32>
    %460 = vector.extract_strided_slice %459 {offsets = [0, 0], sizes = [1, 128], strides = [1, 1]} : vector<3x128xf32> to vector<1x128xf32>
    %461 = vector.shape_cast %460 : vector<1x128xf32> to vector<128xf32>
    %462 = vector.extract_strided_slice %459 {offsets = [1, 0], sizes = [1, 128], strides = [1, 1]} : vector<3x128xf32> to vector<1x128xf32>
    %463 = vector.shape_cast %462 : vector<1x128xf32> to vector<128xf32>
    %464 = arith.addf %461, %463 : vector<128xf32>
    %465 = vector.extract_strided_slice %459 {offsets = [2, 0], sizes = [1, 128], strides = [1, 1]} : vector<3x128xf32> to vector<1x128xf32>
    %466 = vector.shape_cast %465 : vector<1x128xf32> to vector<128xf32>
    %467 = arith.addf %464, %466 : vector<128xf32>
    %468 = arith.addf %467, %201 : vector<128xf32>
    %cst_213 = arith.constant 3.000000e+00 : f32
    %469 = vector.broadcast %cst_213 : f32 to vector<128xf32>
    %470 = arith.addf %468, %469 : vector<128xf32>
    %cst_214 = arith.constant 0.000000e+00 : f32
    %cst_215 = arith.constant 6.000000e+00 : f32
    %471 = vector.broadcast %cst_214 : f32 to vector<128xf32>
    %472 = arith.maximumf %471, %470 : vector<128xf32>
    %473 = vector.broadcast %cst_215 : f32 to vector<128xf32>
    %474 = arith.minimumf %473, %472 : vector<128xf32>
    %cst_216 = arith.constant 0.166666672 : f32
    %475 = vector.broadcast %cst_216 : f32 to vector<128xf32>
    %476 = arith.mulf %474, %475 : vector<128xf32>
    %477 = arith.mulf %468, %476 : vector<128xf32>
    %c8_217 = arith.constant 8 : index
    %c0_218 = arith.constant 0 : index
    %478 = vector.load %arg20[%c8_217, %c0_218] : memref<16x128xf32, #tpu.memory_space<vmem>>, vector<1x128xf32>
    %479 = vector.shape_cast %478 : vector<1x128xf32> to vector<128xf32>
    %480 = vector.shape_cast %477 : vector<128xf32> to vector<1x128xf32>
    tpu.vector_store %arg20[%c8_217, %c0_218], %480 {strides = array<i32>} : memref<16x128xf32, #tpu.memory_space<vmem>>, vector<1x128xf32>,
    %c4_219 = arith.constant 4 : index
    %c2_220 = arith.constant 2 : index
    %c0_221 = arith.constant 0 : index
    %481 = vector.load %arg19[%c4_219, %c2_220, %c0_221] : memref<10x16x128xf32, #tpu.memory_space<vmem>>, vector<3x3x128xf32>
    %482 = arith.mulf %481, %199 : vector<3x3x128xf32>
    %483 = vector.extract_strided_slice %482 {offsets = [0, 0, 0], sizes = [1, 3, 128], strides = [1, 1, 1]} : vector<3x3x128xf32> to vector<1x3x128xf32>
    %484 = vector.shape_cast %483 : vector<1x3x128xf32> to vector<3x128xf32>
    %485 = vector.extract_strided_slice %482 {offsets = [1, 0, 0], sizes = [1, 3, 128], strides = [1, 1, 1]} : vector<3x3x128xf32> to vector<1x3x128xf32>
    %486 = vector.shape_cast %485 : vector<1x3x128xf32> to vector<3x128xf32>
    %487 = arith.addf %484, %486 : vector<3x128xf32>
    %488 = vector.extract_strided_slice %482 {offsets = [2, 0, 0], sizes = [1, 3, 128], strides = [1, 1, 1]} : vector<3x3x128xf32> to vector<1x3x128xf32>
    %489 = vector.shape_cast %488 : vector<1x3x128xf32> to vector<3x128xf32>
    %490 = arith.addf %487, %489 : vector<3x128xf32>
    %491 = vector.extract_strided_slice %490 {offsets = [0, 0], sizes = [1, 128], strides = [1, 1]} : vector<3x128xf32> to vector<1x128xf32>
    %492 = vector.shape_cast %491 : vector<1x128xf32> to vector<128xf32>
    %493 = vector.extract_strided_slice %490 {offsets = [1, 0], sizes = [1, 128], strides = [1, 1]} : vector<3x128xf32> to vector<1x128xf32>
    %494 = vector.shape_cast %493 : vector<1x128xf32> to vector<128xf32>
    %495 = arith.addf %492, %494 : vector<128xf32>
    %496 = vector.extract_strided_slice %490 {offsets = [2, 0], sizes = [1, 128], strides = [1, 1]} : vector<3x128xf32> to vector<1x128xf32>
    %497 = vector.shape_cast %496 : vector<1x128xf32> to vector<128xf32>
    %498 = arith.addf %495, %497 : vector<128xf32>
    %499 = arith.addf %498, %201 : vector<128xf32>
    %cst_222 = arith.constant 3.000000e+00 : f32
    %500 = vector.broadcast %cst_222 : f32 to vector<128xf32>
    %501 = arith.addf %499, %500 : vector<128xf32>
    %cst_223 = arith.constant 0.000000e+00 : f32
    %cst_224 = arith.constant 6.000000e+00 : f32
    %502 = vector.broadcast %cst_223 : f32 to vector<128xf32>
    %503 = arith.maximumf %502, %501 : vector<128xf32>
    %504 = vector.broadcast %cst_224 : f32 to vector<128xf32>
    %505 = arith.minimumf %504, %503 : vector<128xf32>
    %cst_225 = arith.constant 0.166666672 : f32
    %506 = vector.broadcast %cst_225 : f32 to vector<128xf32>
    %507 = arith.mulf %505, %506 : vector<128xf32>
    %508 = arith.mulf %499, %507 : vector<128xf32>
    %c9 = arith.constant 9 : index
    %c0_226 = arith.constant 0 : index
    %509 = vector.load %arg20[%c9, %c0_226] : memref<16x128xf32, #tpu.memory_space<vmem>>, vector<1x128xf32>
    %510 = vector.shape_cast %509 : vector<1x128xf32> to vector<128xf32>
    %511 = vector.shape_cast %508 : vector<128xf32> to vector<1x128xf32>
    tpu.vector_store %arg20[%c9, %c0_226], %511 {strides = array<i32>} : memref<16x128xf32, #tpu.memory_space<vmem>>, vector<1x128xf32>,
    %c4_227 = arith.constant 4 : index
    %c4_228 = arith.constant 4 : index
    %c0_229 = arith.constant 0 : index
    %512 = vector.load %arg19[%c4_227, %c4_228, %c0_229] : memref<10x16x128xf32, #tpu.memory_space<vmem>>, vector<3x3x128xf32>
    %513 = arith.mulf %512, %199 : vector<3x3x128xf32>
    %514 = vector.extract_strided_slice %513 {offsets = [0, 0, 0], sizes = [1, 3, 128], strides = [1, 1, 1]} : vector<3x3x128xf32> to vector<1x3x128xf32>
    %515 = vector.shape_cast %514 : vector<1x3x128xf32> to vector<3x128xf32>
    %516 = vector.extract_strided_slice %513 {offsets = [1, 0, 0], sizes = [1, 3, 128], strides = [1, 1, 1]} : vector<3x3x128xf32> to vector<1x3x128xf32>
    %517 = vector.shape_cast %516 : vector<1x3x128xf32> to vector<3x128xf32>
    %518 = arith.addf %515, %517 : vector<3x128xf32>
    %519 = vector.extract_strided_slice %513 {offsets = [2, 0, 0], sizes = [1, 3, 128], strides = [1, 1, 1]} : vector<3x3x128xf32> to vector<1x3x128xf32>
    %520 = vector.shape_cast %519 : vector<1x3x128xf32> to vector<3x128xf32>
    %521 = arith.addf %518, %520 : vector<3x128xf32>
    %522 = vector.extract_strided_slice %521 {offsets = [0, 0], sizes = [1, 128], strides = [1, 1]} : vector<3x128xf32> to vector<1x128xf32>
    %523 = vector.shape_cast %522 : vector<1x128xf32> to vector<128xf32>
    %524 = vector.extract_strided_slice %521 {offsets = [1, 0], sizes = [1, 128], strides = [1, 1]} : vector<3x128xf32> to vector<1x128xf32>
    %525 = vector.shape_cast %524 : vector<1x128xf32> to vector<128xf32>
    %526 = arith.addf %523, %525 : vector<128xf32>
    %527 = vector.extract_strided_slice %521 {offsets = [2, 0], sizes = [1, 128], strides = [1, 1]} : vector<3x128xf32> to vector<1x128xf32>
    %528 = vector.shape_cast %527 : vector<1x128xf32> to vector<128xf32>
    %529 = arith.addf %526, %528 : vector<128xf32>
    %530 = arith.addf %529, %201 : vector<128xf32>
    %cst_230 = arith.constant 3.000000e+00 : f32
    %531 = vector.broadcast %cst_230 : f32 to vector<128xf32>
    %532 = arith.addf %530, %531 : vector<128xf32>
    %cst_231 = arith.constant 0.000000e+00 : f32
    %cst_232 = arith.constant 6.000000e+00 : f32
    %533 = vector.broadcast %cst_231 : f32 to vector<128xf32>
    %534 = arith.maximumf %533, %532 : vector<128xf32>
    %535 = vector.broadcast %cst_232 : f32 to vector<128xf32>
    %536 = arith.minimumf %535, %534 : vector<128xf32>
    %cst_233 = arith.constant 0.166666672 : f32
    %537 = vector.broadcast %cst_233 : f32 to vector<128xf32>
    %538 = arith.mulf %536, %537 : vector<128xf32>
    %539 = arith.mulf %530, %538 : vector<128xf32>
    %c10 = arith.constant 10 : index
    %c0_234 = arith.constant 0 : index
    %540 = vector.load %arg20[%c10, %c0_234] : memref<16x128xf32, #tpu.memory_space<vmem>>, vector<1x128xf32>
    %541 = vector.shape_cast %540 : vector<1x128xf32> to vector<128xf32>
    %542 = vector.shape_cast %539 : vector<128xf32> to vector<1x128xf32>
    tpu.vector_store %arg20[%c10, %c0_234], %542 {strides = array<i32>} : memref<16x128xf32, #tpu.memory_space<vmem>>, vector<1x128xf32>,
    %c4_235 = arith.constant 4 : index
    %c6_236 = arith.constant 6 : index
    %c0_237 = arith.constant 0 : index
    %543 = vector.load %arg19[%c4_235, %c6_236, %c0_237] : memref<10x16x128xf32, #tpu.memory_space<vmem>>, vector<3x3x128xf32>
    %544 = arith.mulf %543, %199 : vector<3x3x128xf32>
    %545 = vector.extract_strided_slice %544 {offsets = [0, 0, 0], sizes = [1, 3, 128], strides = [1, 1, 1]} : vector<3x3x128xf32> to vector<1x3x128xf32>
    %546 = vector.shape_cast %545 : vector<1x3x128xf32> to vector<3x128xf32>
    %547 = vector.extract_strided_slice %544 {offsets = [1, 0, 0], sizes = [1, 3, 128], strides = [1, 1, 1]} : vector<3x3x128xf32> to vector<1x3x128xf32>
    %548 = vector.shape_cast %547 : vector<1x3x128xf32> to vector<3x128xf32>
    %549 = arith.addf %546, %548 : vector<3x128xf32>
    %550 = vector.extract_strided_slice %544 {offsets = [2, 0, 0], sizes = [1, 3, 128], strides = [1, 1, 1]} : vector<3x3x128xf32> to vector<1x3x128xf32>
    %551 = vector.shape_cast %550 : vector<1x3x128xf32> to vector<3x128xf32>
    %552 = arith.addf %549, %551 : vector<3x128xf32>
    %553 = vector.extract_strided_slice %552 {offsets = [0, 0], sizes = [1, 128], strides = [1, 1]} : vector<3x128xf32> to vector<1x128xf32>
    %554 = vector.shape_cast %553 : vector<1x128xf32> to vector<128xf32>
    %555 = vector.extract_strided_slice %552 {offsets = [1, 0], sizes = [1, 128], strides = [1, 1]} : vector<3x128xf32> to vector<1x128xf32>
    %556 = vector.shape_cast %555 : vector<1x128xf32> to vector<128xf32>
    %557 = arith.addf %554, %556 : vector<128xf32>
    %558 = vector.extract_strided_slice %552 {offsets = [2, 0], sizes = [1, 128], strides = [1, 1]} : vector<3x128xf32> to vector<1x128xf32>
    %559 = vector.shape_cast %558 : vector<1x128xf32> to vector<128xf32>
    %560 = arith.addf %557, %559 : vector<128xf32>
    %561 = arith.addf %560, %201 : vector<128xf32>
    %cst_238 = arith.constant 3.000000e+00 : f32
    %562 = vector.broadcast %cst_238 : f32 to vector<128xf32>
    %563 = arith.addf %561, %562 : vector<128xf32>
    %cst_239 = arith.constant 0.000000e+00 : f32
    %cst_240 = arith.constant 6.000000e+00 : f32
    %564 = vector.broadcast %cst_239 : f32 to vector<128xf32>
    %565 = arith.maximumf %564, %563 : vector<128xf32>
    %566 = vector.broadcast %cst_240 : f32 to vector<128xf32>
    %567 = arith.minimumf %566, %565 : vector<128xf32>
    %cst_241 = arith.constant 0.166666672 : f32
    %568 = vector.broadcast %cst_241 : f32 to vector<128xf32>
    %569 = arith.mulf %567, %568 : vector<128xf32>
    %570 = arith.mulf %561, %569 : vector<128xf32>
    %c11 = arith.constant 11 : index
    %c0_242 = arith.constant 0 : index
    %571 = vector.load %arg20[%c11, %c0_242] : memref<16x128xf32, #tpu.memory_space<vmem>>, vector<1x128xf32>
    %572 = vector.shape_cast %571 : vector<1x128xf32> to vector<128xf32>
    %573 = vector.shape_cast %570 : vector<128xf32> to vector<1x128xf32>
    tpu.vector_store %arg20[%c11, %c0_242], %573 {strides = array<i32>} : memref<16x128xf32, #tpu.memory_space<vmem>>, vector<1x128xf32>,
    %c6_243 = arith.constant 6 : index
    %c0_244 = arith.constant 0 : index
    %c0_245 = arith.constant 0 : index
    %574 = vector.load %arg19[%c6_243, %c0_244, %c0_245] : memref<10x16x128xf32, #tpu.memory_space<vmem>>, vector<3x3x128xf32>
    %575 = arith.mulf %574, %199 : vector<3x3x128xf32>
    %576 = vector.extract_strided_slice %575 {offsets = [0, 0, 0], sizes = [1, 3, 128], strides = [1, 1, 1]} : vector<3x3x128xf32> to vector<1x3x128xf32>
    %577 = vector.shape_cast %576 : vector<1x3x128xf32> to vector<3x128xf32>
    %578 = vector.extract_strided_slice %575 {offsets = [1, 0, 0], sizes = [1, 3, 128], strides = [1, 1, 1]} : vector<3x3x128xf32> to vector<1x3x128xf32>
    %579 = vector.shape_cast %578 : vector<1x3x128xf32> to vector<3x128xf32>
    %580 = arith.addf %577, %579 : vector<3x128xf32>
    %581 = vector.extract_strided_slice %575 {offsets = [2, 0, 0], sizes = [1, 3, 128], strides = [1, 1, 1]} : vector<3x3x128xf32> to vector<1x3x128xf32>
    %582 = vector.shape_cast %581 : vector<1x3x128xf32> to vector<3x128xf32>
    %583 = arith.addf %580, %582 : vector<3x128xf32>
    %584 = vector.extract_strided_slice %583 {offsets = [0, 0], sizes = [1, 128], strides = [1, 1]} : vector<3x128xf32> to vector<1x128xf32>
    %585 = vector.shape_cast %584 : vector<1x128xf32> to vector<128xf32>
    %586 = vector.extract_strided_slice %583 {offsets = [1, 0], sizes = [1, 128], strides = [1, 1]} : vector<3x128xf32> to vector<1x128xf32>
    %587 = vector.shape_cast %586 : vector<1x128xf32> to vector<128xf32>
    %588 = arith.addf %585, %587 : vector<128xf32>
    %589 = vector.extract_strided_slice %583 {offsets = [2, 0], sizes = [1, 128], strides = [1, 1]} : vector<3x128xf32> to vector<1x128xf32>
    %590 = vector.shape_cast %589 : vector<1x128xf32> to vector<128xf32>
    %591 = arith.addf %588, %590 : vector<128xf32>
    %592 = arith.addf %591, %201 : vector<128xf32>
    %cst_246 = arith.constant 3.000000e+00 : f32
    %593 = vector.broadcast %cst_246 : f32 to vector<128xf32>
    %594 = arith.addf %592, %593 : vector<128xf32>
    %cst_247 = arith.constant 0.000000e+00 : f32
    %cst_248 = arith.constant 6.000000e+00 : f32
    %595 = vector.broadcast %cst_247 : f32 to vector<128xf32>
    %596 = arith.maximumf %595, %594 : vector<128xf32>
    %597 = vector.broadcast %cst_248 : f32 to vector<128xf32>
    %598 = arith.minimumf %597, %596 : vector<128xf32>
    %cst_249 = arith.constant 0.166666672 : f32
    %599 = vector.broadcast %cst_249 : f32 to vector<128xf32>
    %600 = arith.mulf %598, %599 : vector<128xf32>
    %601 = arith.mulf %592, %600 : vector<128xf32>
    %c12 = arith.constant 12 : index
    %c0_250 = arith.constant 0 : index
    %602 = vector.load %arg20[%c12, %c0_250] : memref<16x128xf32, #tpu.memory_space<vmem>>, vector<1x128xf32>
    %603 = vector.shape_cast %602 : vector<1x128xf32> to vector<128xf32>
    %604 = vector.shape_cast %601 : vector<128xf32> to vector<1x128xf32>
    tpu.vector_store %arg20[%c12, %c0_250], %604 {strides = array<i32>} : memref<16x128xf32, #tpu.memory_space<vmem>>, vector<1x128xf32>,
    %c6_251 = arith.constant 6 : index
    %c2_252 = arith.constant 2 : index
    %c0_253 = arith.constant 0 : index
    %605 = vector.load %arg19[%c6_251, %c2_252, %c0_253] : memref<10x16x128xf32, #tpu.memory_space<vmem>>, vector<3x3x128xf32>
    %606 = arith.mulf %605, %199 : vector<3x3x128xf32>
    %607 = vector.extract_strided_slice %606 {offsets = [0, 0, 0], sizes = [1, 3, 128], strides = [1, 1, 1]} : vector<3x3x128xf32> to vector<1x3x128xf32>
    %608 = vector.shape_cast %607 : vector<1x3x128xf32> to vector<3x128xf32>
    %609 = vector.extract_strided_slice %606 {offsets = [1, 0, 0], sizes = [1, 3, 128], strides = [1, 1, 1]} : vector<3x3x128xf32> to vector<1x3x128xf32>
    %610 = vector.shape_cast %609 : vector<1x3x128xf32> to vector<3x128xf32>
    %611 = arith.addf %608, %610 : vector<3x128xf32>
    %612 = vector.extract_strided_slice %606 {offsets = [2, 0, 0], sizes = [1, 3, 128], strides = [1, 1, 1]} : vector<3x3x128xf32> to vector<1x3x128xf32>
    %613 = vector.shape_cast %612 : vector<1x3x128xf32> to vector<3x128xf32>
    %614 = arith.addf %611, %613 : vector<3x128xf32>
    %615 = vector.extract_strided_slice %614 {offsets = [0, 0], sizes = [1, 128], strides = [1, 1]} : vector<3x128xf32> to vector<1x128xf32>
    %616 = vector.shape_cast %615 : vector<1x128xf32> to vector<128xf32>
    %617 = vector.extract_strided_slice %614 {offsets = [1, 0], sizes = [1, 128], strides = [1, 1]} : vector<3x128xf32> to vector<1x128xf32>
    %618 = vector.shape_cast %617 : vector<1x128xf32> to vector<128xf32>
    %619 = arith.addf %616, %618 : vector<128xf32>
    %620 = vector.extract_strided_slice %614 {offsets = [2, 0], sizes = [1, 128], strides = [1, 1]} : vector<3x128xf32> to vector<1x128xf32>
    %621 = vector.shape_cast %620 : vector<1x128xf32> to vector<128xf32>
    %622 = arith.addf %619, %621 : vector<128xf32>
    %623 = arith.addf %622, %201 : vector<128xf32>
    %cst_254 = arith.constant 3.000000e+00 : f32
    %624 = vector.broadcast %cst_254 : f32 to vector<128xf32>
    %625 = arith.addf %623, %624 : vector<128xf32>
    %cst_255 = arith.constant 0.000000e+00 : f32
    %cst_256 = arith.constant 6.000000e+00 : f32
    %626 = vector.broadcast %cst_255 : f32 to vector<128xf32>
    %627 = arith.maximumf %626, %625 : vector<128xf32>
    %628 = vector.broadcast %cst_256 : f32 to vector<128xf32>
    %629 = arith.minimumf %628, %627 : vector<128xf32>
    %cst_257 = arith.constant 0.166666672 : f32
    %630 = vector.broadcast %cst_257 : f32 to vector<128xf32>
    %631 = arith.mulf %629, %630 : vector<128xf32>
    %632 = arith.mulf %623, %631 : vector<128xf32>
    %c13 = arith.constant 13 : index
    %c0_258 = arith.constant 0 : index
    %633 = vector.load %arg20[%c13, %c0_258] : memref<16x128xf32, #tpu.memory_space<vmem>>, vector<1x128xf32>
    %634 = vector.shape_cast %633 : vector<1x128xf32> to vector<128xf32>
    %635 = vector.shape_cast %632 : vector<128xf32> to vector<1x128xf32>
    tpu.vector_store %arg20[%c13, %c0_258], %635 {strides = array<i32>} : memref<16x128xf32, #tpu.memory_space<vmem>>, vector<1x128xf32>,
    %c6_259 = arith.constant 6 : index
    %c4_260 = arith.constant 4 : index
    %c0_261 = arith.constant 0 : index
    %636 = vector.load %arg19[%c6_259, %c4_260, %c0_261] : memref<10x16x128xf32, #tpu.memory_space<vmem>>, vector<3x3x128xf32>
    %637 = arith.mulf %636, %199 : vector<3x3x128xf32>
    %638 = vector.extract_strided_slice %637 {offsets = [0, 0, 0], sizes = [1, 3, 128], strides = [1, 1, 1]} : vector<3x3x128xf32> to vector<1x3x128xf32>
    %639 = vector.shape_cast %638 : vector<1x3x128xf32> to vector<3x128xf32>
    %640 = vector.extract_strided_slice %637 {offsets = [1, 0, 0], sizes = [1, 3, 128], strides = [1, 1, 1]} : vector<3x3x128xf32> to vector<1x3x128xf32>
    %641 = vector.shape_cast %640 : vector<1x3x128xf32> to vector<3x128xf32>
    %642 = arith.addf %639, %641 : vector<3x128xf32>
    %643 = vector.extract_strided_slice %637 {offsets = [2, 0, 0], sizes = [1, 3, 128], strides = [1, 1, 1]} : vector<3x3x128xf32> to vector<1x3x128xf32>
    %644 = vector.shape_cast %643 : vector<1x3x128xf32> to vector<3x128xf32>
    %645 = arith.addf %642, %644 : vector<3x128xf32>
    %646 = vector.extract_strided_slice %645 {offsets = [0, 0], sizes = [1, 128], strides = [1, 1]} : vector<3x128xf32> to vector<1x128xf32>
    %647 = vector.shape_cast %646 : vector<1x128xf32> to vector<128xf32>
    %648 = vector.extract_strided_slice %645 {offsets = [1, 0], sizes = [1, 128], strides = [1, 1]} : vector<3x128xf32> to vector<1x128xf32>
    %649 = vector.shape_cast %648 : vector<1x128xf32> to vector<128xf32>
    %650 = arith.addf %647, %649 : vector<128xf32>
    %651 = vector.extract_strided_slice %645 {offsets = [2, 0], sizes = [1, 128], strides = [1, 1]} : vector<3x128xf32> to vector<1x128xf32>
    %652 = vector.shape_cast %651 : vector<1x128xf32> to vector<128xf32>
    %653 = arith.addf %650, %652 : vector<128xf32>
    %654 = arith.addf %653, %201 : vector<128xf32>
    %cst_262 = arith.constant 3.000000e+00 : f32
    %655 = vector.broadcast %cst_262 : f32 to vector<128xf32>
    %656 = arith.addf %654, %655 : vector<128xf32>
    %cst_263 = arith.constant 0.000000e+00 : f32
    %cst_264 = arith.constant 6.000000e+00 : f32
    %657 = vector.broadcast %cst_263 : f32 to vector<128xf32>
    %658 = arith.maximumf %657, %656 : vector<128xf32>
    %659 = vector.broadcast %cst_264 : f32 to vector<128xf32>
    %660 = arith.minimumf %659, %658 : vector<128xf32>
    %cst_265 = arith.constant 0.166666672 : f32
    %661 = vector.broadcast %cst_265 : f32 to vector<128xf32>
    %662 = arith.mulf %660, %661 : vector<128xf32>
    %663 = arith.mulf %654, %662 : vector<128xf32>
    %c14 = arith.constant 14 : index
    %c0_266 = arith.constant 0 : index
    %664 = vector.load %arg20[%c14, %c0_266] : memref<16x128xf32, #tpu.memory_space<vmem>>, vector<1x128xf32>
    %665 = vector.shape_cast %664 : vector<1x128xf32> to vector<128xf32>
    %666 = vector.shape_cast %663 : vector<128xf32> to vector<1x128xf32>
    tpu.vector_store %arg20[%c14, %c0_266], %666 {strides = array<i32>} : memref<16x128xf32, #tpu.memory_space<vmem>>, vector<1x128xf32>,
    %c6_267 = arith.constant 6 : index
    %c6_268 = arith.constant 6 : index
    %c0_269 = arith.constant 0 : index
    %667 = vector.load %arg19[%c6_267, %c6_268, %c0_269] : memref<10x16x128xf32, #tpu.memory_space<vmem>>, vector<3x3x128xf32>
    %668 = arith.mulf %667, %199 : vector<3x3x128xf32>
    %669 = vector.extract_strided_slice %668 {offsets = [0, 0, 0], sizes = [1, 3, 128], strides = [1, 1, 1]} : vector<3x3x128xf32> to vector<1x3x128xf32>
    %670 = vector.shape_cast %669 : vector<1x3x128xf32> to vector<3x128xf32>
    %671 = vector.extract_strided_slice %668 {offsets = [1, 0, 0], sizes = [1, 3, 128], strides = [1, 1, 1]} : vector<3x3x128xf32> to vector<1x3x128xf32>
    %672 = vector.shape_cast %671 : vector<1x3x128xf32> to vector<3x128xf32>
    %673 = arith.addf %670, %672 : vector<3x128xf32>
    %674 = vector.extract_strided_slice %668 {offsets = [2, 0, 0], sizes = [1, 3, 128], strides = [1, 1, 1]} : vector<3x3x128xf32> to vector<1x3x128xf32>
    %675 = vector.shape_cast %674 : vector<1x3x128xf32> to vector<3x128xf32>
    %676 = arith.addf %673, %675 : vector<3x128xf32>
    %677 = vector.extract_strided_slice %676 {offsets = [0, 0], sizes = [1, 128], strides = [1, 1]} : vector<3x128xf32> to vector<1x128xf32>
    %678 = vector.shape_cast %677 : vector<1x128xf32> to vector<128xf32>
    %679 = vector.extract_strided_slice %676 {offsets = [1, 0], sizes = [1, 128], strides = [1, 1]} : vector<3x128xf32> to vector<1x128xf32>
    %680 = vector.shape_cast %679 : vector<1x128xf32> to vector<128xf32>
    %681 = arith.addf %678, %680 : vector<128xf32>
    %682 = vector.extract_strided_slice %676 {offsets = [2, 0], sizes = [1, 128], strides = [1, 1]} : vector<3x128xf32> to vector<1x128xf32>
    %683 = vector.shape_cast %682 : vector<1x128xf32> to vector<128xf32>
    %684 = arith.addf %681, %683 : vector<128xf32>
    %685 = arith.addf %684, %201 : vector<128xf32>
    %cst_270 = arith.constant 3.000000e+00 : f32
    %686 = vector.broadcast %cst_270 : f32 to vector<128xf32>
    %687 = arith.addf %685, %686 : vector<128xf32>
    %cst_271 = arith.constant 0.000000e+00 : f32
    %cst_272 = arith.constant 6.000000e+00 : f32
    %688 = vector.broadcast %cst_271 : f32 to vector<128xf32>
    %689 = arith.maximumf %688, %687 : vector<128xf32>
    %690 = vector.broadcast %cst_272 : f32 to vector<128xf32>
    %691 = arith.minimumf %690, %689 : vector<128xf32>
    %cst_273 = arith.constant 0.166666672 : f32
    %692 = vector.broadcast %cst_273 : f32 to vector<128xf32>
    %693 = arith.mulf %691, %692 : vector<128xf32>
    %694 = arith.mulf %685, %693 : vector<128xf32>
    %c15 = arith.constant 15 : index
    %c0_274 = arith.constant 0 : index
    %695 = vector.load %arg20[%c15, %c0_274] : memref<16x128xf32, #tpu.memory_space<vmem>>, vector<1x128xf32>
    %696 = vector.shape_cast %695 : vector<1x128xf32> to vector<128xf32>
    %697 = vector.shape_cast %694 : vector<128xf32> to vector<1x128xf32>
    tpu.vector_store %arg20[%c15, %c0_274], %697 {strides = array<i32>} : memref<16x128xf32, #tpu.memory_space<vmem>>, vector<1x128xf32>,
    %c0_275 = arith.constant 0 : index
    %c0_276 = arith.constant 0 : index
    %698 = vector.load %arg20[%c0_275, %c0_276] : memref<16x128xf32, #tpu.memory_space<vmem>>, vector<16x128xf32>
    %699 = arith.truncf %698 : vector<16x128xf32> to vector<16x128xbf16>
    %c0_277 = arith.constant 0 : index
    %c0_278 = arith.constant 0 : index
    %700 = vector.load %arg16[%c0_277, %c0_278] : memref<128x256xbf16, #tpu.memory_space<vmem>>, vector<128x256xbf16>
    %cst_279 = arith.constant dense<0.000000e+00> : vector<16x256xf32>
    %701 = tpu.matmul %699, %700, %cst_279 {dimension_numbers = #tpu.dot_dimension_numbers<[1], [0], [0], [1], [0, 0, 1, 1], [], []>} : vector<16x128xbf16>, vector<128x256xbf16>, vector<16x256xf32> -> vector<16x256xf32>
    %c0_280 = arith.constant 0 : index
    %c0_281 = arith.constant 0 : index
    %702 = vector.load %arg17[%c0_280, %c0_281] : memref<1x256xf32, #tpu.memory_space<vmem>>, vector<1x256xf32>
    %703 = vector.broadcast %702 : vector<1x256xf32> to vector<16x256xf32>
    %704 = arith.addf %701, %703 : vector<16x256xf32>
    %cst_282 = arith.constant 3.000000e+00 : f32
    %705 = vector.broadcast %cst_282 : f32 to vector<16x256xf32>
    %706 = arith.addf %704, %705 : vector<16x256xf32>
    %cst_283 = arith.constant 0.000000e+00 : f32
    %cst_284 = arith.constant 6.000000e+00 : f32
    %707 = vector.broadcast %cst_283 : f32 to vector<16x256xf32>
    %708 = arith.maximumf %707, %706 : vector<16x256xf32>
    %709 = vector.broadcast %cst_284 : f32 to vector<16x256xf32>
    %710 = arith.minimumf %709, %708 : vector<16x256xf32>
    %cst_285 = arith.constant 0.166666672 : f32
    %711 = vector.broadcast %cst_285 : f32 to vector<16x256xf32>
    %712 = arith.mulf %710, %711 : vector<16x256xf32>
    %713 = arith.mulf %704, %712 : vector<16x256xf32>
    %cst_286 = arith.constant dense<0.000000e+00> : vector<256xf32>
    %714 = vector.multi_reduction <add>, %713, %cst_286 [0] : vector<16x256xf32> to vector<256xf32>
    %715 = vector.shape_cast %714 : vector<256xf32> to vector<1x256xf32>
    %cst_287 = arith.constant 1.600000e+01 : f32
    %716 = vector.broadcast %cst_287 : f32 to vector<1x256xf32>
    %717 = arith.divf %715, %716 : vector<1x256xf32>
    %c0_288 = arith.constant 0 : index
    %c0_289 = arith.constant 0 : index
    %c0_290 = arith.constant 0 : index
    %718 = vector.load %arg18[%c0_288, %c0_289, %c0_290] : memref<1x1x256xf32, #tpu.memory_space<vmem>>, vector<1x1x256xf32>
    %719 = vector.shape_cast %718 : vector<1x1x256xf32> to vector<1x256xf32>
    %720 = vector.shape_cast %717 : vector<1x256xf32> to vector<1x1x256xf32>
    tpu.vector_store %arg18[%c0_288, %c0_289, %c0_290], %720 {strides = array<i32>} : memref<1x1x256xf32, #tpu.memory_space<vmem>>, vector<1x1x256xf32>,
    return
  }
  func.func @transform_0(%arg0: i32) -> (i32, i32, i32) {
    %c0_i32 = arith.constant 0 : i32
    %c0_i32_0 = arith.constant 0 : i32
    %c0_i32_1 = arith.constant 0 : i32
    return %arg0, %c0_i32, %c0_i32_0 : i32, i32, i32
  }
  func.func @transform_1(%arg0: i32) -> (i32, i32) {
    %c0_i32 = arith.constant 0 : i32
    %c0_i32_0 = arith.constant 0 : i32
    %c0_i32_1 = arith.constant 0 : i32
    return %c0_i32, %c0_i32_0 : i32, i32
  }
  func.func @transform_2(%arg0: i32) -> (i32, i32) {
    %c0_i32 = arith.constant 0 : i32
    %c0_i32_0 = arith.constant 0 : i32
    %c0_i32_1 = arith.constant 0 : i32
    return %c0_i32, %c0_i32_0 : i32, i32
  }
  func.func @transform_3(%arg0: i32) -> (i32, i32) {
    %c0_i32 = arith.constant 0 : i32
    %c0_i32_0 = arith.constant 0 : i32
    %c0_i32_1 = arith.constant 0 : i32
    return %c0_i32, %c0_i32_0 : i32, i32
  }
  func.func @transform_4(%arg0: i32) -> (i32, i32) {
    %c0_i32 = arith.constant 0 : i32
    %c0_i32_0 = arith.constant 0 : i32
    %c0_i32_1 = arith.constant 0 : i32
    return %c0_i32, %c0_i32_0 : i32, i32
  }
  func.func @transform_5(%arg0: i32) -> (i32, i32) {
    %c0_i32 = arith.constant 0 : i32
    %c0_i32_0 = arith.constant 0 : i32
    %c0_i32_1 = arith.constant 0 : i32
    return %c0_i32, %c0_i32_0 : i32, i32
  }
  func.func @transform_6(%arg0: i32) -> (i32, i32) {
    %c0_i32 = arith.constant 0 : i32
    %c0_i32_0 = arith.constant 0 : i32
    %c0_i32_1 = arith.constant 0 : i32
    return %c0_i32, %c0_i32_0 : i32, i32
  }
  func.func @transform_7(%arg0: i32) -> (i32, i32) {
    %c0_i32 = arith.constant 0 : i32
    %c0_i32_0 = arith.constant 0 : i32
    %c0_i32_1 = arith.constant 0 : i32
    return %c0_i32, %c0_i32_0 : i32, i32
  }
  func.func @transform_8(%arg0: i32) -> (i32, i32) {
    %c0_i32 = arith.constant 0 : i32
    %c0_i32_0 = arith.constant 0 : i32
    %c0_i32_1 = arith.constant 0 : i32
    return %c0_i32, %c0_i32_0 : i32, i32
  }
  func.func @transform_9(%arg0: i32) -> (i32, i32) {
    %c0_i32 = arith.constant 0 : i32
    %c0_i32_0 = arith.constant 0 : i32
    %c0_i32_1 = arith.constant 0 : i32
    return %c0_i32, %c0_i32_0 : i32, i32
  }
  func.func @transform_10(%arg0: i32) -> (i32, i32) {
    %c0_i32 = arith.constant 0 : i32
    %c0_i32_0 = arith.constant 0 : i32
    %c0_i32_1 = arith.constant 0 : i32
    return %c0_i32, %c0_i32_0 : i32, i32
  }
  func.func @transform_11(%arg0: i32) -> (i32, i32) {
    %c0_i32 = arith.constant 0 : i32
    %c0_i32_0 = arith.constant 0 : i32
    %c0_i32_1 = arith.constant 0 : i32
    return %c0_i32, %c0_i32_0 : i32, i32
  }
  func.func @transform_12(%arg0: i32) -> (i32, i32) {
    %c0_i32 = arith.constant 0 : i32
    %c0_i32_0 = arith.constant 0 : i32
    %c0_i32_1 = arith.constant 0 : i32
    return %c0_i32, %c0_i32_0 : i32, i32
  }
  func.func @transform_13(%arg0: i32) -> (i32, i32, i32) {
    %c0_i32 = arith.constant 0 : i32
    %c0_i32_0 = arith.constant 0 : i32
    %c0_i32_1 = arith.constant 0 : i32
    %c0_i32_2 = arith.constant 0 : i32
    return %c0_i32, %c0_i32_0, %c0_i32_1 : i32, i32, i32
  }
  func.func @transform_14(%arg0: i32) -> (i32, i32) {
    %c0_i32 = arith.constant 0 : i32
    %c0_i32_0 = arith.constant 0 : i32
    %c0_i32_1 = arith.constant 0 : i32
    return %c0_i32, %c0_i32_0 : i32, i32
  }
  func.func @transform_15(%arg0: i32) -> (i32, i32) {
    %c0_i32 = arith.constant 0 : i32
    %c0_i32_0 = arith.constant 0 : i32
    %c0_i32_1 = arith.constant 0 : i32
    return %c0_i32, %c0_i32_0 : i32, i32
  }
  func.func @transform_16(%arg0: i32) -> (i32, i32) {
    %c0_i32 = arith.constant 0 : i32
    %c0_i32_0 = arith.constant 0 : i32
    %c0_i32_1 = arith.constant 0 : i32
    return %c0_i32, %c0_i32_0 : i32, i32
  }
  func.func @transform_17(%arg0: i32) -> (i32, i32, i32) {
    %c0_i32 = arith.constant 0 : i32
    %c0_i32_0 = arith.constant 0 : i32
    %c0_i32_1 = arith.constant 0 : i32
    return %arg0, %c0_i32, %c0_i32_0 : i32, i32, i32
  }
}

</mosaic_0001>

<bundles_post_ra>
// kernel: mobilenet_v3_forward.3
= control target key start
LH: loop header
LB: loop body
LE: loop exit
PB: predicated region body
PF: predicated region fallthrough
CT: control target
= control target key end

     0   :  { %vm81_vm0 = vcmask 1041409   ;;  %s565_s1 = inlined_call_operand.vmem [shape: bf16[256,128], index: 1, kind: input, shape index: {}]   ;;  %s566_s3 = inlined_call_operand.vmem [shape: bf16[128,128], index: 3, kind: input, shape index: {}]   ;;  %s567_s0 = inlined_call_operand.vmem [shape: f32[2,1,256], index: 0, kind: input, shape index: {}]   ;;  %s568_s2 = inlined_call_operand.vmem [shape: f32[1,128], index: 2, kind: input, shape index: {}]   ;;  %s569_s4 = inlined_call_operand.vmem [shape: f32[1,128], index: 4, kind: input, shape index: {}]   ;;  %s570_s5 = inlined_call_operand.vmem [shape: f32[2,128], index: 5, kind: output, shape index: {}]  }
   0x1   :  { %v425_v0 = vld [vmem:[%s565_s1 + $0x38] sm:$0xff]  ;;  %v424_v2 = vld [vmem:[%s565_s1 + $0x30] sm:$0xff]  ;;  %v423_v4 = vld [vmem:[%s565_s1 + $0x28] sm:$0xff] }
   0x2   :  { %v433_v1 = vld [vmem:[%s565_s1 + $0x78] sm:$0xff]  ;;  %185 = vmatpush.bf16.msra.mxu0 %v425_v0  ;;  %v432_v3 = vld [vmem:[%s565_s1 + $0x70] sm:$0xff]  ;;  %v431_v5 = vld [vmem:[%s565_s1 + $0x68] sm:$0xff] }
   0x3   :  { %198 = vmatpush.bf16.msra.mxu1 %v433_v1  ;;  %v441_v6 = vld [vmem:[%s566_s3 + $0x38] sm:$0xff]  ;;  %v21_v7 = vld [vmem:[%s567_s0 + $0x2] sm:$0x3]  ;;  %v440_v8 = vld [vmem:[%s566_s3 + $0x30] sm:$0xff] }
   0x4   :  { %285 = vmatpush.bf16.msra.mxu2 %v441_v6  ;;  %v422_v9 = vld [vmem:[%s565_s1 + $0x20] sm:$0xff]  ;;  %v26_v11 = vperm.slane %v21_v7, 0  ;;  %v27_v12 = vperm.slane %v21_v7, 1  ;;  %v439_v14 = vld [vmem:[%s566_s3 + $0x28] sm:$0xff]  ;;  %v421_v15 = vld [vmem:[%s565_s1 + $0x18] sm:$0xff] }
   0x5   :  { %v430_v10 = vld [vmem:[%s565_s1 + $0x60] sm:$0xff]  ;;  %v429_v16 = vld [vmem:[%s565_s1 + $0x58] sm:$0xff]  ;;  %v420_v22 = vld [vmem:[%s565_s1 + $0x10] sm:$0xff] }
   0x6   :  { %186 = vmatpush.bf16.msra.mxu0 %v424_v2  ;;  %v20_v13 = vld [vmem:[%s567_s0] sm:$0x3]  ;;  %v34_v18 = vpack.c.bf16 %v26_v11, %v26_v11  ;;  %v35_v20 = vpack.c.bf16 %v27_v12, %v27_v12  ;;  %v428_v23 = vld [vmem:[%s565_s1 + $0x50] sm:$0xff]  ;;  %v419_v28 = vld [vmem:[%s565_s1 + $0x8] sm:$0xff] }
   0x7   :  { %199 = vmatpush.bf16.msra.mxu1 %v432_v3  ;;  %v24_v17 = vperm.slane %v20_v13, 0  ;;  %v25_v19 = vperm.slane %v20_v13, 1  ;;  %v438_v21 = vld [vmem:[%s566_s3 + $0x20] sm:$0xff]  ;;  %v427_v29 = vld [vmem:[%s565_s1 + $0x48] sm:$0xff]  ;;  %v437_v40 = vld [vmem:[%s566_s3 + $0x18] sm:$0xff] }
   0x8   :  { %286 = vmatpush.bf16.msra.mxu2 %v440_v8  ;;  %v78_v25 = vunpack.c.l.b16 %v34_v18  ;;  %v79_v27 = vunpack.c.l.b16 %v35_v20  ;;  %v418_v34 = vld [vmem:[%s565_s1] sm:$0xff]  ;;  %v436_v41 = vld [vmem:[%s566_s3 + $0x10] sm:$0xff]  ;;  %v435_v42 = vld [vmem:[%s566_s3 + $0x8] sm:$0xff] }
   0x9   :  { %v32_v24 = vpack.c.bf16 %v24_v17, %v24_v17  ;;  %v33_v26 = vpack.c.bf16 %v25_v19, %v25_v19  ;;  %v426_v35 = vld [vmem:[%s565_s1 + $0x40] sm:$0xff] }
   0xa   :  { %187 = vmatpush.bf16.msra.mxu0 %v423_v4  ;;  %v80_v31 = vrot.slane %v78_v25, 7  ;;  %v83_v33 = vrot.slane %v79_v27, 7  ;;  %v434_v43 = vld [vmem:[%s566_s3] sm:$0xff] }
   0xb   :  { %200 = vmatpush.bf16.msra.mxu1 %v431_v5  ;;  %v76_v30 = vunpack.c.l.b16 %v32_v24  ;;  %v77_v32 = vunpack.c.l.b16 %v33_v26  ;;  %v442_v44 = vld [vmem:[%s568_s2] ss:$0 sm:$0xff] }
   0xc   :  { %287 = vmatpush.bf16.msra.mxu2 %v439_v14  ;;  %v443_v57 = vld [vmem:[%s569_s4] ss:$0 sm:$0xff] }
   0xd   :  { %v82_v36 = vsel %vm81_vm0, %v80_v31, %v76_v30  ;;  %v84_v37 = vsel %vm81_vm0, %v83_v33, %v77_v32 }
   0xe   :  { %188 = vmatpush.bf16.msra.mxu0 %v422_v9  ;;  %v85_v38 = vpack.c.b16 %v82_v36, %v82_v36  ;;  %v86_v39 = vpack.c.b16 %v84_v37, %v84_v37 }
   0xf   :  { %201 = vmatpush.bf16.msra.mxu1 %v430_v10 }
  0x10   :  { %288 = vmatpush.bf16.msra.mxu2 %v438_v21 }
  0x12   :  { %189 = vmatpush.bf16.msra.mxu0 %v421_v15 }
  0x13   :  { %202 = vmatpush.bf16.msra.mxu1 %v429_v16 }
  0x14   :  { %289 = vmatpush.bf16.msra.mxu2 %v437_v40 }
  0x16   :  { %190 = vmatpush.bf16.msra.mxu0 %v420_v22 }
  0x17   :  { %203 = vmatpush.bf16.msra.mxu1 %v428_v23 }
  0x18   :  { %290 = vmatpush.bf16.msra.mxu2 %v436_v41 }
  0x1a   :  { %191 = vmatpush.bf16.msra.mxu0 %v419_v28 }
  0x1b   :  { %204 = vmatpush.bf16.msra.mxu1 %v427_v29 }
  0x1c   :  { %291 = vmatpush.bf16.msra.mxu2 %v435_v42 }
  0x1e   :  { %192 = vmatpush.bf16.msra.mxu0 %v418_v34 }
  0x1f   :  { %205 = vmatpush.bf16.msra.mxu1 %v426_v35 }
  0x20   :  { %292 = vmatpush.bf16.msra.mxu2 %v434_v43 }
  0x21   :  { %193 = vmatmul.bf16.vlgmr.msra.gmra.mxu0 %v85_v38 }
  0x22   :  { %206 = vmatmul.bf16.vlgmr.msra.gmra.mxu1 %v86_v39 }
  0x9e   :  { %v194_v45 = vpop.f32.mrf.mxu0 }
  0x9f   :  { %v207_v46 = vpop.f32.mrf.mxu1  ;;  %v195_v47 = vadd.f32 %v442_v44, %v194_v45 }
  0xa1   :  { %v208_v48 = vadd.f32 %v207_v46, %v195_v47 }
  0xa3   :  { %v211_v49 = vadd.f32 3.0, %v208_v48 }
  0xa5   :  { %v212_v50 = vmax.f32 %v211_v49, 0.0 }
  0xa6   :  { %v196_v51 = vpop.f32.mrf.mxu0 }
  0xa7   :  { %v209_v52 = vpop.f32.mrf.mxu1  ;;  %v213_v53 = vmin.f32 %v212_v50, 6.0 }
  0xa9   :  { %v214_v54 = vmul.f32 0.16666667, %v213_v53 }
  0xab   :  { %v215_v55 = vmul.f32 %v214_v54, %v208_v48 }
  0xad   :  { %v216_v56 = vpack.c.bf16 %v215_v55, %v215_v55 }
  0xaf   :  { %293 = vmatmul.bf16.vlgmr.msra.gmra.mxu2 %v216_v56 }
 0x132   :  { %v294_v58 = vpop.f32.mrf.mxu2 }
 0x133   :  { %v295_v59 = vadd.f32 %v443_v57, %v294_v58 }
 0x135   :  { %v298_v60 = vsub.f32 0.0, %v295_v59 }
 0x137   :  { %v299_v61 = vmul.f32 1.442695, %v298_v60 }
 0x139   :  { %444 = vpow2.f32 %v299_v61 }
 0x13a   :  { %v296_v62 = vpop.f32.mrf.mxu2 }
 0x13f   :  { %v445_v63 = vpop.eup %444 }
 0x140   :  { %v301_v0 = vadd.f32 1.0, %v445_v63 }
 0x142   :  { %446 = vrcp.f32 %v301_v0  ;;  %v313_v4 = vand.u32 2147483648, %v301_v0  ;;  %v311_v6 = vand.u32 2147483647, %v301_v0  ;;  %vm307_vm2 = vweird.f32 %v301_v0 }
 0x144   :  { %v314_v8 = vor.u32 1.1754944e-38, %v313_v4  ;;  %vm312_vm4 = vcmp.eq.f32.partialorder %v311_v6, 8.507059e+37 }
 0x148   :  { %v447_v1 = vpop.eup %446 }
 0x149   :  { %v303_v2 = vmul.f32 %v447_v1, %v301_v0  ;;  %vm308_vm1 = vweird.f32 %v447_v1 }
 0x14a   :  { %vm309_vm3 = vmor %vm307_vm2, %vm308_vm1 }
 0x14b   :  { %v304_v3 = vsub.f32 1.0, %v303_v2 }
 0x14d   :  { %v305_v5 = vmul.f32 %v447_v1, %v304_v3 }
 0x14f   :  { %v306_v7 = vadd.f32 %v447_v1, %v305_v5 }
 0x151   :  { %v310_v9 = vsel %vm309_vm3, %v447_v1, %v306_v7 }
 0x152   :  { %v315_v10 = vsel %vm312_vm4, %v314_v8, %v310_v9 }
 0x153   :  { %317 = vst [vmem:[%s570_s5] sm:$0x3] %v315_v10 }

// kernel: mobilenet_v3_forward.2
= control target key start
LH: loop header
LB: loop body
LE: loop exit
PB: predicated region body
PF: predicated region fallthrough
CT: control target
= control target key end

     0   :  { %s2485_s24 = smov 0   ;;  %s3214_s0 = inlined_call_operand.vmem [shape: bf16[2,64,128], index: 0, kind: input, shape index: {}]   ;;  %s3215_s1 = inlined_call_operand.vmem [shape: bf16[128,128], index: 1, kind: input, shape index: {}]   ;;  %s3216_s2 = inlined_call_operand.vmem [shape: f32[1,128], index: 2, kind: input, shape index: {}]   ;;  %s3217_s3 = inlined_call_operand.vmem [shape: f32[16,128], index: 3, kind: input, shape index: {}]   ;;  %s3218_s4 = inlined_call_operand.vmem [shape: f32[1,128], index: 4, kind: input, shape index: {}]   ;;  %s3219_s5 = inlined_call_operand.vmem [shape: bf16[128,128], index: 5, kind: input, shape index: {}]   ;;  %s3220_s6 = inlined_call_operand.vmem [shape: f32[1,128], index: 6, kind: input, shape index: {}]   ;;  %s3221_s7 = inlined_call_operand.vmem [shape: bf16[128,128], index: 7, kind: input, shape index: {}]   ;;  %s3222_s8 = inlined_call_operand.vmem [shape: f32[1,128], index: 8, kind: input, shape index: {}]   ;;  %s3223_s9 = inlined_call_operand.vmem [shape: bf16[128,128], index: 9, kind: input, shape index: {}]   ;;  %s3224_s10 = inlined_call_operand.vmem [shape: f32[1,128], index: 10, kind: input, shape index: {}]   ;;  %s3225_s11 = inlined_call_operand.vmem [shape: bf16[128,128], index: 11, kind: input, shape index: {}]   ;;  %s3226_s12 = inlined_call_operand.vmem [shape: f32[1,128], index: 12, kind: input, shape index: {}]   ;;  %s3227_s13 = inlined_call_operand.vmem [shape: f32[3,3,128], index: 13, kind: input, shape index: {}]   ;;  %s3228_s14 = inlined_call_operand.vmem [shape: f32[1,128], index: 14, kind: input, shape index: {}]   ;;  %s3229_s15 = inlined_call_operand.vmem [shape: bf16[128,256], index: 15, kind: input, shape index: {}]   ;;  %s3230_s16 = inlined_call_operand.vmem [shape: f32[1,256], index: 16, kind: input, shape index: {}]   ;;  %s3231_s17 = inlined_call_operand.vmem [shape: f32[2,1,256], index: 17, kind: output, shape index: {}]  }
   0x1   :  { %3233 = sst [smem:[#allocation4_spill]] %s3214_s0 }
   0x2   :  { %3234 = sst [smem:[#allocation5_spill]] %s3215_s1 }
   0x3 LB: > { %s2045_s25 = sadd.s32 4294967295, %s2390_s24   ;;  %p2049_p0 = scmp.ge.s32.totalorder %s2390_s24, 1  ;;  %s2390_s24 = sphi %s2485_s24, %s27_s24  }
   0x4   : > { %p487_p1 = scmp.lt.s32.totalorder %s2390_s24, 3 }
   0x6   : > { %p488_p2 = pnand %p2049_p0, %p487_p1 }
   0x7   : > { %s3235_s28 = sld [smem:[#allocation5_spill]] (!%p488_p2)  ;;  %p538_p3 = scmp.lt.s32.totalorder (!%p488_p2), %s2045_s25, 1 }
   0x8   : > { %491 = sbr.rel (%p488_p2) target bundleno = 1128 (0x468), region = 88  ;;  %s3236_s1 = sld [smem:[#allocation4_spill]] (!%p488_p2) }
   0xd   : > { %v2307_v0 = vld [vmem:[%s3235_s28 + $0x38] sm:$0xff]  ;;  %v2306_v1 = vld [vmem:[%s3235_s28 + $0x30] sm:$0xff]  ;;  %v2305_v2 = vld [vmem:[%s3235_s28 + $0x28] sm:$0xff]  ;;  %s3238_s25 = smov (!%p538_p3, %s2045_s25), 1  ;;  %v2392_v12 = vmov 0.0   ;;  %vm1984_vm2 = vcmask 1040384  }
   0xe   : > { %647 = vmatpush.bf16.msra.mxu0 %v2307_v0  ;;  %v2304_v3 = vld [vmem:[%s3235_s28 + $0x20] sm:$0xff]  ;;  %v2303_v4 = vld [vmem:[%s3235_s28 + $0x18] sm:$0xff]  ;;  %v2302_v5 = vld [vmem:[%s3235_s28 + $0x10] sm:$0xff]  ;;  %s2295_s29 = sshll.u32 %s3238_s25, 5  ;;  %718 = vst [vmem:[#allocation2 + $0x10] sm:$0xff] %v2392_v12  ;;  %s2052_s21 = sshll.u32 %s3238_s25, 1 }
   0xf   : > { %v2301_v6 = vld [vmem:[%s3235_s28 + $0x8] sm:$0xff]  ;;  %v2300_v7 = vld [vmem:[%s3235_s28] sm:$0xff]  ;;  %s542_s20 = scalar_lea.vmem %s3236_s1, %s2295_s29  ;;  %719 = vst [vmem:[#allocation2 + $0x18] sm:$0xff] %v2392_v12  ;;  %v2315_v58 = vld [vmem:[%s3219_s5 + $0x38] sm:$0xff]  ;;  %s546_s26 = scalar_lea.vmem %s3231_s17, %s2052_s21 }
  0x10   : > { %v2296_v8 = vld [vmem:[%s542_s20] sm:$0xff]  ;;  %v2297_v9 = vld [vmem:[%s542_s20 + $0x8] sm:$0xff]  ;;  %v2298_v10 = vld [vmem:[%s542_s20 + $0x10] sm:$0xff]  ;;  %716 = vst [vmem:[#allocation2] sm:$0xff] %v2392_v12  ;;  %1085 = vmatpush.bf16.msra.mxu2 %v2315_v58 }
  0x11   : > { %v2299_v11 = vld [vmem:[%s542_s20 + $0x18] sm:$0xff]  ;;  %717 = vst [vmem:[#allocation2 + $0x8] sm:$0xff] %v2392_v12  ;;  %v2526_v13 = vld [vmem:[%s3216_s2] ss:$0 sm:$0xff]  ;;  %v2549_v41 = vld [vmem:[%s3217_s3 + $0x1] ss:$0 sm:$0xff] }
  0x12   : > { %648 = vmatpush.bf16.msra.mxu0 %v2306_v1  ;;  %720 = vst [vmem:[#allocation2 + $0x20] sm:$0xff] %v2392_v12  ;;  %v2543_v38 = vld [vmem:[%s3217_s3] ss:$0 sm:$0xff]  ;;  %v2554_v43 = vld [vmem:[%s3217_s3 + $0x2] ss:$0 sm:$0xff]  ;;  %v2314_v63 = vld [vmem:[%s3219_s5 + $0x30] sm:$0xff] }
  0x13   : > { %721 = vst [vmem:[#allocation2 + $0x28] sm:$0xff] %v2392_v12  ;;  %v762_v45 = vmul.f32 0.0, %v2543_v38  ;;  %v2566_v56 = vld [vmem:[%s3217_s3 + $0x3] ss:$0 sm:$0xff]  ;;  %v2644_v58 = vld [vmem:[%s3217_s3 + $0x7] ss:$0 sm:$0xff] }
  0x14   : > { %722 = vst [vmem:[#allocation2 + $0x30] sm:$0xff] %v2392_v12  ;;  %1086 = vmatpush.bf16.msra.mxu2 %v2314_v63 }
  0x15   : > { %723 = vst [vmem:[#allocation2 + $0x38] sm:$0xff] %v2392_v12 }
  0x16   : > { %649 = vmatpush.bf16.msra.mxu0 %v2305_v2  ;;  %724 = vst [vmem:[#allocation2 + $0x40] sm:$0xff] %v2392_v12 }
  0x17   : > { %725 = vst [vmem:[#allocation2 + $0x48] sm:$0xff] %v2392_v12 }
  0x18   : > { %726 = vst [vmem:[#allocation2 + $0x50] sm:$0xff] %v2392_v12  ;;  %v770_v40 = vld [vmem:[#allocation2 + $0x1] sm:$0xff] }
  0x19   : > { %727 = vst [vmem:[#allocation2 + $0x58] sm:$0xff] %v2392_v12  ;;  %v780_v46 = vmul.f32 %v2549_v41, %v770_v40  ;;  %v796_v50 = vld [vmem:[#allocation2 + $0x2] sm:$0xff] }
  0x1a   : > { %650 = vmatpush.bf16.msra.mxu0 %v2304_v3  ;;  %728 = vst [vmem:[#allocation2 + $0x60] sm:$0xff] %v2392_v12  ;;  %v806_v55 = vmul.f32 %v2554_v43, %v796_v50 }
  0x1b   : > { %729 = vst [vmem:[#allocation2 + $0x68] sm:$0xff] %v2392_v12  ;;  %v788_v54 = vadd.f32 %v780_v46, %v762_v45 }
  0x1c   : > { %730 = vst [vmem:[#allocation2 + $0x70] sm:$0xff] %v2392_v12 }
  0x1d   : > { %731 = vst [vmem:[#allocation2 + $0x78] sm:$0xff] %v2392_v12  ;;  %v814_v2 = vadd.f32 %v806_v55, %v788_v54 }
  0x1e   : > { %651 = vmatpush.bf16.msra.mxu0 %v2303_v4  ;;  %732 = vst [vmem:[#allocation2 + $0x80] sm:$0xff] %v2392_v12 }
  0x1f   : > { %733 = vst [vmem:[#allocation2 + $0x88] sm:$0xff] %v2392_v12 }
  0x20   : > { %734 = vst [vmem:[#allocation2 + $0x90] sm:$0xff] %v2392_v12 }
  0x21   : > { %735 = vst [vmem:[#allocation2 + $0x98] sm:$0xff] %v2392_v12 }
  0x22   : > { %652 = vmatpush.bf16.msra.mxu0 %v2302_v5 }
  0x26   : > { %653 = vmatpush.bf16.msra.mxu0 %v2301_v6 }
  0x2a   : > { %654 = vmatpush.bf16.msra.mxu0 %v2300_v7 }
  0x2d   : > { %655 = vmatmul.bf16.vlgmr.msra.gmra.mxu0 %v2296_v8 }
  0x3d   : > { %660 = vmatmul.bf16.gmra.mxu0 %v2297_v9 }
  0x4d   : > { %665 = vmatmul.bf16.gmra.mxu0 %v2298_v10  ;;  %v2585_v10 = vld [vmem:[%s3217_s3 + $0x4] ss:$0 sm:$0xff] }
  0x5d   : > { %670 = vmatmul.bf16.gmra.mxu0 %v2299_v11 }
  0xaa   : > { %v656_v14 = vpop.f32.mrf.mxu0 }
  0xab   : > { %v657_v15 = vadd.f32 %v2526_v13, %v656_v14  ;;  %v2313_v14 = vld [vmem:[%s3219_s5 + $0x28] sm:$0xff] }
  0xac   : > { %1087 = vmatpush.bf16.msra.mxu2 %v2313_v14 }
  0xad   : > { %v676_v16 = vadd.f32 3.0, %v657_v15 }
  0xaf   : > { %v684_v17 = vmax.f32 %v676_v16, 0.0 }
  0xb1   : > { %v692_v18 = vmin.f32 %v684_v17, 6.0 }
  0xb2   : > { %v658_v19 = vpop.f32.mrf.mxu0 }
  0xb3   : > { %v700_v20 = vmul.f32 0.16666667, %v692_v18  ;;  %v659_v21 = vadd.f32 %v2526_v13, %v658_v19 }
  0xb5   : > { %v2530_v22 = vmul.f32 %v700_v20, %v657_v15  ;;  %v677_v23 = vadd.f32 3.0, %v659_v21 }
  0xb7   : > { %737 = vst [vmem:[#allocation2 + $0x11] sm:$0xff] %v2530_v22  ;;  %v685_v24 = vmax.f32 %v677_v23, 0.0  ;;  %v781_v59 = vmul.f32 %v2549_v41, %v2530_v22 }
  0xb9   : > { %v693_v25 = vmin.f32 %v685_v24, 6.0 }
  0xba   : > { %v661_v26 = vpop.f32.mrf.mxu0 }
  0xbb   : > { %v701_v27 = vmul.f32 0.16666667, %v693_v25  ;;  %v662_v28 = vadd.f32 %v2526_v13, %v661_v26  ;;  %v858_v25 = vmul.f32 %v2585_v10, %v2530_v22  ;;  %v2605_v26 = vld [vmem:[%s3217_s3 + $0x5] ss:$0 sm:$0xff] }
  0xbd   : > { %v2534_v29 = vmul.f32 %v701_v27, %v659_v21  ;;  %v678_v30 = vadd.f32 3.0, %v662_v28 }
  0xbe   : > { %v753_v47 = vld [vmem:[#allocation2 + $0x10] sm:$0xff] }
  0xbf   : > { %739 = vst [vmem:[#allocation2 + $0x21] sm:$0xff] %v2534_v29  ;;  %v686_v31 = vmax.f32 %v678_v30, 0.0  ;;  %v763_v53 = vmul.f32 %v2543_v38, %v753_v47  ;;  %v797_v60 = vld [vmem:[#allocation2 + $0x12] sm:$0xff]  ;;  %v832_v3 = vmul.f32 %v2566_v56, %v753_v47  ;;  %v782_v15 = vmul.f32 %v2549_v41, %v2534_v29 }
  0xc0   : > { %v807_v6 = vmul.f32 %v2554_v43, %v797_v60 }
  0xc1   : > { %v694_v32 = vmin.f32 %v686_v31, 6.0  ;;  %v789_v1 = vadd.f32 %v781_v59, %v763_v53  ;;  %v840_v17 = vadd.f32 %v832_v3, %v814_v2  ;;  %v2311_v53 = vld [vmem:[%s3219_s5 + $0x18] sm:$0xff] }
  0xc2   : > { %v663_v33 = vpop.f32.mrf.mxu0 }
  0xc3   : > { %v702_v34 = vmul.f32 0.16666667, %v694_v32  ;;  %v664_v35 = vadd.f32 %v2526_v13, %v663_v33  ;;  %v815_v16 = vadd.f32 %v807_v6, %v789_v1 }
  0xc5   : > { %v2538_v36 = vmul.f32 %v702_v34, %v662_v28  ;;  %v679_v37 = vadd.f32 3.0, %v664_v35  ;;  %v2312_v28 = vld [vmem:[%s3219_s5 + $0x20] sm:$0xff] }
  0xc6   : > { %v754_v61 = vld [vmem:[#allocation2 + $0x20] sm:$0xff]  ;;  %1088 = vmatpush.bf16.msra.mxu2 %v2312_v28 }
  0xc7   : > { %741 = vst [vmem:[#allocation2 + $0x31] sm:$0xff] %v2538_v36  ;;  %v687_v39 = vmax.f32 %v679_v37, 0.0  ;;  %v764_v7 = vmul.f32 %v2543_v38, %v754_v61  ;;  %v833_v9 = vmul.f32 %v2566_v56, %v754_v61  ;;  %v2594_v18 = vld [vmem:[#allocation2 + $0x22] sm:$0xff]  ;;  %v783_v30 = vmul.f32 %v2549_v41, %v2538_v36 }
  0xc8   : > { %v808_v34 = vmul.f32 %v2554_v43, %v2594_v18  ;;  %v866_v37 = vadd.f32 %v858_v25, %v840_v17  ;;  %v860_v14 = vmul.f32 %v2585_v10, %v2538_v36 }
  0xc9   : > { %v695_v42 = vmin.f32 %v687_v39, 6.0  ;;  %v790_v23 = vadd.f32 %v782_v15, %v764_v7  ;;  %v841_v24 = vadd.f32 %v833_v9, %v815_v16  ;;  %v2623_v39 = vld [vmem:[%s3217_s3 + $0x6] ss:$0 sm:$0xff]  ;;  %v936_v15 = vmul.f32 %v2644_v58, %v2534_v29 }
  0xca   : > { %v666_v44 = vpop.f32.mrf.mxu0  ;;  %v910_v63 = vmul.f32 %v2623_v39, %v754_v61  ;;  %1089 = vmatpush.bf16.msra.mxu2 %v2311_v53  ;;  %v2310_v61 = vld [vmem:[%s3219_s5 + $0x10] sm:$0xff] }
  0xcb   : > { %v703_v48 = vmul.f32 0.16666667, %v695_v42  ;;  %v667_v49 = vadd.f32 %v2526_v13, %v666_v44  ;;  %v816_v47 = vadd.f32 %v808_v34, %v790_v23 }
  0xcd   : > { %v2559_v51 = vmul.f32 %v703_v48, %v664_v35  ;;  %v680_v52 = vadd.f32 3.0, %v667_v49  ;;  %v859_v35 = vmul.f32 %v2585_v10, %v2534_v29 }
  0xce   : > { %v755_v8 = vld [vmem:[#allocation2 + $0x30] sm:$0xff]  ;;  %1090 = vmatpush.bf16.msra.mxu2 %v2310_v61 }
  0xcf   : > { %743 = vst [vmem:[#allocation2 + $0x41] sm:$0xff] %v2559_v51  ;;  %v688_v57 = vmax.f32 %v680_v52, 0.0  ;;  %v765_v21 = vmul.f32 %v2543_v38, %v755_v8  ;;  %v2614_v33 = vld [vmem:[#allocation2 + $0x32] sm:$0xff]  ;;  %v834_v45 = vmul.f32 %v2566_v56, %v755_v8  ;;  %v784_v46 = vmul.f32 %v2549_v41, %v2559_v51 }
  0xd0   : > { %v867_v48 = vadd.f32 %v859_v35, %v841_v24  ;;  %v809_v55 = vmul.f32 %v2554_v43, %v2614_v33  ;;  %v861_v28 = vmul.f32 %v2585_v10, %v2559_v51  ;;  %v886_v34 = vmul.f32 %v2605_v26, %v2614_v33 }
  0xd1   : > { %v696_v62 = vmin.f32 %v688_v57, 6.0  ;;  %v791_v44 = vadd.f32 %v783_v30, %v765_v21  ;;  %v842_v3 = vadd.f32 %v834_v45, %v816_v47  ;;  %v937_v35 = vmul.f32 %v2644_v58, %v2538_v36 }
  0xd2   : > { %v668_v0 = vpop.f32.mrf.mxu0 }
  0xd3   : > { %v704_v4 = vmul.f32 0.16666667, %v696_v62  ;;  %v669_v5 = vadd.f32 %v2526_v13, %v668_v0  ;;  %v885_v62 = vmul.f32 %v2605_v26, %v2594_v18  ;;  %v911_v0 = vmul.f32 %v2623_v39, %v755_v8 }
  0xd4   : > { %v817_v2 = vadd.f32 %v809_v55, %v791_v44  ;;  %v868_v30 = vadd.f32 %v860_v14, %v842_v3 }
  0xd5   : > { %v2587_v11 = vmul.f32 %v704_v4, %v667_v49  ;;  %v681_v12 = vadd.f32 3.0, %v669_v5  ;;  %v884_v49 = vmul.f32 %v2605_v26, %v797_v60  ;;  %v893_v9 = vadd.f32 %v885_v62, %v867_v48 }
  0xd6   : > { %v2597_v20 = vld [vmem:[#allocation2 + $0x40] sm:$0xff] }
  0xd7   : > { %745 = vst [vmem:[#allocation2 + $0x51] sm:$0xff] %v2587_v11  ;;  %v689_v19 = vmax.f32 %v681_v12, 0.0  ;;  %v766_v32 = vmul.f32 %v2543_v38, %v2597_v20  ;;  %v2635_v54 = vld [vmem:[#allocation2 + $0x42] sm:$0xff]  ;;  %v835_v57 = vmul.f32 %v2566_v56, %v2597_v20  ;;  %v892_v4 = vadd.f32 %v884_v49, %v866_v37 }
  0xd8   : > { %v810_v6 = vmul.f32 %v2554_v43, %v2635_v54  ;;  %v785_v17 = vmul.f32 %v2549_v41, %v2587_v11  ;;  %v919_v23 = vadd.f32 %v911_v0, %v893_v9  ;;  %v912_v45 = vmul.f32 %v2623_v39, %v2597_v20  ;;  %v2691_v20 = vld [vmem:[%s3217_s3 + $0x8] ss:$0 sm:$0xff] }
  0xd9   : > { %v697_v27 = vmin.f32 %v689_v19, 6.0  ;;  %v792_v60 = vadd.f32 %v784_v46, %v766_v32  ;;  %v843_v8 = vadd.f32 %v835_v57, %v817_v2  ;;  %v918_v21 = vadd.f32 %v910_v63, %v892_v4  ;;  %v2308_v2 = vld [vmem:[%s3219_s5] sm:$0xff] }
  0xda   : > { %v671_v31 = vpop.f32.mrf.mxu0  ;;  %v862_v48 = vmul.f32 %v2585_v10, %v2587_v11  ;;  %v887_v55 = vmul.f32 %v2605_v26, %v2635_v54  ;;  %v894_v57 = vadd.f32 %v886_v34, %v868_v30  ;;  %v962_v14 = vmul.f32 %v2691_v20, %v2594_v18 }
  0xdb   : > { %v705_v40 = vmul.f32 0.16666667, %v697_v27  ;;  %v672_v42 = vadd.f32 %v2526_v13, %v671_v31  ;;  %v818_v19 = vadd.f32 %v810_v6, %v792_v60  ;;  %v869_v44 = vadd.f32 %v861_v28, %v843_v8 }
  0xdc   : > { %v944_v49 = vadd.f32 %v936_v15, %v918_v21  ;;  %v963_v15 = vmul.f32 %v2691_v20, %v2614_v33  ;;  %v938_v21 = vmul.f32 %v2644_v58, %v2559_v51  ;;  %v939_v33 = vmul.f32 %v2644_v58, %v2587_v11 }
  0xdd   : > { %v2630_v50 = vmul.f32 %v705_v40, %v669_v5  ;;  %v682_v52 = vadd.f32 3.0, %v672_v42  ;;  %v895_v4 = vadd.f32 %v887_v55, %v869_v44 }
  0xde   : > { %v757_v59 = vld [vmem:[#allocation2 + $0x50] sm:$0xff]  ;;  %v970_v28 = vadd.f32 %v962_v14, %v944_v49 }
  0xdf   : > { %747 = vst [vmem:[#allocation2 + $0x61] sm:$0xff] %v2630_v50  ;;  %v690_v1 = vmax.f32 %v682_v52, 0.0  ;;  %v767_v5 = vmul.f32 %v2543_v38, %v757_v59  ;;  %v836_v7 = vmul.f32 %v2566_v56, %v757_v59  ;;  %v2665_v27 = vld [vmem:[#allocation2 + $0x52] sm:$0xff]  ;;  %v913_v0 = vmul.f32 %v2623_v39, %v757_v59 }
  0xe0   : > { %v811_v47 = vmul.f32 %v2554_v43, %v2665_v27  ;;  %v786_v3 = vmul.f32 %v2549_v41, %v2630_v50  ;;  %v863_v9 = vmul.f32 %v2585_v10, %v2630_v50  ;;  %v965_v55 = vmul.f32 %v2691_v20, %v2665_v27 }
  0xe1   : > { %v698_v12 = vmin.f32 %v690_v1, 6.0  ;;  %v793_v31 = vadd.f32 %v785_v17, %v767_v5  ;;  %v844_v32 = vadd.f32 %v836_v7, %v818_v19  ;;  %v920_v5 = vadd.f32 %v912_v45, %v894_v57 }
  0xe2   : > { %v673_v16 = vpop.f32.mrf.mxu0  ;;  %v921_v19 = vadd.f32 %v913_v0, %v895_v4 }
  0xe3   : > { %v706_v24 = vmul.f32 0.16666667, %v698_v12  ;;  %v674_v25 = vadd.f32 %v2526_v13, %v673_v16  ;;  %v2309_v13 = vld [vmem:[%s3219_s5 + $0x8] sm:$0xff]  ;;  %v819_v60 = vadd.f32 %v811_v47, %v793_v31  ;;  %v870_v63 = vadd.f32 %v862_v48, %v844_v32  ;;  %v2728_v48 = vld [vmem:[%s3218_s4] ss:$0 sm:$0xff] }
  0xe4   : > { %1091 = vmatpush.bf16.msra.mxu2 %v2309_v13  ;;  %v888_v12 = vmul.f32 %v2605_v26, %v2665_v27  ;;  %v946_v34 = vadd.f32 %v938_v21, %v920_v5  ;;  %v964_v13 = vmul.f32 %v2691_v20, %v2635_v54  ;;  %v947_v47 = vadd.f32 %v939_v33, %v921_v19 }
  0xe5   : > { %v2673_v37 = vmul.f32 %v706_v24, %v672_v42  ;;  %v683_v40 = vadd.f32 3.0, %v674_v25  ;;  %v945_v42 = vadd.f32 %v937_v35, %v919_v23 }
  0xe6   : > { %v758_v46 = vld [vmem:[#allocation2 + $0x60] sm:$0xff]  ;;  %v896_v17 = vadd.f32 %v888_v12, %v870_v63  ;;  %v972_v57 = vadd.f32 %v964_v13, %v946_v34 }
  0xe7   : > { %749 = vst [vmem:[#allocation2 + $0x71] sm:$0xff] %v2673_v37  ;;  %v691_v52 = vmax.f32 %v683_v40, 0.0  ;;  %v768_v53 = vmul.f32 %v2543_v38, %v758_v46  ;;  %v837_v62 = vmul.f32 %v2566_v56, %v758_v46  ;;  %v802_v6 = vld [vmem:[#allocation2 + $0x62] sm:$0xff]  ;;  %v914_v59 = vmul.f32 %v2623_v39, %v758_v46 }
  0xe8   : > { %1092 = vmatpush.bf16.msra.mxu2 %v2308_v2  ;;  %v812_v24 = vmul.f32 %v2554_v43, %v802_v6  ;;  %v971_v30 = vadd.f32 %v963_v15, %v945_v42  ;;  %v889_v32 = vmul.f32 %v2605_v26, %v802_v6  ;;  %v940_v46 = vmul.f32 %v2644_v58, %v2630_v50 }
  0xe9   : > { %v699_v1 = vmin.f32 %v691_v52, 6.0  ;;  %v845_v7 = vadd.f32 %v837_v62, %v819_v60  ;;  %v794_v8 = vadd.f32 %v786_v3, %v768_v53  ;;  %v922_v18 = vadd.f32 %v914_v59, %v896_v17 }
  0xea   : > { %v864_v42 = vmul.f32 %v2585_v10, %v2673_v37  ;;  %v941_v63 = vmul.f32 %v2644_v58, %v2673_v37  ;;  %v966_v0 = vmul.f32 %v2691_v20, %v802_v6  ;;  %v2743_v2 = vadd.f32 %v2728_v48, %v971_v30 }
  0xeb   : > { %v707_v61 = vmul.f32 0.16666667, %v699_v1  ;;  %v871_v16 = vadd.f32 %v863_v9, %v845_v7  ;;  %v820_v40 = vadd.f32 %v812_v24, %v794_v8  ;;  %v948_v53 = vadd.f32 %v940_v46, %v922_v18  ;;  %v933_v24 = vld [vmem:[#allocation2 + $0x91] sm:$0xff] }
  0xec   : > { %v973_v1 = vadd.f32 %v965_v55, %v947_v47  ;;  %v2749_v12 = vadd.f32 %v2728_v48, %v972_v57  ;;  %v991_v17 = vmax.f32 %v2743_v2, 0.0  ;;  %v917_v30 = vmul.f32 0.0, %v2623_v39  ;;  %v2322_v47 = vld [vmem:[%s3221_s7 + $0x30] sm:$0xff]  ;;  %v2337_v2 = vld [vmem:[%s3225_s11 + $0x28] sm:$0xff] }
  0xed   : > { %v2711_v23 = vmul.f32 %v707_v61, %v674_v25  ;;  %v897_v44 = vadd.f32 %v889_v32, %v871_v16  ;;  %v974_v9 = vadd.f32 %v966_v0, %v948_v53  ;;  %v2393_v32 = vmov 64.0  }
  0xee   : > { %v759_v31 = vld [vmem:[#allocation2 + $0x70] sm:$0xff]  ;;  %v2756_v15 = vadd.f32 %v2728_v48, %v973_v1  ;;  %2380 = vrcp.f32 %v2393_v32  ;;  %v2317_v32 = vld [vmem:[%s3221_s7 + $0x8] sm:$0xff] }
  0xef   : > { %751 = vst [vmem:[#allocation2 + $0x81] sm:$0xff] %v2711_v23  ;;  %v769_v35 = vmul.f32 %v2543_v38, %v759_v31  ;;  %v838_v25 = vmul.f32 %v2566_v56, %v759_v31  ;;  %v915_v45 = vmul.f32 %v2623_v39, %v759_v31  ;;  %v787_v38 = vmul.f32 %v2549_v41, %v2673_v37  ;;  %v803_v54 = vld [vmem:[#allocation2 + $0x72] sm:$0xff] }
  0xf0   : > { %v2740_v41 = vadd.f32 %v2728_v48, %v970_v28  ;;  %v813_v3 = vmul.f32 %v2554_v43, %v803_v54  ;;  %v890_v4 = vmul.f32 %v2605_v26, %v803_v54  ;;  %v967_v7 = vmul.f32 %v2691_v20, %v803_v54 }
  0xf1   : > { %v846_v49 = vadd.f32 %v838_v25, %v820_v40  ;;  %v923_v52 = vadd.f32 %v915_v45, %v897_v44  ;;  %v795_v60 = vadd.f32 %v787_v38, %v769_v35  ;;  %v865_v14 = vmul.f32 %v2585_v10, %v2711_v23  ;;  %v959_v35 = vld [vmem:[#allocation2 + $0x92] sm:$0xff] }
  0xf2   : > { %v990_v16 = vmax.f32 %v2740_v41, 0.0  ;;  %v2764_v31 = vadd.f32 %v2728_v48, %v974_v9  ;;  %v992_v10 = vmax.f32 %v2749_v12, 0.0  ;;  %v2323_v25 = vld [vmem:[%s3221_s7 + $0x38] sm:$0xff]  ;;  %v969_v38 = vmul.f32 %v2691_v20, %v959_v35  ;;  %v2329_v35 = vld [vmem:[%s3223_s9 + $0x28] sm:$0xff]  ;;  %v2338_v41 = vld [vmem:[%s3225_s11 + $0x30] sm:$0xff] }
  0xf3   : > { %v872_v62 = vadd.f32 %v864_v42, %v846_v49  ;;  %v949_v27 = vadd.f32 %v941_v63, %v923_v52  ;;  %v821_v6 = vadd.f32 %v813_v3, %v795_v60  ;;  %1165 = vmatpush.bf16.msrb.mxu2 %v2323_v25  ;;  %v1036_v25 = vld [vmem:[%s3220_s6] sm:$0x1] }
  0xf4   : > { %v998_v13 = vadd.f32 %v991_v17, %v990_v16  ;;  %v994_v42 = vmax.f32 %v2764_v31, 0.0  ;;  %v2381_v52 = vpop.eup %2380  ;;  %v2335_v31 = vld [vmem:[%s3225_s11 + $0x18] sm:$0xff] }
  0xf5   : > { %v898_v61 = vadd.f32 %v890_v4, %v872_v62  ;;  %v975_v28 = vadd.f32 %v967_v7, %v949_v27  ;;  %v1012_v0 = vmul.f32 64.0, %v2381_v52  ;;  %v2320_v4 = vld [vmem:[%s3221_s7 + $0x20] sm:$0xff]  ;;  %vm1016_vm0 = vweird.f32 %v2381_v52 }
  0xf6   : > { %v829_v5 = vld [vmem:[#allocation2 + $0x80] sm:$0xff]  ;;  %v999_v54 = vadd.f32 %v998_v13, %v992_v10 }
  0xf7   : > { %v839_v59 = vmul.f32 %v2566_v56, %v829_v5  ;;  %v916_v8 = vmul.f32 %v2623_v39, %v829_v5  ;;  %v881_v43 = vld [vmem:[#allocation2 + $0x82] sm:$0xff]  ;;  %v942_v56 = vmul.f32 %v2644_v58, %v2711_v23  ;;  %v943_v39 = vmul.f32 %v2644_v58, %v933_v24  ;;  %1166 = vmatpush.bf16.msrb.mxu2 %v2322_v47 }
  0xf8   : > { %v891_v33 = vmul.f32 %v2605_v26, %v881_v43  ;;  %v968_v40 = vmul.f32 %v2691_v20, %v881_v43  ;;  %v2778_v46 = vadd.f32 %v2728_v48, %v975_v28  ;;  %v993_v26 = vmax.f32 %v2756_v15, 0.0  ;;  %v2321_v20 = vld [vmem:[%s3221_s7 + $0x28] sm:$0xff] }
  0xf9   : > { %v847_v19 = vadd.f32 %v839_v59, %v821_v6  ;;  %v924_v21 = vadd.f32 %v916_v8, %v898_v61  ;;  %v1013_v7 = vsub.f32 1.0, %v1012_v0  ;;  %v2318_v8 = vld [vmem:[%s3221_s7 + $0x10] sm:$0xff] }
  0xfa   : > { %v995_v55 = vmax.f32 %v2778_v46, 0.0  ;;  %v1000_v57 = vadd.f32 %v999_v54, %v993_v26  ;;  %v2325_v54 = vld [vmem:[%s3223_s9 + $0x8] sm:$0xff]  ;;  %v2334_v46 = vld [vmem:[%s3225_s11 + $0x10] sm:$0xff] }
  0xfb   : > { %v873_v18 = vadd.f32 %v865_v14, %v847_v19  ;;  %v950_v34 = vadd.f32 %v942_v56, %v924_v21  ;;  %1167 = vmatpush.bf16.msrb.mxu2 %v2321_v20  ;;  %v1014_v59 = vmul.f32 %v2381_v52, %v1013_v7 }
  0xfc   : > { %v1001_v63 = vadd.f32 %v1000_v57, %v994_v42 }
  0xfd   : > { %v899_v44 = vadd.f32 %v891_v33, %v873_v18  ;;  %v976_v45 = vadd.f32 %v968_v40, %v950_v34  ;;  %v1015_v43 = vadd.f32 %v2381_v52, %v1014_v59  ;;  %v2316_v18 = vld [vmem:[%s3221_s7] sm:$0xff]  ;;  %v2331_v33 = vld [vmem:[%s3223_s9 + $0x38] sm:$0xff]  ;;  %v2330_v34 = vld [vmem:[%s3223_s9 + $0x30] sm:$0xff] }
  0xfe   : > { %v1002_v3 = vadd.f32 %v1001_v63, %v995_v55  ;;  %1263 = vmatpush.bf16.msra.mxu3 %v2331_v33  ;;  %v2328_v40 = vld [vmem:[%s3223_s9 + $0x20] sm:$0xff] }
  0xff   : > { %v925_v58 = vadd.f32 %v917_v30, %v899_v44  ;;  %v2786_v49 = vadd.f32 %v2728_v48, %v976_v45  ;;  %1168 = vmatpush.bf16.msrb.mxu2 %v2320_v4  ;;  %v1017_v24 = vsel %vm1016_vm0, %v2381_v52, %v1015_v43  ;;  %v2324_v52 = vld [vmem:[%s3223_s9] sm:$0xff] }
 0x101   : > { %v951_v53 = vadd.f32 %v943_v39, %v925_v58  ;;  %v996_v62 = vmax.f32 %v2786_v49, 0.0  ;;  %v2326_v58 = vld [vmem:[%s3223_s9 + $0x10] sm:$0xff]  ;;  %v2333_v49 = vld [vmem:[%s3225_s11 + $0x8] sm:$0xff] }
 0x102   : > { %1264 = vmatpush.bf16.msra.mxu3 %v2330_v34 }
 0x103   : > { %v977_v60 = vadd.f32 %v969_v38, %v951_v53  ;;  %v1003_v5 = vadd.f32 %v1002_v3, %v996_v62  ;;  %v2327_v38 = vld [vmem:[%s3223_s9 + $0x18] sm:$0xff]  ;;  %v1116_v53 = vld [vmem:[%s3222_s8] sm:$0x1] }
 0x105   : > { %v2801_v1 = vadd.f32 %v2728_v48, %v977_v60  ;;  %v2319_v48 = vld [vmem:[%s3221_s7 + $0x18] sm:$0xff] }
 0x106   : > { %1169 = vmatpush.bf16.msrb.mxu2 %v2319_v48  ;;  %1265 = vmatpush.bf16.msra.mxu3 %v2329_v35 }
 0x107   : > { %v997_v27 = vmax.f32 %v2801_v1, 0.0 }
 0x109   : > { %v1004_v9 = vadd.f32 %v1003_v5, %v997_v27 }
 0x10a   : > { %1170 = vmatpush.bf16.msrb.mxu2 %v2318_v8  ;;  %1266 = vmatpush.bf16.msra.mxu3 %v2328_v40  ;;  %v2339_v8 = vld [vmem:[%s3225_s11 + $0x38] sm:$0xff] }
 0x10b   : > { %v1005_v6 = vrot.slane %v1004_v9, 4  ;;  %1372 = vmatpush.bf16.msra.mxu1 %v2339_v8 }
 0x10d   : > { %v1006_v61 = vadd.f32 %v1005_v6, %v1004_v9 }
 0x10e   : > { %1171 = vmatpush.bf16.msrb.mxu2 %v2317_v32  ;;  %1267 = vmatpush.bf16.msra.mxu3 %v2327_v38 }
 0x10f   : > { %v1007_v14 = vrot.slane %v1006_v61, 2  ;;  %1373 = vmatpush.bf16.msra.mxu1 %v2338_v41  ;;  %v1475_v41 = vld [vmem:[#allocation2 + $0x2] sm:$0x7] }
 0x111   : > { %v1008_v19 = vadd.f32 %v1007_v14, %v1006_v61 }
 0x112   : > { %1172 = vmatpush.bf16.msrb.mxu2 %v2316_v18  ;;  %1268 = vmatpush.bf16.msra.mxu3 %v2326_v58 }
 0x113   : > { %v1009_v21 = vrot.slane %v1008_v19, 1  ;;  %1374 = vmatpush.bf16.msra.mxu1 %v2337_v2  ;;  %v1497_v2 = vld [vmem:[#allocation2 + $0x4] sm:$0x7] }
 0x115   : > { %v1010_v56 = vadd.f32 %v1009_v21, %v1008_v19 }
 0x116   : > { %1269 = vmatpush.bf16.msra.mxu3 %v2325_v54  ;;  %v2909_v54 = vld [vmem:[%s3226_s12] ss:$0 sm:$0xff] }
 0x117   : > { %v1018_v28 = vmul.f32 %v1017_v24, %v1010_v56 }
 0x119   : > { %v1019_v30 = vpack.c.bf16 %v1018_v28, %v1018_v28 }
 0x11a   : > { %1270 = vmatpush.bf16.msra.mxu3 %v2324_v52 }
 0x11b   : > { %1093 = vmatmul.bf16.vlgmr.msra.gmra.mxu2 %v1019_v30 }
 0x19e   : > { %v1094_v39 = vpop.f32.mrf.mxu2 }
 0x19f   : > { %v1095_v13 = vadd.f32 %v1094_v39, %v1036_v25 }
 0x1a1   : > { %v1098_v44 = vmax.f32 %v1095_v13, 0.0 }
 0x1a3   : > { %v1099_v45 = vpack.c.bf16 %v1098_v44, %v1098_v44 }
 0x1a5   : > { %1173 = vmatmul.bf16.vlgmr.msrb.gmra.mxu2 %v1099_v45 }
 0x1a6   : > { %v1096_v47 = vpop.f32.mrf.mxu2 }
 0x228   : > { %v1174_v57 = vpop.f32.mrf.mxu2 }
 0x229   : > { %v1175_v20 = vadd.f32 %v1174_v57, %v1116_v53 }
 0x22b   : > { %v1178_v60 = vadd.f32 3.0, %v1175_v20 }
 0x22d   : > { %v1179_v63 = vmax.f32 %v1178_v60, 0.0 }
 0x22f   : > { %v1180_v0 = vmin.f32 %v1179_v63, 6.0 }
 0x230   : > { %v1176_v3 = vpop.f32.mrf.mxu2 }
 0x231   : > { %v1181_v4 = vmul.f32 0.16666667, %v1180_v0 }
 0x233   : > { %v1182_v5 = vperm.slane %v1181_v4, 0 }
 0x235   : > { %v1183_v7 = vmul.f32 %v1182_v5, %v990_v16  ;;  %v1184_v9 = vmul.f32 %v1182_v5, %v991_v17  ;;  %v1185_v6 = vmul.f32 %v1182_v5, %v992_v10  ;;  %v1186_v59 = vmul.f32 %v1182_v5, %v993_v26  ;;  %v2336_v16 = vld [vmem:[%s3225_s11 + $0x20] sm:$0xff] }
 0x236   : > { %v1187_v12 = vmul.f32 %v1182_v5, %v994_v42  ;;  %v1188_v15 = vmul.f32 %v1182_v5, %v995_v55  ;;  %1375 = vmatpush.bf16.msra.mxu1 %v2336_v16  ;;  %v1189_v10 = vmul.f32 %v1182_v5, %v996_v62  ;;  %v1190_v26 = vmul.f32 %v1182_v5, %v997_v27  ;;  %v2332_v42 = vld [vmem:[%s3225_s11] sm:$0xff] }
 0x237   : > { %v1191_v48 = vpack.c.bf16 %v1184_v9, %v1183_v7  ;;  %v1192_v61 = vpack.c.bf16 %v1186_v59, %v1185_v6  ;;  %v2378_v62 = vld [vmem:[%s3224_s10] ss:$0 sm:$0xff]  ;;  %v2922_v59 = vld [vmem:[%s3227_s13 + $0x4] sm:$0x7] }
 0x238   : > { %v1193_v17 = vpack.c.bf16 %v1188_v15, %v1187_v12  ;;  %v1194_v14 = vpack.c.bf16 %v1190_v26, %v1189_v10  ;;  %v2917_v9 = vld [vmem:[%s3227_s13] sm:$0x7] }
 0x239   : > { %1271 = vmatmul.bf16.vlgmr.msra.gmra.mxu3 %v1191_v48  ;;  %v1478_v26 = vmul.f32 %v1475_v41, %v2917_v9 }
 0x23a   : > { %1376 = vmatpush.bf16.msra.mxu1 %v2335_v31 }
 0x23e   : > { %1377 = vmatpush.bf16.msra.mxu1 %v2334_v46 }
 0x242   : > { %1378 = vmatpush.bf16.msra.mxu1 %v2333_v49  ;;  %v1500_v49 = vmul.f32 %v1497_v2, %v2917_v9 }
 0x246   : > { %1379 = vmatpush.bf16.msra.mxu1 %v2332_v42 }
 0x249   : > { %1276 = vmatmul.bf16.gmra.mxu3 %v1192_v61  ;;  %v1453_v61 = vld [vmem:[#allocation2] sm:$0x7] }
 0x24a   : > { %v1456_v10 = vmul.f32 %v1453_v61, %v2917_v9  ;;  %v2352_v61 = vld [vmem:[%s3229_s15 + $0x64] sm:$0xf] }
 0x259   : > { %1281 = vmatmul.bf16.gmra.mxu3 %v1193_v17 }
 0x269   : > { %1286 = vmatmul.bf16.gmra.mxu3 %v1194_v14 }
 0x2bc   : > { %v1272_v55 = vpop.f32.mrf.mxu3 }
 0x2bd   : > { %v1273_v1 = vadd.f32 %v2378_v62, %v1272_v55  ;;  %v1519_v55 = vld [vmem:[#allocation2 + $0x6] sm:$0x7] }
 0x2bf   : > { %v1292_v19 = vadd.f32 %v1273_v1, %v2530_v22 }
 0x2c4   : > { %v1274_v27 = vpop.f32.mrf.mxu3 }
 0x2c5   : > { %v1275_v43 = vadd.f32 %v2378_v62, %v1274_v27 }
 0x2c7   : > { %v1293_v21 = vadd.f32 %v1275_v43, %v2534_v29  ;;  %v2934_v43 = vld [vmem:[%s3227_s13 + $0x8] sm:$0x7] }
 0x2c9   : > { %v1300_v24 = vpack.c.bf16 %v1293_v21, %v1292_v19 }
 0x2cb   : > { %1380 = vmatmul.bf16.vlgmr.msra.gmra.mxu1 %v1300_v24  ;;  %v1522_v24 = vmul.f32 %v1519_v55, %v2917_v9 }
 0x2cc   : > { %v1277_v56 = vpop.f32.mrf.mxu3 }
 0x2cd   : > { %v1278_v28 = vadd.f32 %v2378_v62, %v1277_v56 }
 0x2cf   : > { %v1294_v18 = vadd.f32 %v1278_v28, %v2538_v36 }
 0x2d4   : > { %v1279_v30 = vpop.f32.mrf.mxu3 }
 0x2d5   : > { %v1280_v32 = vadd.f32 %v2378_v62, %v1279_v30 }
 0x2d7   : > { %v1295_v33 = vadd.f32 %v1280_v32, %v2559_v51 }
 0x2d9   : > { %v1301_v34 = vpack.c.bf16 %v1295_v33, %v1294_v18 }
 0x2db   : > { %1385 = vmatmul.bf16.gmra.mxu1 %v1301_v34 }
 0x2dc   : > { %v1282_v35 = vpop.f32.mrf.mxu3 }
 0x2dd   : > { %v1283_v40 = vadd.f32 %v2378_v62, %v1282_v35 }
 0x2df   : > { %v1296_v22 = vadd.f32 %v1283_v40, %v2587_v11  ;;  %v2354_v40 = vld [vmem:[%s3229_s15 + $0x74] sm:$0xf] }
 0x2e4   : > { %v1284_v25 = vpop.f32.mrf.mxu3 }
 0x2e5   : > { %v1285_v39 = vadd.f32 %v2378_v62, %v1284_v25  ;;  %v2289_v25 = vld [vmem:[%s3229_s15 + $0x78] sm:$0xf0] }
 0x2e7   : > { %v1297_v29 = vadd.f32 %v1285_v39, %v2630_v50 }
 0x2e9   : > { %v1302_v13 = vpack.c.bf16 %v1297_v29, %v1296_v22 }
 0x2eb   : > { %1390 = vmatmul.bf16.gmra.mxu1 %v1302_v13  ;;  %v2292_v13 = vor.u32 %v2354_v40, %v2289_v25  ;;  %v2353_v40 = vld [vmem:[%s3229_s15 + $0x64] sm:$0xf0] }
 0x2ec   : > { %v1287_v44 = vpop.f32.mrf.mxu3 }
 0x2ed   : > { %v1288_v45 = vadd.f32 %v2378_v62, %v1287_v44  ;;  %1924 = vmatpush.bf16.msrb.mxu0 %v2292_v13 }
 0x2ef   : > { %v1298_v36 = vadd.f32 %v1288_v45, %v2673_v37 }
 0x2f4   : > { %v1289_v47 = vpop.f32.mrf.mxu3 }
 0x2f5   : > { %v1290_v38 = vadd.f32 %v2378_v62, %v1289_v47 }
 0x2f7   : > { %v1299_v51 = vadd.f32 %v1290_v38, %v2711_v23 }
 0x2f9   : > { %v1303_v58 = vpack.c.bf16 %v1299_v51, %v1298_v36 }
 0x2fb   : > { %1395 = vmatmul.bf16.gmra.mxu1 %v1303_v58 }
 0x348   : > { %v1381_v11 = vpop.f32.mrf.mxu1 }
 0x349   : > { %v1382_v50 = vadd.f32 %v2909_v54, %v1381_v11 }
 0x34b   : > { %v1401_v52 = vadd.f32 3.0, %v1382_v50 }
 0x34d   : > { %v1409_v53 = vmax.f32 %v1401_v52, 0.0 }
 0x34f   : > { %v1417_v57 = vmin.f32 %v1409_v53, 6.0 }
 0x350   : > { %v1383_v20 = vpop.f32.mrf.mxu1 }
 0x351   : > { %v1425_v60 = vmul.f32 0.16666667, %v1417_v57  ;;  %v1384_v63 = vadd.f32 %v2909_v54, %v1383_v20 }
 0x353   : > { %v1433_v37 = vmul.f32 %v1425_v60, %v1382_v50  ;;  %v1402_v0 = vadd.f32 3.0, %v1384_v63 }
 0x355   : > { %1441 = vst [vmem:[#allocation2 + $0x11] sm:$0xff] %v1433_v37  ;;  %v1410_v23 = vmax.f32 %v1402_v0, 0.0 }
 0x357   : > { %v1418_v3 = vmin.f32 %v1410_v23, 6.0 }
 0x358   : > { %v1386_v4 = vpop.f32.mrf.mxu1 }
 0x359   : > { %v1426_v5 = vmul.f32 0.16666667, %v1418_v3  ;;  %v1387_v7 = vadd.f32 %v2909_v54, %v1386_v4  ;;  %v2954_v3 = vld [vmem:[%s3228_s14] sm:$0x1] }
 0x35b   : > { %v1434_v48 = vmul.f32 %v1426_v5, %v1384_v63  ;;  %v1403_v6 = vadd.f32 3.0, %v1387_v7 }
 0x35c   : > { %v1454_v8 = vld [vmem:[#allocation2 + $0x10] sm:$0x7]  ;;  %v1498_v16 = vld [vmem:[#allocation2 + $0x14] sm:$0x7] }
 0x35d   : > { %1442 = vst [vmem:[#allocation2 + $0x21] sm:$0xff] %v1434_v48  ;;  %v1411_v12 = vmax.f32 %v1403_v6, 0.0  ;;  %v1476_v15 = vld [vmem:[#allocation2 + $0x12] sm:$0x7]  ;;  %v1457_v31 = vmul.f32 %v1454_v8, %v2922_v59  ;;  %v1501_v42 = vmul.f32 %v1498_v16, %v2922_v59  ;;  %v1520_v27 = vld [vmem:[#allocation2 + $0x16] sm:$0x7] }
 0x35e   : > { %v1479_v46 = vmul.f32 %v1476_v15, %v2922_v59  ;;  %v1523_v34 = vmul.f32 %v1520_v27, %v2922_v59  ;;  %v2281_v8 = vld [vmem:[%s3229_s15 + $0x68] sm:$0xf0] }
 0x35f   : > { %v1419_v17 = vmin.f32 %v1411_v12, 6.0  ;;  %v1459_v28 = vadd.f32 %v1457_v31, %v1456_v10  ;;  %v1503_v33 = vadd.f32 %v1501_v42, %v1500_v49  ;;  %v2350_v10 = vld [vmem:[%s3229_s15 + $0x54] sm:$0xf]  ;;  %v2976_v49 = vld [vmem:[%s3229_s15 + $0x48] sm:$0xf0] }
 0x360   : > { %v1388_v14 = vpop.f32.mrf.mxu1  ;;  %v1481_v32 = vadd.f32 %v1479_v46, %v1478_v26  ;;  %v1525_v53 = vadd.f32 %v1523_v34, %v1522_v24  ;;  %v2273_v26 = vld [vmem:[%s3229_s15 + $0x58] sm:$0xf0]  ;;  %v2971_v46 = vld [vmem:[%s3229_s15 + $0x44] sm:$0xf]  ;;  %v2287_v42 = vld [vmem:[%s3229_s15 + $0x70] sm:$0xf] }
 0x361   : > { %v1427_v62 = vmul.f32 0.16666667, %v1419_v17  ;;  %v1389_v1 = vadd.f32 %v2909_v54, %v1388_v14  ;;  %v2284_v17 = vor.u32 %v2352_v61, %v2281_v8  ;;  %v2355_v24 = vld [vmem:[%s3229_s15 + $0x74] sm:$0xf0]  ;;  %v3083_v8 = vld [vmem:[%s3229_s15 + $0x20] sm:$0xf] }
 0x362   : > { %v2288_v34 = vor.u32 %v2355_v24, %v2287_v42  ;;  %v3131_v24 = vld [vmem:[%s3229_s15 + $0x4] sm:$0xf0] }
 0x363   : > { %v1435_v19 = vmul.f32 %v1427_v62, %v1387_v7  ;;  %v1404_v21 = vadd.f32 3.0, %v1389_v1  ;;  %1925 = vmatpush.bf16.msrb.mxu0 %v2284_v17 }
 0x364   : > { %v1455_v56 = vld [vmem:[#allocation2 + $0x20] sm:$0x7]  ;;  %v1499_v18 = vld [vmem:[#allocation2 + $0x24] sm:$0x7]  ;;  %1910 = vmatpush.bf16.msra.mxu2 %v2288_v34 }
 0x365   : > { %v1477_v30 = vld [vmem:[#allocation2 + $0x22] sm:$0x7]  ;;  %1443 = vst [vmem:[#allocation2 + $0x31] sm:$0xff] %v1435_v19  ;;  %v1412_v35 = vmax.f32 %v1404_v21, 0.0  ;;  %v1458_v39 = vmul.f32 %v1455_v56, %v2934_v43  ;;  %v1502_v29 = vmul.f32 %v1499_v18, %v2934_v43  ;;  %v1521_v44 = vld [vmem:[#allocation2 + $0x26] sm:$0x7]  ;;  %v2276_v21 = vor.u32 %v2350_v10, %v2273_v26 }
 0x366   : > { %v1480_v22 = vmul.f32 %v1477_v30, %v2934_v43  ;;  %v1524_v58 = vmul.f32 %v1521_v44, %v2934_v43  ;;  %v1541_v12 = vld [vmem:[#allocation2 + $0x20] sm:$0x7]  ;;  %v1607_v27 = vld [vmem:[#allocation2 + $0x26] sm:$0x7]  ;;  %v2991_v56 = vld [vmem:[%s3229_s15 + $0x34] sm:$0xf] }
 0x367   : > { %v1420_v45 = vmin.f32 %v1412_v35, 6.0  ;;  %v1460_v47 = vadd.f32 %v1459_v28, %v1458_v39  ;;  %v1504_v36 = vadd.f32 %v1503_v33, %v1502_v29  ;;  %v1563_v15 = vld [vmem:[#allocation2 + $0x22] sm:$0x7]  ;;  %v2996_v28 = vld [vmem:[%s3229_s15 + $0x38] sm:$0xf0]  ;;  %v1544_v13 = vmul.f32 %v1541_v12, %v2917_v9  ;;  %1926 = vmatpush.bf16.msrb.mxu0 %v2276_v21 }
 0x368   : > { %v1482_v38 = vadd.f32 %v1481_v32, %v1480_v22  ;;  %v1391_v51 = vpop.f32.mrf.mxu1  ;;  %v2949_v23 = vadd.f32 %v1525_v53, %v1524_v58  ;;  %v2279_v35 = vld [vmem:[%s3229_s15 + $0x60] sm:$0xf]  ;;  %v3011_v39 = vld [vmem:[%s3229_s15 + $0x50] sm:$0xf]  ;;  %v3016_v22 = vld [vmem:[%s3229_s15 + $0x54] sm:$0xf0]  ;;  %v1566_v44 = vmul.f32 %v1563_v15, %v2917_v9 }
 0x369   : > { %v1428_v11 = vmul.f32 0.16666667, %v1420_v45  ;;  %v1392_v50 = vadd.f32 %v2909_v54, %v1391_v51  ;;  %v1462_v52 = vrot.slane %v1460_v47, 1  ;;  %v1465_v57 = vrot.slane %v1460_v47, 2  ;;  %v3021_v29 = vld [vmem:[%s3229_s15 + $0x24] sm:$0xf] }
 0x36a   : > { %v1484_v20 = vrot.slane %v1482_v38, 1  ;;  %v1506_v60 = vrot.slane %v1504_v36, 1  ;;  %v1487_v5 = vrot.slane %v1482_v38, 2  ;;  %v1509_v7 = vrot.slane %v1504_v36, 2  ;;  %v3031_v58 = vld [vmem:[%s3229_s15 + $0x28] sm:$0xf0] }
 0x36b   : > { %v1436_v63 = vmul.f32 %v1428_v11, %v1389_v1  ;;  %v1405_v37 = vadd.f32 3.0, %v1392_v50  ;;  %v1464_v0 = vadd.f32 %v1462_v52, %v1460_v47  ;;  %v1528_v62 = vrot.slane %v2949_v23, 1  ;;  %v1585_v1 = vld [vmem:[#allocation2 + $0x24] sm:$0x7]  ;;  %v3036_v11 = vld [vmem:[%s3229_s15 + $0x40] sm:$0xf] }
 0x36c   : > { %v1486_v4 = vadd.f32 %v1484_v20, %v1482_v38  ;;  %v1542_v48 = vld [vmem:[#allocation2 + $0x30] sm:$0x7]  ;;  %v1508_v2 = vadd.f32 %v1506_v60, %v1504_v36  ;;  %v1586_v14 = vld [vmem:[#allocation2 + $0x34] sm:$0x7]  ;;  %v2280_v51 = vor.u32 %v2353_v40, %v2279_v35  ;;  %v3044_v53 = vld [vmem:[%s3229_s15 + $0x44] sm:$0xf0]  ;;  %v2272_v61 = vor.u32 %v3016_v22, %v3011_v39 }
 0x36d   : > { %1444 = vst [vmem:[#allocation2 + $0x41] sm:$0xff] %v1436_v63  ;;  %v1413_v6 = vmax.f32 %v1405_v37, 0.0  ;;  %v1467_v41 = vadd.f32 %v1465_v57, %v1464_v0  ;;  %v1564_v16 = vld [vmem:[#allocation2 + $0x32] sm:$0x7]  ;;  %v1545_v32 = vmul.f32 %v1542_v48, %v2922_v59  ;;  %v1589_v47 = vmul.f32 %v1586_v14, %v2922_v59  ;;  %v3054_v20 = vld [vmem:[%s3229_s15 + $0x34] sm:$0xf0] }
 0x36e   : > { %v1489_v30 = vadd.f32 %v1487_v5, %v1486_v4  ;;  %v1511_v25 = vadd.f32 %v1509_v7, %v1508_v2  ;;  %v1567_v45 = vmul.f32 %v1564_v16, %v2922_v59  ;;  %v3049_v57 = vld [vmem:[%s3229_s15 + $0x30] sm:$0xf]  ;;  %v1588_v63 = vmul.f32 %v1585_v1, %v2917_v9  ;;  %v3068_v5 = vld [vmem:[%s3229_s15 + $0x14] sm:$0xf]  ;;  %v3073_v7 = vld [vmem:[%s3229_s15 + $0x18] sm:$0xf0]  ;;  %1911 = vmatpush.bf16.msra.mxu2 %v2280_v51 }
 0x36f   : > { %v1421_v31 = vmin.f32 %v1413_v6, 6.0  ;;  %v2982_v55 = vadd.f32 %v1467_v41, %v2954_v3  ;;  %v3061_v37 = vmul.f32 %v1607_v27, %v2917_v9  ;;  %v2260_v4 = vor.u32 %v2991_v56, %v2996_v28  ;;  %v3088_v41 = vld [vmem:[%s3229_s15 + $0x24] sm:$0xf0]  ;;  %v3093_v2 = vld [vmem:[%s3229_s15 + $0x10] sm:$0xf] }
 0x370   : > { %v1393_v19 = vpop.f32.mrf.mxu1  ;;  %v3057_v60 = vadd.f32 %v1489_v30, %v2954_v3  ;;  %v3076_v48 = vadd.f32 %v1511_v25, %v2954_v3  ;;  %v1547_v6 = vadd.f32 %v1545_v32, %v1544_v13  ;;  %v1530_v12 = vadd.f32 %v1528_v62, %v2949_v23  ;;  %v3103_v14 = vld [vmem:[%s3229_s15 + $0x14] sm:$0xf0]  ;;  %v3126_v21 = vld [vmem:[%s3229_s15] sm:$0xf] }
 0x371   : > { %v1429_v18 = vmul.f32 0.16666667, %v1421_v31  ;;  %v3000_v33 = vadd.f32 %v2909_v54, %v1393_v19  ;;  %v1469_v52 = vadd.f32 3.0, %v2982_v55  ;;  %v1569_v15 = vadd.f32 %v1567_v45, %v1566_v44  ;;  %v3108_v31 = vld [vmem:[%s3229_s15 + $0x4] sm:$0xf] }
 0x372   : > { %v1591_v16 = vadd.f32 %v1589_v47, %v1588_v63  ;;  %v2252_v10 = vor.u32 %v3021_v29, %v3031_v58  ;;  %v2264_v26 = vor.u32 %v3044_v53, %v3036_v11  ;;  %v2256_v42 = vor.u32 %v3054_v20, %v3049_v57  ;;  %v3121_v19 = vld [vmem:[%s3229_s15 + $0x8] sm:$0xf0]  ;;  %1912 = vmatpush.bf16.msra.mxu2 %v2272_v61 }
 0x373   : > { %v1437_v38 = vmul.f32 %v1429_v18, %v1392_v50  ;;  %v1406_v36 = vadd.f32 3.0, %v3000_v33  ;;  %v2268_v50 = vor.u32 %v2971_v46, %v2976_v49  ;;  %v1470_v46 = vmax.f32 %v1469_v52, 0.0 }
 0x374   : > { %v2244_v62 = vor.u32 %v3068_v5, %v3073_v7  ;;  %v2248_v1 = vor.u32 %v3088_v41, %v3083_v8  ;;  %v2240_v27 = vor.u32 %v3103_v14, %v3093_v2  ;;  %v2236_v30 = vor.u32 %v3108_v31, %v3121_v19  ;;  %v1543_v18 = vld [vmem:[#allocation2 + $0x40] sm:$0x7]  ;;  %v1587_v22 = vld [vmem:[#allocation2 + $0x44] sm:$0x7] }
 0x375   : > { %1445 = vst [vmem:[#allocation2 + $0x51] sm:$0xff] %v1437_v38  ;;  %v1414_v0 = vmax.f32 %v1406_v36, 0.0  ;;  %1927 = vmatpush.bf16.msrb.mxu0 %v2268_v50  ;;  %v2232_v32 = vor.u32 %v3131_v24, %v3126_v21  ;;  %v1565_v34 = vld [vmem:[#allocation2 + $0x42] sm:$0x7]  ;;  %v1471_v35 = vmin.f32 %v1470_v46, 6.0  ;;  %v1491_v40 = vadd.f32 3.0, %v3057_v60 }
 0x376   : > { %v1513_v25 = vadd.f32 3.0, %v3076_v48  ;;  %v1531_v39 = vrot.slane %v2949_v23, 2  ;;  %v1546_v44 = vmul.f32 %v1543_v18, %v2934_v43  ;;  %v1568_v45 = vmul.f32 %v1565_v34, %v2934_v43  ;;  %v1608_v50 = vld [vmem:[#allocation2 + $0x36] sm:$0x7]  ;;  %1913 = vmatpush.bf16.msra.mxu2 %v2264_v26  ;;  %v1609_v34 = vld [vmem:[#allocation2 + $0x46] sm:$0x7] }
 0x377   : > { %v1422_v17 = vmin.f32 %v1414_v0, 6.0  ;;  %v1472_v47 = vmul.f32 0.16666667, %v1471_v35  ;;  %v1492_v38 = vmax.f32 %v1491_v40, 0.0  ;;  %v1590_v23 = vmul.f32 %v1587_v22, %v2934_v43 }
 0x378   : > { %v1396_v49 = vpop.f32.mrf.mxu1  ;;  %v1514_v36 = vmax.f32 %v1513_v25, 0.0  ;;  %v1533_v51 = vadd.f32 %v1531_v39, %v1530_v12  ;;  %v1548_v11 = vadd.f32 %v1547_v6, %v1546_v44  ;;  %v1570_v52 = vadd.f32 %v1569_v15, %v1568_v45 }
 0x379   : > { %v1430_v56 = vmul.f32 0.16666667, %v1422_v17  ;;  %v1397_v28 = vadd.f32 %v2909_v54, %v1396_v49  ;;  %1928 = vmatpush.bf16.msrb.mxu0 %v2260_v4  ;;  %v1493_v53 = vmin.f32 %v1492_v38, 6.0  ;;  %v1592_v15 = vadd.f32 %v1591_v16, %v1590_v23  ;;  %v1629_v16 = vld [vmem:[#allocation2 + $0x40] sm:$0x7] }
 0x37a   : > { %v1515_v57 = vmin.f32 %v1514_v36, 6.0  ;;  %v1534_v20 = vadd.f32 %v1533_v51, %v2954_v3  ;;  %v1550_v0 = vrot.slane %v1548_v11, 1  ;;  %v1553_v4 = vrot.slane %v1548_v11, 2  ;;  %1914 = vmatpush.bf16.msra.mxu2 %v2256_v42 }
 0x37b   : > { %v1438_v29 = vmul.f32 %v1430_v56, %v3000_v33  ;;  %v1407_v13 = vadd.f32 3.0, %v1397_v28  ;;  %v1473_v33 = vmul.f32 %v1472_v47, %v2982_v55  ;;  %v1572_v61 = vrot.slane %v1570_v52, 1 }
 0x37c   : > { %v1494_v12 = vmul.f32 0.16666667, %v1493_v53  ;;  %v1516_v6 = vmul.f32 0.16666667, %v1515_v57  ;;  %v1611_v46 = vmul.f32 %v1608_v50, %v2922_v59  ;;  %v1535_v56 = vadd.f32 3.0, %v1534_v20 }
 0x37d   : > { %1446 = vst [vmem:[#allocation2 + $0x61] sm:$0xff] %v1438_v29  ;;  %v1415_v58 = vmax.f32 %v1407_v13, 0.0  ;;  %1929 = vmatpush.bf16.msrb.mxu0 %v2252_v10  ;;  %v1552_v18 = vadd.f32 %v1550_v0, %v1548_v11  ;;  %v1574_v40 = vadd.f32 %v1572_v61, %v1570_v52  ;;  %v1575_v25 = vrot.slane %v1570_v52, 2  ;;  %v1630_v13 = vld [vmem:[#allocation2 + $0x50] sm:$0x7] }
 0x37e   : > { %1474 = vst [vmem:[#allocation3] sm:$0x1] %v1473_v33  ;;  %v1495_v35 = vmul.f32 %v1494_v12, %v3057_v60  ;;  %v1517_v26 = vmul.f32 %v1516_v6, %v3076_v48  ;;  %v1536_v22 = vmax.f32 %v1535_v56, 0.0  ;;  %v1594_v44 = vrot.slane %v1592_v15, 1  ;;  %1915 = vmatpush.bf16.msra.mxu2 %v2248_v1  ;;  %v1651_v53 = vld [vmem:[#allocation2 + $0x42] sm:$0x7] }
 0x37f   : > { %v1423_v63 = vmin.f32 %v1415_v58, 6.0  ;;  %v1555_v29 = vadd.f32 %v1553_v4, %v1552_v18  ;;  %v1597_v45 = vrot.slane %v1592_v15, 2  ;;  %v1612_v60 = vmul.f32 %v1609_v34, %v2934_v43  ;;  %v1674_v18 = vld [vmem:[#allocation2 + $0x54] sm:$0x7] }
 0x380   : > { %v1398_v17 = vpop.f32.mrf.mxu1  ;;  %1496 = vst [vmem:[#allocation3 + $0x1] sm:$0x1] %v1495_v35  ;;  %v1537_v47 = vmin.f32 %v1536_v22, 6.0  ;;  %v1613_v42 = vadd.f32 %v1611_v46, %v3061_v37  ;;  %v1596_v51 = vadd.f32 %v1594_v44, %v1592_v15  ;;  %v1632_v5 = vmul.f32 %v1629_v16, %v2917_v9 }
 0x381   : > { %v1431_v49 = vmul.f32 0.16666667, %v1423_v63  ;;  %v1399_v55 = vadd.f32 %v2909_v54, %v1398_v17  ;;  %1930 = vmatpush.bf16.msrb.mxu0 %v2244_v62  ;;  %v1577_v54 = vadd.f32 %v1575_v25, %v1574_v40  ;;  %1518 = vst [vmem:[#allocation3 + $0x2] sm:$0x1] %v1517_v26  ;;  %v1633_v7 = vmul.f32 %v1630_v13, %v2922_v59  ;;  %v1652_v17 = vld [vmem:[#allocation2 + $0x52] sm:$0x7] }
 0x382   : > { %v1538_v58 = vmul.f32 0.16666667, %v1537_v47  ;;  %v1614_v52 = vadd.f32 %v1613_v42, %v1612_v60  ;;  %v1599_v23 = vadd.f32 %v1597_v45, %v1596_v51  ;;  %1916 = vmatpush.bf16.msra.mxu2 %v2240_v27  ;;  %v1677_v16 = vmul.f32 %v1674_v18, %v2922_v59  ;;  %v1696_v13 = vld [vmem:[#allocation2 + $0x56] sm:$0x7] }
 0x383   : > { %v1439_v39 = vmul.f32 %v1431_v49, %v1397_v28  ;;  %v1408_v10 = vadd.f32 3.0, %v1399_v55  ;;  %v1556_v28 = vadd.f32 %v1555_v29, %v2954_v3  ;;  %v1578_v36 = vadd.f32 %v1577_v54, %v2954_v3 }
 0x384   : > { %v1631_v38 = vld [vmem:[#allocation2 + $0x60] sm:$0x7]  ;;  %v1635_v33 = vadd.f32 %v1633_v7, %v1632_v5  ;;  %v1539_v63 = vmul.f32 %v1538_v58, %v1534_v20  ;;  %v1616_v4 = vrot.slane %v1614_v52, 1  ;;  %v1600_v8 = vadd.f32 %v1599_v23, %v2954_v3  ;;  %v1673_v20 = vld [vmem:[#allocation2 + $0x44] sm:$0x7] }
 0x385   : > { %1447 = vst [vmem:[#allocation2 + $0x71] sm:$0xff] %v1439_v39  ;;  %v1416_v48 = vmax.f32 %v1408_v10, 0.0  ;;  %v1557_v11 = vadd.f32 3.0, %v1556_v28  ;;  %1931 = vmatpush.bf16.msrb.mxu0 %v2236_v30  ;;  %v1579_v37 = vadd.f32 3.0, %v1578_v36  ;;  %v1634_v50 = vmul.f32 %v1631_v38, %v2934_v43  ;;  %v1653_v12 = vld [vmem:[#allocation2 + $0x62] sm:$0x7] }
 0x386   : > { %v1619_v41 = vrot.slane %v1614_v52, 2  ;;  %1540 = vst [vmem:[#allocation3 + $0x3] sm:$0x1] %v1539_v63  ;;  %v1618_v19 = vadd.f32 %v1616_v4, %v1614_v52  ;;  %v1654_v30 = vmul.f32 %v1651_v53, %v2917_v9  ;;  %v1601_v46 = vadd.f32 3.0, %v1600_v8  ;;  %v1675_v2 = vld [vmem:[#allocation2 + $0x64] sm:$0x7]  ;;  %1917 = vmatpush.bf16.msra.mxu2 %v2232_v32 }
 0x387   : > { %v1424_v62 = vmin.f32 %v1416_v48, 6.0  ;;  %v1558_v0 = vmax.f32 %v1557_v11, 0.0  ;;  %v1580_v61 = vmax.f32 %v1579_v37, 0.0  ;;  %v1636_v1 = vadd.f32 %v1635_v33, %v1634_v50  ;;  %v1695_v39 = vld [vmem:[#allocation2 + $0x46] sm:$0x7] }
 0x388   : > { %v1621_v35 = vadd.f32 %v1619_v41, %v1618_v19  ;;  %v1656_v26 = vmul.f32 %v1653_v12, %v2934_v43  ;;  %v1602_v27 = vmax.f32 %v1601_v46, 0.0  ;;  %v1676_v25 = vmul.f32 %v1673_v20, %v2917_v9  ;;  %v1697_v54 = vld [vmem:[#allocation2 + $0x66] sm:$0x7]  ;;  %v1717_v24 = vld [vmem:[#allocation2 + $0x60] sm:$0x7] }
 0x389   : > { %v1432_v57 = vmul.f32 0.16666667, %v1424_v62  ;;  %v1559_v31 = vmin.f32 %v1558_v0, 6.0  ;;  %v1581_v15 = vmin.f32 %v1580_v61, 6.0  ;;  %v1638_v49 = vrot.slane %v1636_v1, 1 }
 0x38a   : > { %v1641_v56 = vrot.slane %v1636_v1, 2  ;;  %v1622_v22 = vadd.f32 %v1621_v35, %v2954_v3  ;;  %v1603_v45 = vmin.f32 %v1602_v27, 6.0  ;;  %v1678_v48 = vmul.f32 %v1675_v2, %v2934_v43  ;;  %v1739_v53 = vld [vmem:[#allocation2 + $0x62] sm:$0x7] }
 0x38b   : > { %v1440_v6 = vmul.f32 %v1432_v57, %v1399_v55  ;;  %v1560_v34 = vmul.f32 0.16666667, %v1559_v31  ;;  %v1655_v55 = vmul.f32 %v1652_v17, %v2922_v59  ;;  %v1582_v14 = vmul.f32 0.16666667, %v1581_v15 }
 0x38c   : > { %v1640_v40 = vadd.f32 %v1638_v49, %v1636_v1  ;;  %v1623_v47 = vadd.f32 3.0, %v1622_v22  ;;  %v1679_v38 = vadd.f32 %v1677_v16, %v1676_v25  ;;  %v1698_v21 = vmul.f32 %v1695_v39, %v2917_v9  ;;  %v1718_v11 = vld [vmem:[#allocation2 + $0x70] sm:$0x7]  ;;  %v1783_v25 = vld [vmem:[#allocation2 + $0x66] sm:$0x7] }
 0x38d   : > { %1448 = vst [vmem:[#allocation2 + $0x81] sm:$0xff] %v1440_v6  ;;  %v1561_v10 = vmul.f32 %v1560_v34, %v1556_v28  ;;  %v1657_v29 = vadd.f32 %v1655_v55, %v1654_v30  ;;  %v1583_v44 = vmul.f32 %v1582_v14, %v1578_v36  ;;  %v1604_v32 = vmul.f32 0.16666667, %v1603_v45  ;;  %v1740_v12 = vld [vmem:[#allocation2 + $0x72] sm:$0x7] }
 0x38e   : > { %v1643_v60 = vadd.f32 %v1641_v56, %v1640_v40  ;;  %v1699_v51 = vmul.f32 %v1696_v13, %v2922_v59  ;;  %v1700_v5 = vmul.f32 %v1697_v54, %v2934_v43  ;;  %v1624_v36 = vmax.f32 %v1623_v47, 0.0  ;;  %v1761_v56 = vld [vmem:[#allocation2 + $0x64] sm:$0x7]  ;;  %v1762_v40 = vld [vmem:[#allocation2 + $0x74] sm:$0x7] }
 0x38f   : > { %1562 = vst [vmem:[#allocation3 + $0x4] sm:$0x1] %v1561_v10  ;;  %v1658_v42 = vadd.f32 %v1657_v29, %v1656_v26  ;;  %v1680_v58 = vadd.f32 %v1679_v38, %v1678_v48  ;;  %v1605_v52 = vmul.f32 %v1604_v32, %v1600_v8  ;;  %v1720_v33 = vmul.f32 %v1717_v24, %v2917_v9  ;;  %v1784_v38 = vld [vmem:[#allocation2 + $0x76] sm:$0x7] }
 0x390   : > { %1584 = vst [vmem:[#allocation3 + $0x5] sm:$0x1] %v1583_v44  ;;  %v1644_v28 = vadd.f32 %v1643_v60, %v2954_v3  ;;  %v1701_v23 = vadd.f32 %v1699_v51, %v1698_v21  ;;  %v1625_v57 = vmin.f32 %v1624_v36, 6.0  ;;  %v1721_v1 = vmul.f32 %v1718_v11, %v2922_v59 }
 0x391   : > { %v1660_v7 = vrot.slane %v1658_v42, 1  ;;  %v1663_v62 = vrot.slane %v1658_v42, 2  ;;  %v1682_v0 = vrot.slane %v1680_v58, 1  ;;  %v1685_v4 = vrot.slane %v1680_v58, 2  ;;  %1606 = vst [vmem:[#allocation3 + $0x6] sm:$0x1] %v1605_v52 }
 0x392   : > { %v1645_v37 = vadd.f32 3.0, %v1644_v28  ;;  %v1702_v41 = vadd.f32 %v1701_v23, %v1700_v5  ;;  %v1626_v6 = vmul.f32 0.16666667, %v1625_v57  ;;  %v1742_v30 = vmul.f32 %v1739_v53, %v2917_v9 }
 0x393   : > { %v1662_v63 = vadd.f32 %v1660_v7, %v1658_v42  ;;  %v1684_v31 = vadd.f32 %v1682_v0, %v1680_v58  ;;  %v1723_v49 = vadd.f32 %v1721_v1, %v1720_v33  ;;  %v1743_v55 = vmul.f32 %v1740_v12, %v2922_v59 }
 0x394   : > { %v1719_v50 = vld [vmem:[#allocation2 + $0x80] sm:$0x7]  ;;  %v1646_v61 = vmax.f32 %v1645_v37, 0.0  ;;  %v1704_v15 = vrot.slane %v1702_v41, 1  ;;  %v1707_v46 = vrot.slane %v1702_v41, 2  ;;  %v1627_v18 = vmul.f32 %v1626_v6, %v1622_v22 }
 0x395   : > { %v1722_v17 = vmul.f32 %v1719_v50, %v2934_v43  ;;  %v1665_v8 = vadd.f32 %v1663_v62, %v1662_v63  ;;  %v1741_v19 = vld [vmem:[#allocation2 + $0x82] sm:$0x7]  ;;  %v1687_v35 = vadd.f32 %v1685_v4, %v1684_v31  ;;  %v1745_v29 = vadd.f32 %v1743_v55, %v1742_v30  ;;  %v1785_v51 = vld [vmem:[#allocation2 + $0x86] sm:$0x7] }
 0x396   : > { %v1647_v20 = vmin.f32 %v1646_v61, 6.0  ;;  %v1706_v2 = vadd.f32 %v1704_v15, %v1702_v41  ;;  %v1744_v27 = vmul.f32 %v1741_v19, %v2934_v43  ;;  %1628 = vst [vmem:[#allocation3 + $0x7] sm:$0x1] %v1627_v18  ;;  %v1763_v16 = vld [vmem:[#allocation2 + $0x84] sm:$0x7]  ;;  %v1764_v22 = vmul.f32 %v1761_v56, %v2917_v9 }
 0x397   : > { %v1666_v34 = vadd.f32 %v1665_v8, %v2954_v3  ;;  %v1724_v14 = vadd.f32 %v1723_v49, %v1722_v17  ;;  %v1688_v10 = vadd.f32 %v1687_v35, %v2954_v3  ;;  %v1765_v42 = vmul.f32 %v1762_v40, %v2922_v59 }
 0x398   : > { %v1648_v26 = vmul.f32 0.16666667, %v1647_v20  ;;  %v1709_v54 = vadd.f32 %v1707_v46, %v1706_v2  ;;  %v1746_v47 = vadd.f32 %v1745_v29, %v1744_v27  ;;  %v1766_v32 = vmul.f32 %v1763_v16, %v2934_v43 }
 0x399   : > { %v1667_v39 = vadd.f32 3.0, %v1666_v34  ;;  %v1726_v44 = vrot.slane %v1724_v14, 1  ;;  %v1729_v45 = vrot.slane %v1724_v14, 2  ;;  %v1689_v48 = vadd.f32 3.0, %v1688_v10 }
 0x39a   : > { %v1649_v13 = vmul.f32 %v1648_v26, %v1644_v28  ;;  %v1710_v21 = vadd.f32 %v1709_v54, %v2954_v3  ;;  %v1786_v5 = vmul.f32 %v1783_v25, %v2917_v9  ;;  %v1748_v7 = vrot.slane %v1746_v47, 1 }
 0x39b   : > { %v1668_v60 = vmax.f32 %v1667_v39, 0.0  ;;  %v1728_v24 = vadd.f32 %v1726_v44, %v1724_v14  ;;  %v1690_v28 = vmax.f32 %v1689_v48, 0.0  ;;  %v1751_v62 = vrot.slane %v1746_v47, 2 }
 0x39c   : > { %1650 = vst [vmem:[#allocation3 + $0x8] sm:$0x1] %v1649_v13  ;;  %v1711_v58 = vadd.f32 3.0, %v1710_v21  ;;  %v1767_v52 = vadd.f32 %v1765_v42, %v1764_v22  ;;  %v1787_v37 = vmul.f32 %v1784_v38, %v2922_v59  ;;  %v1750_v33 = vadd.f32 %v1748_v7, %v1746_v47 }
 0x39d   : > { %v1669_v36 = vmin.f32 %v1668_v60, 6.0  ;;  %v1731_v11 = vadd.f32 %v1729_v45, %v1728_v24  ;;  %v1691_v50 = vmin.f32 %v1690_v28, 6.0  ;;  %v1788_v53 = vmul.f32 %v1785_v51, %v2934_v43  ;;  %v1805_v47 = vld [vmem:[#allocation3] sm:$0xff] }
 0x39e   : > { %v1712_v57 = vmax.f32 %v1711_v58, 0.0  ;;  %v1768_v0 = vadd.f32 %v1767_v52, %v1766_v32  ;;  %v1753_v61 = vadd.f32 %v1751_v62, %v1750_v33  ;;  %v1789_v41 = vadd.f32 %v1787_v37, %v1786_v5 }
 0x39f   : > { %v1670_v23 = vmul.f32 0.16666667, %v1669_v36  ;;  %v1732_v63 = vadd.f32 %v1731_v11, %v2954_v3  ;;  %v1692_v9 = vmul.f32 0.16666667, %v1691_v50  ;;  %v2394_v52 = vmov 16.0  }
 0x3a0   : > { %v1713_v1 = vmin.f32 %v1712_v57, 6.0  ;;  %v1770_v12 = vrot.slane %v1768_v0, 1  ;;  %v1754_v59 = vadd.f32 %v1753_v61, %v2954_v3  ;;  %v1790_v8 = vadd.f32 %v1789_v41, %v1788_v53 }
 0x3a1   : > { %v1671_v4 = vmul.f32 %v1670_v23, %v1666_v34  ;;  %v1733_v17 = vadd.f32 3.0, %v1732_v63  ;;  %v1693_v6 = vmul.f32 %v1692_v9, %v1688_v10  ;;  %v1773_v43 = vrot.slane %v1768_v0, 2 }
 0x3a2   : > { %v1714_v31 = vmul.f32 0.16666667, %v1713_v1  ;;  %v1772_v30 = vadd.f32 %v1770_v12, %v1768_v0  ;;  %v1755_v20 = vadd.f32 3.0, %v1754_v59  ;;  %v1792_v15 = vrot.slane %v1790_v8, 1 }
 0x3a3   : > { %1672 = vst [vmem:[#allocation3 + $0x9] sm:$0x1] %v1671_v4  ;;  %v1734_v19 = vmax.f32 %v1733_v17, 0.0  ;;  %v1795_v35 = vrot.slane %v1790_v8, 2  ;;  %2382 = vrcp.f32 %v2394_v52 }
 0x3a4   : > { %1694 = vst [vmem:[#allocation3 + $0xa] sm:$0x1] %v1693_v6  ;;  %v1715_v46 = vmul.f32 %v1714_v31, %v1710_v21  ;;  %v1775_v56 = vadd.f32 %v1773_v43, %v1772_v30  ;;  %v1756_v18 = vmax.f32 %v1755_v20, 0.0  ;;  %v1794_v34 = vadd.f32 %v1792_v15, %v1790_v8 }
 0x3a5   : > { %v1735_v49 = vmin.f32 %v1734_v19, 6.0 }
 0x3a6   : > { %1716 = vst [vmem:[#allocation3 + $0xb] sm:$0x1] %v1715_v46  ;;  %v1776_v26 = vadd.f32 %v1775_v56, %v2954_v3  ;;  %v1757_v2 = vmin.f32 %v1756_v18, 6.0  ;;  %v1797_v14 = vadd.f32 %v1795_v35, %v1794_v34 }
 0x3a7   : > { %v1736_v55 = vmul.f32 0.16666667, %v1735_v49 }
 0x3a8   : > { %v1777_v40 = vadd.f32 3.0, %v1776_v26  ;;  %v1758_v25 = vmul.f32 0.16666667, %v1757_v2  ;;  %v1798_v39 = vadd.f32 %v1797_v14, %v2954_v3  ;;  %v1824_v3 = vld [vmem:[%s3230_s16] sm:$0x3] }
 0x3a9   : > { %v1737_v27 = vmul.f32 %v1736_v55, %v1732_v63  ;;  %v1827_v21 = vperm.slane %v1824_v3, 1  ;;  %v1826_v5 = vperm.slane %v1824_v3, 0  ;;  %v2383_v57 = vpop.eup %2382 }
 0x3aa   : > { %v1778_v10 = vmax.f32 %v1777_v40, 0.0  ;;  %v1759_v29 = vmul.f32 %v1758_v25, %v1754_v59  ;;  %v1799_v16 = vadd.f32 3.0, %v1798_v39  ;;  %v1973_v1 = vmul.f32 16.0, %v2383_v57 }
 0x3ab   : > { %1738 = vst [vmem:[#allocation3 + $0xc] sm:$0x1] %v1737_v27  ;;  %vm1977_vm1 = vweird.f32 %v2383_v57 }
 0x3ac   : > { %v1779_v22 = vmin.f32 %v1778_v10, 6.0  ;;  %1760 = vst [vmem:[#allocation3 + $0xd] sm:$0x1] %v1759_v29  ;;  %v1800_v13 = vmax.f32 %v1799_v16, 0.0  ;;  %v1974_v19 = vsub.f32 1.0, %v1973_v1  ;;  %v1987_v29 = vlaneseq }
 0x3ae   : > { %v1780_v54 = vmul.f32 0.16666667, %v1779_v22  ;;  %v1801_v44 = vmin.f32 %v1800_v13, 6.0  ;;  %v1975_v49 = vmul.f32 %v2383_v57, %v1974_v19  ;;  %vm1989_vm3 = vcmp.lt.s32.totalorder %v1987_v29, 256 }
 0x3b0   : > { %v1781_v45 = vmul.f32 %v1780_v54, %v1776_v26  ;;  %v1802_v60 = vmul.f32 0.16666667, %v1801_v44  ;;  %v1976_v55 = vadd.f32 %v2383_v57, %v1975_v49 }
 0x3b2   : > { %1782 = vst [vmem:[#allocation3 + $0xe] sm:$0x1] %v1781_v45  ;;  %v1803_v48 = vmul.f32 %v1802_v60, %v1798_v39  ;;  %v1978_v40 = vsel %vm1977_vm1, %v2383_v57, %v1976_v55 }
 0x3b4   : > { %1804 = vst [vmem:[#allocation3 + $0xf] sm:$0x1] %v1803_v48 }
 0x3bb   : > { %v1806_v42 = vld [vmem:[#allocation3 + $0x8] sm:$0xff] }
 0x3bc   : > { %v1807_v38 = vpack.c.bf16 %v1806_v42, %v1805_v47 }
 0x3be   : > { %1918 = vmatmul.bf16.vlgmr.msra.gmra.mxu2 %v1807_v38  ;;  %1932 = vmatmul.bf16.vlgmr.msrb.gmra.mxu0 %v1807_v38 }
 0x43b   : > { %v1933_v24 = vpop.f32.mrf.mxu0 }
 0x43c   : > { %v1934_v32 = vadd.f32 %v1933_v24, %v1827_v21 }
 0x43e   : > { %v1939_v51 = vadd.f32 3.0, %v1934_v32 }
 0x440   : > { %v1943_v28 = vmax.f32 %v1939_v51, 0.0 }
 0x441   : > { %v1919_v36 = vpop.f32.mrf.mxu2 }
 0x442   : > { %v1920_v7 = vadd.f32 %v1919_v36, %v1826_v5  ;;  %v1947_v37 = vmin.f32 %v1943_v28, 6.0 }
 0x443   : > { %v1935_v62 = vpop.f32.mrf.mxu0 }
 0x444   : > { %v1938_v58 = vadd.f32 3.0, %v1920_v7  ;;  %v1936_v11 = vadd.f32 %v1935_v62, %v1827_v21  ;;  %v1951_v63 = vmul.f32 0.16666667, %v1947_v37 }
 0x446   : > { %v1941_v23 = vadd.f32 3.0, %v1936_v11  ;;  %v1942_v50 = vmax.f32 %v1938_v58, 0.0  ;;  %v1955_v17 = vmul.f32 %v1951_v63, %v1934_v32 }
 0x448   : > { %v1945_v33 = vmax.f32 %v1941_v23, 0.0  ;;  %v1946_v9 = vmin.f32 %v1942_v50, 6.0 }
 0x449   : > { %v1921_v53 = vpop.f32.mrf.mxu2 }
 0x44a   : > { %v1949_v0 = vmin.f32 %v1945_v33, 6.0  ;;  %v1922_v4 = vadd.f32 %v1921_v53, %v1826_v5  ;;  %v1950_v59 = vmul.f32 0.16666667, %v1946_v9 }
 0x44c   : > { %v1953_v61 = vmul.f32 0.16666667, %v1949_v0  ;;  %v1940_v41 = vadd.f32 3.0, %v1922_v4  ;;  %v1954_v20 = vmul.f32 %v1950_v59, %v1920_v7 }
 0x44e   : > { %v1957_v12 = vmul.f32 %v1953_v61, %v1936_v11  ;;  %v1944_v6 = vmax.f32 %v1940_v41, 0.0 }
 0x450   : > { %v1965_v8 = vadd.f32 %v1957_v12, %v1955_v17  ;;  %v1948_v31 = vmin.f32 %v1944_v6, 6.0 }
 0x452   : > { %v1966_v30 = vrot.slane %v1965_v8, 4  ;;  %v1952_v43 = vmul.f32 0.16666667, %v1948_v31 }
 0x454   : > { %v1967_v15 = vadd.f32 %v1966_v30, %v1965_v8  ;;  %v1956_v46 = vmul.f32 %v1952_v43, %v1922_v4 }
 0x456   : > { %v1968_v56 = vrot.slane %v1967_v15, 2  ;;  %v1958_v18 = vadd.f32 %v1956_v46, %v1954_v20 }
 0x458   : > { %v1969_v34 = vadd.f32 %v1968_v56, %v1967_v15  ;;  %v1959_v35 = vrot.slane %v1958_v18, 4 }
 0x45a   : > { %v1970_v26 = vrot.slane %v1969_v34, 1  ;;  %v1960_v2 = vadd.f32 %v1959_v35, %v1958_v18 }
 0x45c   : > { %v1971_v14 = vadd.f32 %v1970_v26, %v1969_v34  ;;  %v1961_v27 = vrot.slane %v1960_v2, 2 }
 0x45e   : > { %v1962_v25 = vadd.f32 %v1961_v27, %v1960_v2  ;;  %v1980_v39 = vmul.f32 %v1978_v40, %v1971_v14 }
 0x460   : > { %v1963_v10 = vrot.slane %v1962_v25, 1  ;;  %v1983_v22 = vrot.slane %v1980_v39, 7 }
 0x462   : > { %v1964_v16 = vadd.f32 %v1963_v10, %v1962_v25 }
 0x464   : > { %v1979_v13 = vmul.f32 %v1978_v40, %v1964_v16 }
 0x466   : > { %v1985_v54 = vsel %vm1984_vm2, %v1979_v13, %v1983_v22 }
 0x467   : > { %1991 = vst.msk [vmem:[%s546_s26] sm:$0x3] %vm1989_vm3, %v1985_v54 }
 0x468 PF: > { %s27_s24 = sadd.s32 1, %s2390_s24  }
 0x469   : > { %p24_p4 = scmp.ge.s32.totalorder %s27_s24, 4  }
 0x46b   :  { %26 = sbr.rel (!%p24_p4) target bundleno = 3 (0x3), region = 126 }

</bundles_post_ra>
